<compile_context>
chip_gen: v7x
topology: tpu7x:2x2x1
jax: 0.10.0
libtpu: 0.0.40
codegen_flags: <defaults>
</compile_context>

<pallas_src>
import functools

import jax
import jax.numpy as jnp
import numpy as np
from jax.experimental import pallas as pl
from jax.experimental.pallas import tpu as pltpu

EPS = 1e-5
LANES = 128
VMEM_LIMIT = 48 * 1024 * 1024  # < 64 MiB physical on v7x, > default scoped limit


def _round_up(x, m):
    return ((x + m - 1) // m) * m


def _cparams():
    return pltpu.CompilerParams(dimension_semantics=("parallel",),
                                vmem_limit_bytes=VMEM_LIMIT)


# ---------------------------------------------------------------------------
# Kernels
# ---------------------------------------------------------------------------
def conv1x1_stats_kernel(x_ref, w_ref, y_ref, st_ref):
    """y = x @ w (1x1 conv over a row tile) + per-tile [sum, sum_sq] for BN."""
    y = jnp.dot(x_ref[...], w_ref[...], preferred_element_type=jnp.float32)
    y_ref[...] = y
    s1 = jnp.sum(y, axis=0, keepdims=True)
    s2 = jnp.sum(y * y, axis=0, keepdims=True)
    st_ref[...] = jnp.concatenate([s1, s2], axis=0)[None]


def bn_relu_conv3x3_stats_kernel(y1_ref, sc_ref, sh_ref, w_ref,
                                 y2_ref, st_ref, pad_ref, patch_ref):
    """relu(bn1(y1)) -> zero-halo pad -> im2col -> one 3x3 matmul + BN2 stats.

    One grid step = one batch sample.
      y1_ref   : (1, H, W, C)   conv1 output for this sample (C = padded width)
      sc/sh    : (1, C)         precomputed BN1 per-channel scale / shift
      w_ref    : (9*C, C)       conv2 weights in im2col layout (dy, dx, ci) x co
      y2_ref   : (1, H, W, C)   conv2 output
      st_ref   : (1, 2, C)      [sum, sum_sq] of y2 for this sample
      pad_ref  : (H+2, W+2, C)  VMEM scratch with a 1-pixel zero halo
      patch_ref: (H*W, 9*C)     VMEM scratch, im2col matrix
    """
    _, H, W, C = y1_ref.shape
    HW = H * W

    # bn1 (scale/shift precomputed from global batch stats) + relu
    h1 = jnp.maximum(y1_ref[0] * sc_ref[...].reshape(1, 1, C)
                     + sh_ref[...].reshape(1, 1, C), 0.0)

    # Zero ONLY the 1-pixel halo (not the full scratch), then write the interior.
    pad_ref[0:1, :, :] = jnp.zeros((1, W + 2, C), jnp.float32)
    pad_ref[H + 1:H + 2, :, :] = jnp.zeros((1, W + 2, C), jnp.float32)
    pad_ref[:, 0:1, :] = jnp.zeros((H + 2, 1, C), jnp.float32)
    pad_ref[:, W + 1:W + 2, :] = jnp.zeros((H + 2, 1, C), jnp.float32)
    pad_ref[1:H + 1, 1:W + 1, :] = h1

    # im2col: 9 shifted windows -> one (H*W, 9*C) matrix.  C is a multiple of
    # 128, so every store below lands on a lane-aligned full-width slot.
    for k in range(9):
        dy, dx = k // 3, k % 3
        patch_ref[:, k * C:(k + 1) * C] = (
            pad_ref[dy:dy + H, dx:dx + W, :].reshape(HW, C))

    # Single fat-K matmul on the MXU (K = 9*C), f32 accumulation.
    y2 = jnp.dot(patch_ref[...], w_ref[...], preferred_element_type=jnp.float32)
    y2_ref[...] = y2.reshape(1, H, W, C)
    s1 = jnp.sum(y2, axis=0, keepdims=True)
    s2 = jnp.sum(y2 * y2, axis=0, keepdims=True)
    st_ref[...] = jnp.concatenate([s1, s2], axis=0)[None]


def bn_relu_conv1x1_stats_kernel(y2_ref, sc_ref, sh_ref, w_ref, y3_ref, st_ref):
    """y3 = relu(bn2(y2)) @ w3 + per-tile [sum, sum_sq] for BN3."""
    h = jnp.maximum(y2_ref[...] * sc_ref[...] + sh_ref[...], 0.0)
    y3 = jnp.dot(h, w_ref[...], preferred_element_type=jnp.float32)
    y3_ref[...] = y3
    s1 = jnp.sum(y3, axis=0, keepdims=True)
    s2 = jnp.sum(y3 * y3, axis=0, keepdims=True)
    st_ref[...] = jnp.concatenate([s1, s2], axis=0)[None]


def bn_add_relu_kernel(y3_ref, x_ref, sc_ref, sh_ref, o_ref):
    """out = relu(bn3(y3) + identity)."""
    o_ref[...] = jnp.maximum(
        y3_ref[...] * sc_ref[...] + sh_ref[...] + x_ref[...], 0.0)


# ---------------------------------------------------------------------------
# Per-channel BN glue (tiny: shapes (ntiles, 2, C) -> (1, C))
# ---------------------------------------------------------------------------
def _bn_scale_shift(partial_stats, count, gamma, beta):
    """Fold per-tile [sum, sum_sq] partials into per-channel scale / shift.

    Training-mode BN: batch mean and *biased* variance over (N, H, W).
    One-pass variance: var = E[x^2] - E[x]^2.
    """
    s = jnp.sum(partial_stats, axis=0)                   # (2, C)
    mean = s[0] / count
    var = jnp.maximum(s[1] / count - mean * mean, 0.0)
    scale = gamma * jax.lax.rsqrt(var + EPS)
    shift = beta - mean * scale
    return scale.reshape(1, -1), shift.reshape(1, -1)


# ---------------------------------------------------------------------------
# Forward wrapper (NCHW in / NCHW out, PyTorch convention)
# ---------------------------------------------------------------------------
@functools.partial(jax.jit, static_argnames=("row_tile",))
def bottleneck_forward(x_nchw, w1, g1, b1, w2, g2, b2, w3, g3, b3, *,
                       row_tile=256):
    f32 = jnp.float32
    N, Cin, H, W = x_nchw.shape
    width = w1.shape[0]
    Cexp = w3.shape[0]
    assert w1.shape == (width, Cin, 1, 1)
    assert w2.shape == (width, width, 3, 3)
    assert w3.shape == (Cexp, width, 1, 1)
    assert Cexp == Cin, "stride=1 / downsample=None => conv3 out == in_channel"
    # TODO(synk): stride>1, groups>1 and the downsample branch are not implemented
    # (module defaults stride=1, downsample=None, groups=1 are assumed).

    Cin_p = _round_up(Cin, LANES)
    Cw_p = _round_up(width, LANES)
    Cex_p = _round_up(Cexp, LANES)
    assert Cex_p == Cin_p

    R = N * H * W
    TR = min(row_tile, R)
    while R % TR != 0:
        TR //= 2
    assert TR >= 8 and TR % 8 == 0
    nt = R // TR

    # Host-side layout prep: one NCHW->NHWC transpose and a channel pad that is
    # a no-op for real Bottleneck widths (multiples of 128).  In an NHWC
    # end-to-end network this relayout disappears entirely.
    x_nhwc = jnp.transpose(x_nchw, (0, 2, 3, 1)).astype(f32)
    x2d = jnp.pad(x_nhwc, ((0, 0),) * 3 + ((0, Cin_p - Cin),)).reshape(R, Cin_p)

    # Conv weights -> matmul layouts, zero-padded to lane multiples.
    # NOTE: matmul inputs are kept f32 for bit-parity with the f32 reference;
    # casting patches/weights to bf16 (f32 accumulation) is a further ~2x MXU win.
    w1m = jnp.pad(jnp.transpose(w1[:, :, 0, 0], (1, 0)).astype(f32),
                  ((0, Cin_p - Cin), (0, Cw_p - width)))                    # (Cin_p, Cw_p)
    w2m = jnp.pad(jnp.transpose(w2, (2, 3, 1, 0)).astype(f32),
                  ((0, 0), (0, 0), (0, Cw_p - width), (0, Cw_p - width))
                  ).reshape(9 * Cw_p, Cw_p)                                 # (9*Cw_p, Cw_p)
    w3m = jnp.pad(jnp.transpose(w3[:, :, 0, 0], (1, 0)).astype(f32),
                  ((0, Cw_p - width), (0, Cex_p - Cexp)))                   # (Cw_p, Cex_p)

    g1p = jnp.pad(g1.astype(f32), (0, Cw_p - width))
    b1p = jnp.pad(b1.astype(f32), (0, Cw_p - width))
    g2p = jnp.pad(g2.astype(f32), (0, Cw_p - width))
    b2p = jnp.pad(b2.astype(f32), (0, Cw_p - width))
    g3p = jnp.pad(g3.astype(f32), (0, Cex_p - Cexp))
    b3p = jnp.pad(b3.astype(f32), (0, Cex_p - Cexp))

    # TODO(synk): BatchNorm running-stats momentum update is a training side
    # effect with no contribution to the forward output; it is not modeled.

    # ---- call 1: conv1 (1x1) + BN1 partial stats, tiled over rows ----------
    y1_flat, st1 = pl.pallas_call(
        conv1x1_stats_kernel,
        grid=(nt,),
        in_specs=[pl.BlockSpec((TR, Cin_p), lambda i: (i, 0)),
                  pl.BlockSpec((Cin_p, Cw_p), lambda i: (0, 0))],
        out_specs=[pl.BlockSpec((TR, Cw_p), lambda i: (i, 0)),
                   pl.BlockSpec((1, 2, Cw_p), lambda i: (i, 0, 0))],
        out_shape=[jax.ShapeDtypeStruct((R, Cw_p), f32),
                   jax.ShapeDtypeStruct((nt, 2, Cw_p), f32)],
        compiler_params=_cparams(),
        cost_estimate=pl.CostEstimate(
            flops=2 * R * Cin_p * Cw_p, transcendentals=0,
            bytes_accessed=4 * (R * Cin_p + Cin_p * Cw_p + R * Cw_p)),
    )(x2d, w1m)
    sc1, sh1 = _bn_scale_shift(st1, R, g1p, b1p)

    # ---- call 2: bn1+relu -> im2col -> conv2 (3x3) + BN2 stats, per sample --
    y1 = y1_flat.reshape(N, H, W, Cw_p)
    y2, st2 = pl.pallas_call(
        bn_relu_conv3x3_stats_kernel,
        grid=(N,),
        in_specs=[pl.BlockSpec((1, H, W, Cw_p), lambda n: (n, 0, 0, 0)),
                  pl.BlockSpec((1, Cw_p), lambda n: (0, 0)),
                  pl.BlockSpec((1, Cw_p), lambda n: (0, 0)),
                  pl.BlockSpec((9 * Cw_p, Cw_p), lambda n: (0, 0))],
        out_specs=[pl.BlockSpec((1, H, W, Cw_p), lambda n: (n, 0, 0, 0)),
                   pl.BlockSpec((1, 2, Cw_p), lambda n: (n, 0, 0))],
        out_shape=[jax.ShapeDtypeStruct((N, H, W, Cw_p), f32),
                   jax.ShapeDtypeStruct((N, 2, Cw_p), f32)],
        scratch_shapes=[pltpu.VMEM((H + 2, W + 2, Cw_p), f32),
                        pltpu.VMEM((H * W, 9 * Cw_p), f32)],
        compiler_params=_cparams(),
        cost_estimate=pl.CostEstimate(
            flops=2 * N * H * W * 9 * Cw_p * Cw_p, transcendentals=0,
            bytes_accessed=4 * (2 * N * H * W * Cw_p + 9 * Cw_p * Cw_p)),
    )(y1, sc1, sh1, w2m)
    sc2, sh2 = _bn_scale_shift(st2, R, g2p, b2p)

    # ---- call 3: bn2+relu -> conv3 (1x1) + BN3 partial stats, row tiles -----
    y3, st3 = pl.pallas_call(
        bn_relu_conv1x1_stats_kernel,
        grid=(nt,),
        in_specs=[pl.BlockSpec((TR, Cw_p), lambda i: (i, 0)),
                  pl.BlockSpec((1, Cw_p), lambda i: (0, 0)),
                  pl.BlockSpec((1, Cw_p), lambda i: (0, 0)),
                  pl.BlockSpec((Cw_p, Cex_p), lambda i: (0, 0))],
        out_specs=[pl.BlockSpec((TR, Cex_p), lambda i: (i, 0)),
                   pl.BlockSpec((1, 2, Cex_p), lambda i: (i, 0, 0))],
        out_shape=[jax.ShapeDtypeStruct((R, Cex_p), f32),
                   jax.ShapeDtypeStruct((nt, 2, Cex_p), f32)],
        compiler_params=_cparams(),
        cost_estimate=pl.CostEstimate(
            flops=2 * R * Cw_p * Cex_p, transcendentals=0,
            bytes_accessed=4 * (R * Cw_p + Cw_p * Cex_p + R * Cex_p)),
    )(y2.reshape(R, Cw_p), sc2, sh2, w3m)
    sc3, sh3 = _bn_scale_shift(st3, R, g3p, b3p)

    # ---- call 4: bn3 + residual add + relu, row tiles ------------------------
    out2d = pl.pallas_call(
        bn_add_relu_kernel,
        grid=(nt,),
        in_specs=[pl.BlockSpec((TR, Cex_p), lambda i: (i, 0)),
                  pl.BlockSpec((TR, Cex_p), lambda i: (i, 0)),
                  pl.BlockSpec((1, Cex_p), lambda i: (0, 0)),
                  pl.BlockSpec((1, Cex_p), lambda i: (0, 0))],
        out_specs=pl.BlockSpec((TR, Cex_p), lambda i: (i, 0)),
        out_shape=jax.ShapeDtypeStruct((R, Cex_p), f32),
        compiler_params=_cparams(),
        cost_estimate=pl.CostEstimate(
            flops=3 * R * Cex_p, transcendentals=0,
            bytes_accessed=4 * 3 * R * Cex_p),
    )(y3, x2d, sc3, sh3)

    out = out2d.reshape(N, H, W, Cex_p)[..., :Cexp]
    return jnp.transpose(out, (0, 3, 1, 2))


# ---------------------------------------------------------------------------
# Pure-JAX reference (NCHW), mirrors the PyTorch Bottleneck in training mode
# ---------------------------------------------------------------------------
def bottleneck_reference(x, w1, g1, b1, w2, g2, b2, w3, g3, b3):
    def conv(z, w, pad):
        dn = jax.lax.conv_dimension_numbers(z.shape, w.shape,
                                            ("NCHW", "OIHW", "NCHW"))
        return jax.lax.conv_general_dilated(
            z, w, (1, 1), ((pad, pad), (pad, pad)), dimension_numbers=dn,
            precision=jax.lax.Precision.HIGHEST)

    def bn(z, g, b):
        mu = z.mean(axis=(0, 2, 3), keepdims=True)
        var = ((z - mu) ** 2).mean(axis=(0, 2, 3), keepdims=True)
        return (z - mu) / jnp.sqrt(var + EPS) * g.reshape(1, -1, 1, 1) \
            + b.reshape(1, -1, 1, 1)

    out = jax.nn.relu(bn(conv(x, w1, 0), g1, b1))
    out = jax.nn.relu(bn(conv(out, w2, 1), g2, b2))
    out = bn(conv(out, w3, 0), g3, b3) + x
    return jax.nn.relu(out)


if __name__ == "__main__":
    # Bottleneck(in_channel=16, out_channel=4) with module defaults:
    #   width = 4, conv3 outputs out_channel * expansion = 16 = in_channel,
    #   stride=1, downsample=None -> identity residual is valid.
    N, Cin, Cout, H, W = 2, 16, 4, 16, 16
    width = Cout            # groups=1, width_per_group=64
    Cexp = Cout * 4         # == Cin

    key = jax.random.PRNGKey(0)
    ks = jax.random.split(key, 10)
    x = jax.random.normal(ks[0], (N, Cin, H, W), jnp.float32)
    w1 = 0.2 * jax.random.normal(ks[1], (width, Cin, 1, 1), jnp.float32)
    w2 = 0.2 * jax.random.normal(ks[2], (width, width, 3, 3), jnp.float32)
    w3 = 0.2 * jax.random.normal(ks[3], (Cexp, width, 1, 1), jnp.float32)
    g1 = 1.0 + 0.1 * jax.random.normal(ks[4], (width,), jnp.float32)
    b1 = 0.1 * jax.random.normal(ks[5], (width,), jnp.float32)
    g2 = 1.0 + 0.1 * jax.random.normal(ks[6], (width,), jnp.float32)
    b2 = 0.1 * jax.random.normal(ks[7], (width,), jnp.float32)
    g3 = 1.0 + 0.1 * jax.random.normal(ks[8], (Cexp,), jnp.float32)
    b3 = 0.1 * jax.random.normal(ks[9], (Cexp,), jnp.float32)

    out = bottleneck_forward(x, w1, g1, b1, w2, g2, b2, w3, g3, b3)
    out = jax.block_until_ready(out)

    ref = jax.block_until_ready(
        bottleneck_reference(x, w1, g1, b1, w2, g2, b2, w3, g3, b3))

    np.testing.assert_allclose(np.asarray(out), np.asarray(ref),
                               rtol=5e-4, atol=5e-4)
    print("KERNEL_OK")
</pallas_src>

<mosaic_0001>
module attributes {stable_mosaic.version = 11 : i64} {
  func.func @conv1x1_stats_kernel(%arg0: i32, %arg1: memref<256x128xf32, #tpu.memory_space<vmem>>, %arg2: memref<128x128xf32, #tpu.memory_space<vmem>>, %arg3: memref<256x128xf32, #tpu.memory_space<vmem>>, %arg4: memref<1x2x128xf32, #tpu.memory_space<vmem>>) attributes {dimension_semantics = [#tpu.dimension_semantics<parallel>], iteration_bounds = array<i64: 2>, scalar_prefetch = 0 : i64, scratch_operands = 0 : i64, tpu.core_type = #tpu.core_type<tc>, window_params = [{transform_indices = @transform_0, window_bounds = array<i64: 256, 128>}, {pipeline_mode = #tpu.pipeline_mode<synchronous>, transform_indices = @transform_1, window_bounds = array<i64: 128, 128>}, {transform_indices = @transform_2, window_bounds = array<i64: 256, 128>}, {transform_indices = @transform_3, window_bounds = array<i64: 1, 2, 128>}]} {
    %c0 = arith.constant 0 : index
    %c0_0 = arith.constant 0 : index
    %0 = vector.load %arg1[%c0, %c0_0] : memref<256x128xf32, #tpu.memory_space<vmem>>, vector<256x128xf32>
    %c0_1 = arith.constant 0 : index
    %c0_2 = arith.constant 0 : index
    %1 = vector.load %arg2[%c0_1, %c0_2] : memref<128x128xf32, #tpu.memory_space<vmem>>, vector<128x128xf32>
    %cst = arith.constant dense<0.000000e+00> : vector<256x128xf32>
    %2 = tpu.matmul %0, %1, %cst {dimension_numbers = #tpu.dot_dimension_numbers<[1], [0], [0], [1], [0, 0, 1, 1], [], []>} : vector<256x128xf32>, vector<128x128xf32>, vector<256x128xf32> -> vector<256x128xf32>
    %c0_3 = arith.constant 0 : index
    %c0_4 = arith.constant 0 : index
    %3 = vector.load %arg3[%c0_3, %c0_4] : memref<256x128xf32, #tpu.memory_space<vmem>>, vector<256x128xf32>
    tpu.vector_store %arg3[%c0_3, %c0_4], %2 {strides = array<i32>} : memref<256x128xf32, #tpu.memory_space<vmem>>, vector<256x128xf32>,
    %cst_5 = arith.constant dense<0.000000e+00> : vector<128xf32>
    %4 = vector.multi_reduction <add>, %2, %cst_5 [0] : vector<256x128xf32> to vector<128xf32>
    %5 = vector.shape_cast %4 : vector<128xf32> to vector<1x128xf32>
    %6 = arith.mulf %2, %2 : vector<256x128xf32>
    %cst_6 = arith.constant dense<0.000000e+00> : vector<128xf32>
    %7 = vector.multi_reduction <add>, %6, %cst_6 [0] : vector<256x128xf32> to vector<128xf32>
    %8 = vector.shape_cast %7 : vector<128xf32> to vector<1x128xf32>
    %9 = tpu.concatenate %5, %8 in 0 : vector<1x128xf32>, vector<1x128xf32> -> vector<2x128xf32>
    %10 = vector.shape_cast %9 : vector<2x128xf32> to vector<1x2x128xf32>
    %c0_7 = arith.constant 0 : index
    %c0_8 = arith.constant 0 : index
    %c0_9 = arith.constant 0 : index
    %11 = vector.load %arg4[%c0_7, %c0_8, %c0_9] : memref<1x2x128xf32, #tpu.memory_space<vmem>>, vector<1x2x128xf32>
    tpu.vector_store %arg4[%c0_7, %c0_8, %c0_9], %10 {strides = array<i32>} : memref<1x2x128xf32, #tpu.memory_space<vmem>>, vector<1x2x128xf32>,
    return
  }
  func.func @transform_0(%arg0: i32) -> (i32, i32) {
    %c0_i32 = arith.constant 0 : i32
    %c0_i32_0 = arith.constant 0 : i32
    return %arg0, %c0_i32 : i32, i32
  }
  func.func @transform_1(%arg0: i32) -> (i32, i32) {
    %c0_i32 = arith.constant 0 : i32
    %c0_i32_0 = arith.constant 0 : i32
    %c0_i32_1 = arith.constant 0 : i32
    return %c0_i32, %c0_i32_0 : i32, i32
  }
  func.func @transform_2(%arg0: i32) -> (i32, i32) {
    %c0_i32 = arith.constant 0 : i32
    %c0_i32_0 = arith.constant 0 : i32
    return %arg0, %c0_i32 : i32, i32
  }
  func.func @transform_3(%arg0: i32) -> (i32, i32, i32) {
    %c0_i32 = arith.constant 0 : i32
    %c0_i32_0 = arith.constant 0 : i32
    %c0_i32_1 = arith.constant 0 : i32
    return %arg0, %c0_i32, %c0_i32_0 : i32, i32, i32
  }
}

module attributes {stable_mosaic.version = 11 : i64} {
  func.func @bn_relu_conv3x3_stats_kernel(%arg0: i32, %arg1: memref<1x16x16x128xf32, #tpu.memory_space<vmem>>, %arg2: memref<1x128xf32, #tpu.memory_space<vmem>>, %arg3: memref<1x128xf32, #tpu.memory_space<vmem>>, %arg4: memref<1152x128xf32, #tpu.memory_space<vmem>>, %arg5: memref<1x16x16x128xf32, #tpu.memory_space<vmem>>, %arg6: memref<1x2x128xf32, #tpu.memory_space<vmem>>, %arg7: memref<18x18x128xf32, #tpu.memory_space<vmem>>, %arg8: memref<256x1152xf32, #tpu.memory_space<vmem>>) attributes {dimension_semantics = [#tpu.dimension_semantics<parallel>], iteration_bounds = array<i64: 2>, scalar_prefetch = 0 : i64, scratch_operands = 2 : i64, tpu.core_type = #tpu.core_type<tc>, window_params = [{transform_indices = @transform_0, window_bounds = array<i64: 1, 16, 16, 128>}, {pipeline_mode = #tpu.pipeline_mode<synchronous>, transform_indices = @transform_1, window_bounds = array<i64: 1, 128>}, {pipeline_mode = #tpu.pipeline_mode<synchronous>, transform_indices = @transform_2, window_bounds = array<i64: 1, 128>}, {pipeline_mode = #tpu.pipeline_mode<synchronous>, transform_indices = @transform_3, window_bounds = array<i64: 1152, 128>}, {transform_indices = @transform_4, window_bounds = array<i64: 1, 16, 16, 128>}, {transform_indices = @transform_5, window_bounds = array<i64: 1, 2, 128>}]} {
    %c0 = arith.constant 0 : index
    %c0_0 = arith.constant 0 : index
    %c0_1 = arith.constant 0 : index
    %c0_2 = arith.constant 0 : index
    %0 = vector.load %arg1[%c0, %c0_0, %c0_1, %c0_2] : memref<1x16x16x128xf32, #tpu.memory_space<vmem>>, vector<1x16x16x128xf32>
    %1 = vector.shape_cast %0 : vector<1x16x16x128xf32> to vector<16x16x128xf32>
    %c0_3 = arith.constant 0 : index
    %c0_4 = arith.constant 0 : index
    %2 = vector.load %arg2[%c0_3, %c0_4] : memref<1x128xf32, #tpu.memory_space<vmem>>, vector<1x128xf32>
    %3 = vector.shape_cast %2 : vector<1x128xf32> to vector<1x1x128xf32>
    %4 = vector.broadcast %3 : vector<1x1x128xf32> to vector<16x16x128xf32>
    %5 = arith.mulf %1, %4 : vector<16x16x128xf32>
    %c0_5 = arith.constant 0 : index
    %c0_6 = arith.constant 0 : index
    %6 = vector.load %arg3[%c0_5, %c0_6] : memref<1x128xf32, #tpu.memory_space<vmem>>, vector<1x128xf32>
    %7 = vector.shape_cast %6 : vector<1x128xf32> to vector<1x1x128xf32>
    %8 = vector.broadcast %7 : vector<1x1x128xf32> to vector<16x16x128xf32>
    %9 = arith.addf %5, %8 : vector<16x16x128xf32>
    %cst = arith.constant 0.000000e+00 : f32
    %10 = vector.broadcast %cst : f32 to vector<16x16x128xf32>
    %11 = arith.maximumf %9, %10 : vector<16x16x128xf32>
    %cst_7 = arith.constant 0.000000e+00 : f32
    %12 = vector.broadcast %cst_7 : f32 to vector<1x18x128xf32>
    %c0_8 = arith.constant 0 : index
    %c0_9 = arith.constant 0 : index
    %c0_10 = arith.constant 0 : index
    %13 = vector.load %arg7[%c0_8, %c0_9, %c0_10] : memref<18x18x128xf32, #tpu.memory_space<vmem>>, vector<1x18x128xf32>
    tpu.vector_store %arg7[%c0_8, %c0_9, %c0_10], %12 {strides = array<i32>} : memref<18x18x128xf32, #tpu.memory_space<vmem>>, vector<1x18x128xf32>,
    %cst_11 = arith.constant 0.000000e+00 : f32
    %14 = vector.broadcast %cst_11 : f32 to vector<1x18x128xf32>
    %c17 = arith.constant 17 : index
    %c0_12 = arith.constant 0 : index
    %c0_13 = arith.constant 0 : index
    %15 = vector.load %arg7[%c17, %c0_12, %c0_13] : memref<18x18x128xf32, #tpu.memory_space<vmem>>, vector<1x18x128xf32>
    tpu.vector_store %arg7[%c17, %c0_12, %c0_13], %14 {strides = array<i32>} : memref<18x18x128xf32, #tpu.memory_space<vmem>>, vector<1x18x128xf32>,
    %cst_14 = arith.constant 0.000000e+00 : f32
    %16 = vector.broadcast %cst_14 : f32 to vector<18x1x128xf32>
    %c0_15 = arith.constant 0 : index
    %c0_16 = arith.constant 0 : index
    %c0_17 = arith.constant 0 : index
    %17 = vector.load %arg7[%c0_15, %c0_16, %c0_17] : memref<18x18x128xf32, #tpu.memory_space<vmem>>, vector<18x1x128xf32>
    tpu.vector_store %arg7[%c0_15, %c0_16, %c0_17], %16 {strides = array<i32>} : memref<18x18x128xf32, #tpu.memory_space<vmem>>, vector<18x1x128xf32>,
    %cst_18 = arith.constant 0.000000e+00 : f32
    %18 = vector.broadcast %cst_18 : f32 to vector<18x1x128xf32>
    %c0_19 = arith.constant 0 : index
    %c17_20 = arith.constant 17 : index
    %c0_21 = arith.constant 0 : index
    %19 = vector.load %arg7[%c0_19, %c17_20, %c0_21] : memref<18x18x128xf32, #tpu.memory_space<vmem>>, vector<18x1x128xf32>
    tpu.vector_store %arg7[%c0_19, %c17_20, %c0_21], %18 {strides = array<i32>} : memref<18x18x128xf32, #tpu.memory_space<vmem>>, vector<18x1x128xf32>,
    %c1 = arith.constant 1 : index
    %c1_22 = arith.constant 1 : index
    %c0_23 = arith.constant 0 : index
    %20 = vector.load %arg7[%c1, %c1_22, %c0_23] : memref<18x18x128xf32, #tpu.memory_space<vmem>>, vector<16x16x128xf32>
    tpu.vector_store %arg7[%c1, %c1_22, %c0_23], %11 {strides = array<i32>} : memref<18x18x128xf32, #tpu.memory_space<vmem>>, vector<16x16x128xf32>,
    %c0_24 = arith.constant 0 : index
    %c0_25 = arith.constant 0 : index
    %c0_26 = arith.constant 0 : index
    %21 = vector.load %arg7[%c0_24, %c0_25, %c0_26] : memref<18x18x128xf32, #tpu.memory_space<vmem>>, vector<16x16x128xf32>
    %22 = vector.shape_cast %21 : vector<16x16x128xf32> to vector<256x128xf32>
    %c0_27 = arith.constant 0 : index
    %c0_28 = arith.constant 0 : index
    %23 = vector.load %arg8[%c0_27, %c0_28] : memref<256x1152xf32, #tpu.memory_space<vmem>>, vector<256x128xf32>
    tpu.vector_store %arg8[%c0_27, %c0_28], %22 {strides = array<i32>} : memref<256x1152xf32, #tpu.memory_space<vmem>>, vector<256x128xf32>,
    %c0_29 = arith.constant 0 : index
    %c1_30 = arith.constant 1 : index
    %c0_31 = arith.constant 0 : index
    %24 = vector.load %arg7[%c0_29, %c1_30, %c0_31] : memref<18x18x128xf32, #tpu.memory_space<vmem>>, vector<16x16x128xf32>
    %25 = vector.shape_cast %24 : vector<16x16x128xf32> to vector<256x128xf32>
    %c0_32 = arith.constant 0 : index
    %c128 = arith.constant 128 : index
    %26 = vector.load %arg8[%c0_32, %c128] : memref<256x1152xf32, #tpu.memory_space<vmem>>, vector<256x128xf32>
    tpu.vector_store %arg8[%c0_32, %c128], %25 {strides = array<i32>} : memref<256x1152xf32, #tpu.memory_space<vmem>>, vector<256x128xf32>,
    %c0_33 = arith.constant 0 : index
    %c2 = arith.constant 2 : index
    %c0_34 = arith.constant 0 : index
    %27 = vector.load %arg7[%c0_33, %c2, %c0_34] : memref<18x18x128xf32, #tpu.memory_space<vmem>>, vector<16x16x128xf32>
    %28 = vector.shape_cast %27 : vector<16x16x128xf32> to vector<256x128xf32>
    %c0_35 = arith.constant 0 : index
    %c256 = arith.constant 256 : index
    %29 = vector.load %arg8[%c0_35, %c256] : memref<256x1152xf32, #tpu.memory_space<vmem>>, vector<256x128xf32>
    tpu.vector_store %arg8[%c0_35, %c256], %28 {strides = array<i32>} : memref<256x1152xf32, #tpu.memory_space<vmem>>, vector<256x128xf32>,
    %c1_36 = arith.constant 1 : index
    %c0_37 = arith.constant 0 : index
    %c0_38 = arith.constant 0 : index
    %30 = vector.load %arg7[%c1_36, %c0_37, %c0_38] : memref<18x18x128xf32, #tpu.memory_space<vmem>>, vector<16x16x128xf32>
    %31 = vector.shape_cast %30 : vector<16x16x128xf32> to vector<256x128xf32>
    %c0_39 = arith.constant 0 : index
    %c384 = arith.constant 384 : index
    %32 = vector.load %arg8[%c0_39, %c384] : memref<256x1152xf32, #tpu.memory_space<vmem>>, vector<256x128xf32>
    tpu.vector_store %arg8[%c0_39, %c384], %31 {strides = array<i32>} : memref<256x1152xf32, #tpu.memory_space<vmem>>, vector<256x128xf32>,
    %c1_40 = arith.constant 1 : index
    %c1_41 = arith.constant 1 : index
    %c0_42 = arith.constant 0 : index
    %33 = vector.load %arg7[%c1_40, %c1_41, %c0_42] : memref<18x18x128xf32, #tpu.memory_space<vmem>>, vector<16x16x128xf32>
    %34 = vector.shape_cast %33 : vector<16x16x128xf32> to vector<256x128xf32>
    %c0_43 = arith.constant 0 : index
    %c512 = arith.constant 512 : index
    %35 = vector.load %arg8[%c0_43, %c512] : memref<256x1152xf32, #tpu.memory_space<vmem>>, vector<256x128xf32>
    tpu.vector_store %arg8[%c0_43, %c512], %34 {strides = array<i32>} : memref<256x1152xf32, #tpu.memory_space<vmem>>, vector<256x128xf32>,
    %c1_44 = arith.constant 1 : index
    %c2_45 = arith.constant 2 : index
    %c0_46 = arith.constant 0 : index
    %36 = vector.load %arg7[%c1_44, %c2_45, %c0_46] : memref<18x18x128xf32, #tpu.memory_space<vmem>>, vector<16x16x128xf32>
    %37 = vector.shape_cast %36 : vector<16x16x128xf32> to vector<256x128xf32>
    %c0_47 = arith.constant 0 : index
    %c640 = arith.constant 640 : index
    %38 = vector.load %arg8[%c0_47, %c640] : memref<256x1152xf32, #tpu.memory_space<vmem>>, vector<256x128xf32>
    tpu.vector_store %arg8[%c0_47, %c640], %37 {strides = array<i32>} : memref<256x1152xf32, #tpu.memory_space<vmem>>, vector<256x128xf32>,
    %c2_48 = arith.constant 2 : index
    %c0_49 = arith.constant 0 : index
    %c0_50 = arith.constant 0 : index
    %39 = vector.load %arg7[%c2_48, %c0_49, %c0_50] : memref<18x18x128xf32, #tpu.memory_space<vmem>>, vector<16x16x128xf32>
    %40 = vector.shape_cast %39 : vector<16x16x128xf32> to vector<256x128xf32>
    %c0_51 = arith.constant 0 : index
    %c768 = arith.constant 768 : index
    %41 = vector.load %arg8[%c0_51, %c768] : memref<256x1152xf32, #tpu.memory_space<vmem>>, vector<256x128xf32>
    tpu.vector_store %arg8[%c0_51, %c768], %40 {strides = array<i32>} : memref<256x1152xf32, #tpu.memory_space<vmem>>, vector<256x128xf32>,
    %c2_52 = arith.constant 2 : index
    %c1_53 = arith.constant 1 : index
    %c0_54 = arith.constant 0 : index
    %42 = vector.load %arg7[%c2_52, %c1_53, %c0_54] : memref<18x18x128xf32, #tpu.memory_space<vmem>>, vector<16x16x128xf32>
    %43 = vector.shape_cast %42 : vector<16x16x128xf32> to vector<256x128xf32>
    %c0_55 = arith.constant 0 : index
    %c896 = arith.constant 896 : index
    %44 = vector.load %arg8[%c0_55, %c896] : memref<256x1152xf32, #tpu.memory_space<vmem>>, vector<256x128xf32>
    tpu.vector_store %arg8[%c0_55, %c896], %43 {strides = array<i32>} : memref<256x1152xf32, #tpu.memory_space<vmem>>, vector<256x128xf32>,
    %c2_56 = arith.constant 2 : index
    %c2_57 = arith.constant 2 : index
    %c0_58 = arith.constant 0 : index
    %45 = vector.load %arg7[%c2_56, %c2_57, %c0_58] : memref<18x18x128xf32, #tpu.memory_space<vmem>>, vector<16x16x128xf32>
    %46 = vector.shape_cast %45 : vector<16x16x128xf32> to vector<256x128xf32>
    %c0_59 = arith.constant 0 : index
    %c1024 = arith.constant 1024 : index
    %47 = vector.load %arg8[%c0_59, %c1024] : memref<256x1152xf32, #tpu.memory_space<vmem>>, vector<256x128xf32>
    tpu.vector_store %arg8[%c0_59, %c1024], %46 {strides = array<i32>} : memref<256x1152xf32, #tpu.memory_space<vmem>>, vector<256x128xf32>,
    %c0_60 = arith.constant 0 : index
    %c0_61 = arith.constant 0 : index
    %48 = vector.load %arg8[%c0_60, %c0_61] : memref<256x1152xf32, #tpu.memory_space<vmem>>, vector<256x1152xf32>
    %c0_62 = arith.constant 0 : index
    %c0_63 = arith.constant 0 : index
    %49 = vector.load %arg4[%c0_62, %c0_63] : memref<1152x128xf32, #tpu.memory_space<vmem>>, vector<1152x128xf32>
    %cst_64 = arith.constant dense<0.000000e+00> : vector<256x128xf32>
    %50 = tpu.matmul %48, %49, %cst_64 {dimension_numbers = #tpu.dot_dimension_numbers<[1], [0], [0], [1], [0, 0, 1, 1], [], []>} : vector<256x1152xf32>, vector<1152x128xf32>, vector<256x128xf32> -> vector<256x128xf32>
    %51 = vector.shape_cast %50 : vector<256x128xf32> to vector<1x16x16x128xf32>
    %c0_65 = arith.constant 0 : index
    %c0_66 = arith.constant 0 : index
    %c0_67 = arith.constant 0 : index
    %c0_68 = arith.constant 0 : index
    %52 = vector.load %arg5[%c0_65, %c0_66, %c0_67, %c0_68] : memref<1x16x16x128xf32, #tpu.memory_space<vmem>>, vector<1x16x16x128xf32>
    tpu.vector_store %arg5[%c0_65, %c0_66, %c0_67, %c0_68], %51 {strides = array<i32>} : memref<1x16x16x128xf32, #tpu.memory_space<vmem>>, vector<1x16x16x128xf32>,
    %cst_69 = arith.constant dense<0.000000e+00> : vector<128xf32>
    %53 = vector.multi_reduction <add>, %50, %cst_69 [0] : vector<256x128xf32> to vector<128xf32>
    %54 = vector.shape_cast %53 : vector<128xf32> to vector<1x128xf32>
    %55 = arith.mulf %50, %50 : vector<256x128xf32>
    %cst_70 = arith.constant dense<0.000000e+00> : vector<128xf32>
    %56 = vector.multi_reduction <add>, %55, %cst_70 [0] : vector<256x128xf32> to vector<128xf32>
    %57 = vector.shape_cast %56 : vector<128xf32> to vector<1x128xf32>
    %58 = tpu.concatenate %54, %57 in 0 : vector<1x128xf32>, vector<1x128xf32> -> vector<2x128xf32>
    %59 = vector.shape_cast %58 : vector<2x128xf32> to vector<1x2x128xf32>
    %c0_71 = arith.constant 0 : index
    %c0_72 = arith.constant 0 : index
    %c0_73 = arith.constant 0 : index
    %60 = vector.load %arg6[%c0_71, %c0_72, %c0_73] : memref<1x2x128xf32, #tpu.memory_space<vmem>>, vector<1x2x128xf32>
    tpu.vector_store %arg6[%c0_71, %c0_72, %c0_73], %59 {strides = array<i32>} : memref<1x2x128xf32, #tpu.memory_space<vmem>>, vector<1x2x128xf32>,
    return
  }
  func.func @transform_0(%arg0: i32) -> (i32, i32, i32, i32) {
    %c0_i32 = arith.constant 0 : i32
    %c0_i32_0 = arith.constant 0 : i32
    %c0_i32_1 = arith.constant 0 : i32
    %c0_i32_2 = arith.constant 0 : i32
    return %arg0, %c0_i32, %c0_i32_0, %c0_i32_1 : i32, i32, i32, i32
  }
  func.func @transform_1(%arg0: i32) -> (i32, i32) {
    %c0_i32 = arith.constant 0 : i32
    %c0_i32_0 = arith.constant 0 : i32
    %c0_i32_1 = arith.constant 0 : i32
    return %c0_i32, %c0_i32_0 : i32, i32
  }
  func.func @transform_2(%arg0: i32) -> (i32, i32) {
    %c0_i32 = arith.constant 0 : i32
    %c0_i32_0 = arith.constant 0 : i32
    %c0_i32_1 = arith.constant 0 : i32
    return %c0_i32, %c0_i32_0 : i32, i32
  }
  func.func @transform_3(%arg0: i32) -> (i32, i32) {
    %c0_i32 = arith.constant 0 : i32
    %c0_i32_0 = arith.constant 0 : i32
    %c0_i32_1 = arith.constant 0 : i32
    return %c0_i32, %c0_i32_0 : i32, i32
  }
  func.func @transform_4(%arg0: i32) -> (i32, i32, i32, i32) {
    %c0_i32 = arith.constant 0 : i32
    %c0_i32_0 = arith.constant 0 : i32
    %c0_i32_1 = arith.constant 0 : i32
    %c0_i32_2 = arith.constant 0 : i32
    return %arg0, %c0_i32, %c0_i32_0, %c0_i32_1 : i32, i32, i32, i32
  }
  func.func @transform_5(%arg0: i32) -> (i32, i32, i32) {
    %c0_i32 = arith.constant 0 : i32
    %c0_i32_0 = arith.constant 0 : i32
    %c0_i32_1 = arith.constant 0 : i32
    return %arg0, %c0_i32, %c0_i32_0 : i32, i32, i32
  }
}

module attributes {stable_mosaic.version = 11 : i64} {
  func.func @bn_relu_conv1x1_stats_kernel(%arg0: i32, %arg1: memref<256x128xf32, #tpu.memory_space<vmem>>, %arg2: memref<1x128xf32, #tpu.memory_space<vmem>>, %arg3: memref<1x128xf32, #tpu.memory_space<vmem>>, %arg4: memref<128x128xf32, #tpu.memory_space<vmem>>, %arg5: memref<256x128xf32, #tpu.memory_space<vmem>>, %arg6: memref<1x2x128xf32, #tpu.memory_space<vmem>>) attributes {dimension_semantics = [#tpu.dimension_semantics<parallel>], iteration_bounds = array<i64: 2>, scalar_prefetch = 0 : i64, scratch_operands = 0 : i64, tpu.core_type = #tpu.core_type<tc>, window_params = [{transform_indices = @transform_0, window_bounds = array<i64: 256, 128>}, {pipeline_mode = #tpu.pipeline_mode<synchronous>, transform_indices = @transform_1, window_bounds = array<i64: 1, 128>}, {pipeline_mode = #tpu.pipeline_mode<synchronous>, transform_indices = @transform_2, window_bounds = array<i64: 1, 128>}, {pipeline_mode = #tpu.pipeline_mode<synchronous>, transform_indices = @transform_3, window_bounds = array<i64: 128, 128>}, {transform_indices = @transform_4, window_bounds = array<i64: 256, 128>}, {transform_indices = @transform_5, window_bounds = array<i64: 1, 2, 128>}]} {
    %c0 = arith.constant 0 : index
    %c0_0 = arith.constant 0 : index
    %0 = vector.load %arg1[%c0, %c0_0] : memref<256x128xf32, #tpu.memory_space<vmem>>, vector<256x128xf32>
    %c0_1 = arith.constant 0 : index
    %c0_2 = arith.constant 0 : index
    %1 = vector.load %arg2[%c0_1, %c0_2] : memref<1x128xf32, #tpu.memory_space<vmem>>, vector<1x128xf32>
    %2 = vector.broadcast %1 : vector<1x128xf32> to vector<256x128xf32>
    %3 = arith.mulf %0, %2 : vector<256x128xf32>
    %c0_3 = arith.constant 0 : index
    %c0_4 = arith.constant 0 : index
    %4 = vector.load %arg3[%c0_3, %c0_4] : memref<1x128xf32, #tpu.memory_space<vmem>>, vector<1x128xf32>
    %5 = vector.broadcast %4 : vector<1x128xf32> to vector<256x128xf32>
    %6 = arith.addf %3, %5 : vector<256x128xf32>
    %cst = arith.constant 0.000000e+00 : f32
    %7 = vector.broadcast %cst : f32 to vector<256x128xf32>
    %8 = arith.maximumf %6, %7 : vector<256x128xf32>
    %c0_5 = arith.constant 0 : index
    %c0_6 = arith.constant 0 : index
    %9 = vector.load %arg4[%c0_5, %c0_6] : memref<128x128xf32, #tpu.memory_space<vmem>>, vector<128x128xf32>
    %cst_7 = arith.constant dense<0.000000e+00> : vector<256x128xf32>
    %10 = tpu.matmul %8, %9, %cst_7 {dimension_numbers = #tpu.dot_dimension_numbers<[1], [0], [0], [1], [0, 0, 1, 1], [], []>} : vector<256x128xf32>, vector<128x128xf32>, vector<256x128xf32> -> vector<256x128xf32>
    %c0_8 = arith.constant 0 : index
    %c0_9 = arith.constant 0 : index
    %11 = vector.load %arg5[%c0_8, %c0_9] : memref<256x128xf32, #tpu.memory_space<vmem>>, vector<256x128xf32>
    tpu.vector_store %arg5[%c0_8, %c0_9], %10 {strides = array<i32>} : memref<256x128xf32, #tpu.memory_space<vmem>>, vector<256x128xf32>,
    %cst_10 = arith.constant dense<0.000000e+00> : vector<128xf32>
    %12 = vector.multi_reduction <add>, %10, %cst_10 [0] : vector<256x128xf32> to vector<128xf32>
    %13 = vector.shape_cast %12 : vector<128xf32> to vector<1x128xf32>
    %14 = arith.mulf %10, %10 : vector<256x128xf32>
    %cst_11 = arith.constant dense<0.000000e+00> : vector<128xf32>
    %15 = vector.multi_reduction <add>, %14, %cst_11 [0] : vector<256x128xf32> to vector<128xf32>
    %16 = vector.shape_cast %15 : vector<128xf32> to vector<1x128xf32>
    %17 = tpu.concatenate %13, %16 in 0 : vector<1x128xf32>, vector<1x128xf32> -> vector<2x128xf32>
    %18 = vector.shape_cast %17 : vector<2x128xf32> to vector<1x2x128xf32>
    %c0_12 = arith.constant 0 : index
    %c0_13 = arith.constant 0 : index
    %c0_14 = arith.constant 0 : index
    %19 = vector.load %arg6[%c0_12, %c0_13, %c0_14] : memref<1x2x128xf32, #tpu.memory_space<vmem>>, vector<1x2x128xf32>
    tpu.vector_store %arg6[%c0_12, %c0_13, %c0_14], %18 {strides = array<i32>} : memref<1x2x128xf32, #tpu.memory_space<vmem>>, vector<1x2x128xf32>,
    return
  }
  func.func @transform_0(%arg0: i32) -> (i32, i32) {
    %c0_i32 = arith.constant 0 : i32
    %c0_i32_0 = arith.constant 0 : i32
    return %arg0, %c0_i32 : i32, i32
  }
  func.func @transform_1(%arg0: i32) -> (i32, i32) {
    %c0_i32 = arith.constant 0 : i32
    %c0_i32_0 = arith.constant 0 : i32
    %c0_i32_1 = arith.constant 0 : i32
    return %c0_i32, %c0_i32_0 : i32, i32
  }
  func.func @transform_2(%arg0: i32) -> (i32, i32) {
    %c0_i32 = arith.constant 0 : i32
    %c0_i32_0 = arith.constant 0 : i32
    %c0_i32_1 = arith.constant 0 : i32
    return %c0_i32, %c0_i32_0 : i32, i32
  }
  func.func @transform_3(%arg0: i32) -> (i32, i32) {
    %c0_i32 = arith.constant 0 : i32
    %c0_i32_0 = arith.constant 0 : i32
    %c0_i32_1 = arith.constant 0 : i32
    return %c0_i32, %c0_i32_0 : i32, i32
  }
  func.func @transform_4(%arg0: i32) -> (i32, i32) {
    %c0_i32 = arith.constant 0 : i32
    %c0_i32_0 = arith.constant 0 : i32
    return %arg0, %c0_i32 : i32, i32
  }
  func.func @transform_5(%arg0: i32) -> (i32, i32, i32) {
    %c0_i32 = arith.constant 0 : i32
    %c0_i32_0 = arith.constant 0 : i32
    %c0_i32_1 = arith.constant 0 : i32
    return %arg0, %c0_i32, %c0_i32_0 : i32, i32, i32
  }
}

module attributes {stable_mosaic.version = 11 : i64} {
  func.func @bn_add_relu_kernel(%arg0: i32, %arg1: memref<256x128xf32, #tpu.memory_space<vmem>>, %arg2: memref<256x128xf32, #tpu.memory_space<vmem>>, %arg3: memref<1x128xf32, #tpu.memory_space<vmem>>, %arg4: memref<1x128xf32, #tpu.memory_space<vmem>>, %arg5: memref<256x128xf32, #tpu.memory_space<vmem>>) attributes {dimension_semantics = [#tpu.dimension_semantics<parallel>], iteration_bounds = array<i64: 2>, scalar_prefetch = 0 : i64, scratch_operands = 0 : i64, tpu.core_type = #tpu.core_type<tc>, window_params = [{transform_indices = @transform_0, window_bounds = array<i64: 256, 128>}, {transform_indices = @transform_1, window_bounds = array<i64: 256, 128>}, {pipeline_mode = #tpu.pipeline_mode<synchronous>, transform_indices = @transform_2, window_bounds = array<i64: 1, 128>}, {pipeline_mode = #tpu.pipeline_mode<synchronous>, transform_indices = @transform_3, window_bounds = array<i64: 1, 128>}, {transform_indices = @transform_4, window_bounds = array<i64: 256, 128>}]} {
    %c0 = arith.constant 0 : index
    %c0_0 = arith.constant 0 : index
    %0 = vector.load %arg1[%c0, %c0_0] : memref<256x128xf32, #tpu.memory_space<vmem>>, vector<256x128xf32>
    %c0_1 = arith.constant 0 : index
    %c0_2 = arith.constant 0 : index
    %1 = vector.load %arg3[%c0_1, %c0_2] : memref<1x128xf32, #tpu.memory_space<vmem>>, vector<1x128xf32>
    %2 = vector.broadcast %1 : vector<1x128xf32> to vector<256x128xf32>
    %3 = arith.mulf %0, %2 : vector<256x128xf32>
    %c0_3 = arith.constant 0 : index
    %c0_4 = arith.constant 0 : index
    %4 = vector.load %arg4[%c0_3, %c0_4] : memref<1x128xf32, #tpu.memory_space<vmem>>, vector<1x128xf32>
    %5 = vector.broadcast %4 : vector<1x128xf32> to vector<256x128xf32>
    %6 = arith.addf %3, %5 : vector<256x128xf32>
    %c0_5 = arith.constant 0 : index
    %c0_6 = arith.constant 0 : index
    %7 = vector.load %arg2[%c0_5, %c0_6] : memref<256x128xf32, #tpu.memory_space<vmem>>, vector<256x128xf32>
    %8 = arith.addf %6, %7 : vector<256x128xf32>
    %cst = arith.constant 0.000000e+00 : f32
    %9 = vector.broadcast %cst : f32 to vector<256x128xf32>
    %10 = arith.maximumf %8, %9 : vector<256x128xf32>
    %c0_7 = arith.constant 0 : index
    %c0_8 = arith.constant 0 : index
    %11 = vector.load %arg5[%c0_7, %c0_8] : memref<256x128xf32, #tpu.memory_space<vmem>>, vector<256x128xf32>
    tpu.vector_store %arg5[%c0_7, %c0_8], %10 {strides = array<i32>} : memref<256x128xf32, #tpu.memory_space<vmem>>, vector<256x128xf32>,
    return
  }
  func.func @transform_0(%arg0: i32) -> (i32, i32) {
    %c0_i32 = arith.constant 0 : i32
    %c0_i32_0 = arith.constant 0 : i32
    return %arg0, %c0_i32 : i32, i32
  }
  func.func @transform_1(%arg0: i32) -> (i32, i32) {
    %c0_i32 = arith.constant 0 : i32
    %c0_i32_0 = arith.constant 0 : i32
    return %arg0, %c0_i32 : i32, i32
  }
  func.func @transform_2(%arg0: i32) -> (i32, i32) {
    %c0_i32 = arith.constant 0 : i32
    %c0_i32_0 = arith.constant 0 : i32
    %c0_i32_1 = arith.constant 0 : i32
    return %c0_i32, %c0_i32_0 : i32, i32
  }
  func.func @transform_3(%arg0: i32) -> (i32, i32) {
    %c0_i32 = arith.constant 0 : i32
    %c0_i32_0 = arith.constant 0 : i32
    %c0_i32_1 = arith.constant 0 : i32
    return %c0_i32, %c0_i32_0 : i32, i32
  }
  func.func @transform_4(%arg0: i32) -> (i32, i32) {
    %c0_i32 = arith.constant 0 : i32
    %c0_i32_0 = arith.constant 0 : i32
    return %arg0, %c0_i32 : i32, i32
  }
}

</mosaic_0001>

<bundles_post_ra>
// kernel: bottleneck_forward.4
= control target key start
LH: loop header
LB: loop body
LE: loop exit
PB: predicated region body
PF: predicated region fallthrough
CT: control target
= control target key end

     0   :  { %s910_s12 = smov 0   ;;  %s1136_s0 = inlined_call_operand.vmem [shape: f32[512,128], index: 0, kind: input, shape index: {}]   ;;  %s1137_s1 = inlined_call_operand.vmem [shape: f32[128,128], index: 1, kind: input, shape index: {}]   ;;  %s1138_s2 = inlined_call_operand.vmem [shape: f32[512,128], index: 2, kind: output, shape index: {0}]   ;;  %s1139_s3 = inlined_call_operand.vmem [shape: f32[2,2,128], index: 3, kind: output, shape index: {1}]  }
   0x1 LB: > { %s916_s13 = sadd.s32 4294967295, %s888_s12   ;;  %p690_p0 = scmp.ge.s32.totalorder %s888_s12, 1  ;;  %s888_s12 = sphi %s910_s12, %s14_s12  }
   0x2   : > { %p141_p1 = scmp.lt.s32.totalorder %s888_s12, 3 }
   0x4   : > { %p142_p2 = pnand %p690_p0, %p141_p1 }
   0x5   : > { %v217_v0 = vld [vmem:[%s1137_s1] sm:$0xff] (!%p142_p2)  ;;  %v218_v1 = vld [vmem:[%s1137_s1 + $0x8] sm:$0xff] (!%p142_p2)  ;;  %v219_v2 = vld [vmem:[%s1137_s1 + $0x10] sm:$0xff] (!%p142_p2)  ;;  %s691_s20 = sshll.u32 (!%p142_p2), %s916_s13, 5  ;;  %p181_p4 = scmp.lt.s32.totalorder (!%p142_p2), %s916_s13, 1  ;;  %vm596_vm0 = vcmask (!%p142_p2), 1040384  }
   0x6   : > { %145 = sbr.rel (%p142_p2) target bundleno = 333 (0x14d), region = 28  ;;  %v826_v3 = vpack.c.bf16 (!%p142_p2), %v218_v1, %v217_v0  ;;  %v220_v4 = vld [vmem:[%s1137_s1 + $0x18] sm:$0xff] (!%p142_p2)  ;;  %p170_p3 = scmp.lt.s32.totalorder (!%p142_p2), %s691_s20, 63  ;;  %v221_v6 = vld [vmem:[%s1137_s1 + $0x20] sm:$0xff] (!%p142_p2)  ;;  %v222_v7 = vld [vmem:[%s1137_s1 + $0x28] sm:$0xff] (!%p142_p2) }
   0x7   : > { %v830_v5 = vpack.c.bf16 (!%p142_p2), %v220_v4, %v219_v2  ;;  %v834_v8 = vpack.c.bf16 (!%p142_p2), %v222_v7, %v221_v6  ;;  %v223_v9 = vld [vmem:[%s1137_s1 + $0x30] sm:$0xff] (!%p142_p2)  ;;  %v224_v10 = vld [vmem:[%s1137_s1 + $0x38] sm:$0xff] (!%p142_p2)  ;;  %v225_v13 = vld [vmem:[%s1137_s1 + $0x40] sm:$0xff] (!%p142_p2) }
   0x8   : > { %827 = vmatprep.subr.bf16.mxu0 (!%p142_p2), %v826_v3  ;;  %858 = vmatprep.subr.bf16.mxu1 (!%p142_p2), %v826_v3  ;;  %v838_v12 = vpack.c.bf16 (!%p142_p2), %v224_v10, %v223_v9  ;;  %v226_v14 = vld [vmem:[%s1137_s1 + $0x48] sm:$0xff] (!%p142_p2)  ;;  %v227_v17 = vld [vmem:[%s1137_s1 + $0x50] sm:$0xff] (!%p142_p2)  ;;  %v228_v18 = vld [vmem:[%s1137_s1 + $0x58] sm:$0xff] (!%p142_p2) }
   0x9   : > { %829 = vmatpush3.bf16.msra.mxu0 (!%p142_p2), %v826_v3  ;;  %866 = vmatpush3.bf16.msra.mxu1 (!%p142_p2), %v826_v3  ;;  %v842_v16 = vpack.c.bf16 (!%p142_p2), %v226_v14, %v225_v13  ;;  %v846_v19 = vpack.c.bf16 (!%p142_p2), %v228_v18, %v227_v17  ;;  %v229_v20 = vld [vmem:[%s1137_s1 + $0x60] sm:$0xff] (!%p142_p2)  ;;  %v230_v21 = vld [vmem:[%s1137_s1 + $0x68] sm:$0xff] (!%p142_p2)  ;;  %v231_v23 = vld [vmem:[%s1137_s1 + $0x70] sm:$0xff] (!%p142_p2) }
   0xa   : > { %831 = vmatprep.subr.bf16.mxu0 (!%p142_p2), %v830_v5  ;;  %859 = vmatprep.subr.bf16.mxu1 (!%p142_p2), %v830_v5  ;;  %v850_v22 = vpack.c.bf16 (!%p142_p2), %v230_v21, %v229_v20  ;;  %v232_v24 = vld [vmem:[%s1137_s1 + $0x78] sm:$0xff] (!%p142_p2) }
   0xb   : > { %v854_v25 = vpack.c.bf16 (!%p142_p2), %v232_v24, %v231_v23 }
   0xd   : > { %s1141_s20 = smov (!%p170_p3, %s691_s20), 63  ;;  %833 = vmatpush3.bf16.msra.mxu0 %v830_v5  ;;  %867 = vmatpush3.bf16.msra.mxu1 %v830_v5  ;;  %s1143_s13 = smov (!%p181_p4, %s916_s13), 1 }
   0xe   : > { %s692_s27 = sshll.u32 %s1141_s20, 3  ;;  %835 = vmatprep.subr.bf16.mxu0 %v834_v8  ;;  %860 = vmatprep.subr.bf16.mxu1 %v834_v8  ;;  %s695_s20 = sshll.u32 %s1143_s13, 1 }
   0xf   : > { %s953_s7 = scalar_lea.vmem %s1136_s0, %s692_s27  ;;  %s1016_s30 = scalar_lea.vmem %s1138_s2, %s692_s27 }
  0x10   : > { %v185_v11 = vld [vmem:[%s953_s7] sm:$0xff]  ;;  %v186_v26 = vld [vmem:[%s953_s7 + $0x8] sm:$0xff]  ;;  %v187_v27 = vld [vmem:[%s953_s7 + $0x10] sm:$0xff]  ;;  %s184_s5 = scalar_lea.vmem %s1139_s3, %s695_s20 }
  0x11   : > { %778 = vmatprep.mubr.f32.mxu0 %v185_v11  ;;  %837 = vmatpush3.bf16.msra.mxu0 %v834_v8  ;;  %v201_v15 = vld [vmem:[%s953_s7 + $0x80] sm:$0xff]  ;;  %v202_v28 = vld [vmem:[%s953_s7 + $0x88] sm:$0xff]  ;;  %v203_v29 = vld [vmem:[%s953_s7 + $0x90] sm:$0xff] }
  0x12   : > { %839 = vmatprep.subr.bf16.mxu0 %v838_v12  ;;  %868 = vmatpush3.bf16.msra.mxu1 %v834_v8  ;;  %v188_v30 = vld [vmem:[%s953_s7 + $0x18] sm:$0xff]  ;;  %v189_v31 = vld [vmem:[%s953_s7 + $0x20] sm:$0xff]  ;;  %v190_v34 = vld [vmem:[%s953_s7 + $0x28] sm:$0xff] }
  0x13   : > { %861 = vmatprep.subr.bf16.mxu1 %v838_v12  ;;  %802 = vmatprep.mubr.f32.mxu1 %v201_v15  ;;  %v204_v32 = vld [vmem:[%s953_s7 + $0x98] sm:$0xff]  ;;  %v205_v33 = vld [vmem:[%s953_s7 + $0xa0] sm:$0xff]  ;;  %v191_v35 = vld [vmem:[%s953_s7 + $0x30] sm:$0xff] }
  0x14   : > { %v206_v36 = vld [vmem:[%s953_s7 + $0xa8] sm:$0xff]  ;;  %v207_v37 = vld [vmem:[%s953_s7 + $0xb0] sm:$0xff]  ;;  %v192_v38 = vld [vmem:[%s953_s7 + $0x38] sm:$0xff] }
  0x15   : > { %841 = vmatpush3.bf16.msra.mxu0 %v838_v12  ;;  %v193_v39 = vld [vmem:[%s953_s7 + $0x40] sm:$0xff]  ;;  %v208_v40 = vld [vmem:[%s953_s7 + $0xb8] sm:$0xff]  ;;  %v194_v42 = vld [vmem:[%s953_s7 + $0x48] sm:$0xff] }
  0x16   : > { %843 = vmatprep.subr.bf16.mxu0 %v842_v16  ;;  %869 = vmatpush3.bf16.msra.mxu1 %v838_v12  ;;  %v209_v41 = vld [vmem:[%s953_s7 + $0xc0] sm:$0xff]  ;;  %v195_v43 = vld [vmem:[%s953_s7 + $0x50] sm:$0xff]  ;;  %v210_v44 = vld [vmem:[%s953_s7 + $0xc8] sm:$0xff] }
  0x17   : > { %862 = vmatprep.subr.bf16.mxu1 %v842_v16  ;;  %v211_v45 = vld [vmem:[%s953_s7 + $0xd0] sm:$0xff]  ;;  %v196_v46 = vld [vmem:[%s953_s7 + $0x58] sm:$0xff]  ;;  %v197_v47 = vld [vmem:[%s953_s7 + $0x60] sm:$0xff] }
  0x18   : > { %v212_v48 = vld [vmem:[%s953_s7 + $0xd8] sm:$0xff]  ;;  %v213_v49 = vld [vmem:[%s953_s7 + $0xe0] sm:$0xff]  ;;  %v198_v50 = vld [vmem:[%s953_s7 + $0x68] sm:$0xff] }
  0x19   : > { %845 = vmatpush3.bf16.msra.mxu0 %v842_v16  ;;  %v199_v51 = vld [vmem:[%s953_s7 + $0x70] sm:$0xff]  ;;  %v214_v52 = vld [vmem:[%s953_s7 + $0xe8] sm:$0xff]  ;;  %v200_v54 = vld [vmem:[%s953_s7 + $0x78] sm:$0xff] }
  0x1a   : > { %847 = vmatprep.subr.bf16.mxu0 %v846_v19  ;;  %870 = vmatpush3.bf16.msra.mxu1 %v842_v16  ;;  %v215_v53 = vld [vmem:[%s953_s7 + $0xf0] sm:$0xff]  ;;  %v216_v55 = vld [vmem:[%s953_s7 + $0xf8] sm:$0xff] }
  0x1b   : > { %863 = vmatprep.subr.bf16.mxu1 %v846_v19 }
  0x1d   : > { %849 = vmatpush3.bf16.msra.mxu0 %v846_v19 }
  0x1e   : > { %851 = vmatprep.subr.bf16.mxu0 %v850_v22  ;;  %871 = vmatpush3.bf16.msra.mxu1 %v846_v19 }
  0x1f   : > { %864 = vmatprep.subr.bf16.mxu1 %v850_v22 }
  0x21   : > { %853 = vmatpush3.bf16.msra.mxu0 %v850_v22 }
  0x22   : > { %855 = vmatprep.subr.bf16.mxu0 %v854_v25  ;;  %872 = vmatpush3.bf16.msra.mxu1 %v850_v22 }
  0x23   : > { %865 = vmatprep.subr.bf16.mxu1 %v854_v25 }
  0x25   : > { %857 = vmatpush3.bf16.msra.mxu0 %v854_v25 }
  0x26   : > { %873 = vmatpush3.bf16.msra.mxu1 %v854_v25 }
  0x28   : > { %779 = vmatmul.mubr.f32.vlgmr.msra.gmra.mrb[0].mxu0 %v186_v26 }
  0x29   : > { %781 = vmatprep.mubr.f32.mxu0 %v187_v27  ;;  %803 = vmatmul.mubr.f32.vlgmr.msra.gmra.mrb[0].mxu1 %v202_v28 }
  0x2a   : > { %805 = vmatprep.mubr.f32.mxu1 %v203_v29 }
  0x2c   : > { %782 = vmatmul.mubr.f32.gmra.mrb[2].mxu0 %v188_v30 }
  0x2d   : > { %784 = vmatprep.mubr.f32.mxu0 %v189_v31  ;;  %806 = vmatmul.mubr.f32.gmra.mrb[2].mxu1 %v204_v32 }
  0x2e   : > { %808 = vmatprep.mubr.f32.mxu1 %v205_v33 }
  0x30   : > { %785 = vmatmul.mubr.f32.gmra.mrb[4].mxu0 %v190_v34 }
  0x31   : > { %787 = vmatprep.mubr.f32.mxu0 %v191_v35  ;;  %809 = vmatmul.mubr.f32.gmra.mrb[4].mxu1 %v206_v36 }
  0x32   : > { %811 = vmatprep.mubr.f32.mxu1 %v207_v37 }
  0x34   : > { %788 = vmatmul.mubr.f32.gmra.mrb[6].mxu0 %v192_v38 }
  0x35   : > { %790 = vmatprep.mubr.f32.mxu0 %v193_v39  ;;  %812 = vmatmul.mubr.f32.gmra.mrb[6].mxu1 %v208_v40 }
  0x36   : > { %814 = vmatprep.mubr.f32.mxu1 %v209_v41 }
  0x38   : > { %791 = vmatmul.mubr.f32.gmra.mrb[8].mxu0 %v194_v42 }
  0x39   : > { %793 = vmatprep.mubr.f32.mxu0 %v195_v43  ;;  %815 = vmatmul.mubr.f32.gmra.mrb[8].mxu1 %v210_v44 }
  0x3a   : > { %817 = vmatprep.mubr.f32.mxu1 %v211_v45 }
  0x3c   : > { %794 = vmatmul.mubr.f32.gmra.mrb[10].mxu0 %v196_v46 }
  0x3d   : > { %796 = vmatprep.mubr.f32.mxu0 %v197_v47  ;;  %818 = vmatmul.mubr.f32.gmra.mrb[10].mxu1 %v212_v48 }
  0x3e   : > { %820 = vmatprep.mubr.f32.mxu1 %v213_v49 }
  0x40   : > { %797 = vmatmul.mubr.f32.gmra.mrb[12].mxu0 %v198_v50 }
  0x41   : > { %799 = vmatprep.mubr.f32.mxu0 %v199_v51  ;;  %821 = vmatmul.mubr.f32.gmra.mrb[12].mxu1 %v214_v52 }
  0x42   : > { %823 = vmatprep.mubr.f32.mxu1 %v215_v53 }
  0x44   : > { %800 = vmatmul.mubr.f32.gmra.mrb[14].mxu0 %v200_v54 }
  0x45   : > { %824 = vmatmul.mubr.f32.gmra.mrb[14].mxu1 %v216_v55 }
  0xfb   : > { %v780_v56 = vpop.f32.mrb[0].mxu0 }
  0xfc   : > { %459 = vst [vmem:[%s1016_s30 + $0x8] sm:$0xff] %v780_v56  ;;  %v528_v57 = vmul.f32 %v780_v56, %v780_v56  ;;  %v299_v58 = vpop.f32.mrb[1].mxu0  ;;  %v1019_v59 = vpop.f32.mrb[0].mxu1 }
  0xfd   : > { %458 = vst [vmem:[%s1016_s30] sm:$0xff] %v299_v58  ;;  %v490_v60 = vadd.f32 %v780_v56, %v299_v58  ;;  %v527_v61 = vmul.f32 %v299_v58, %v299_v58  ;;  %475 = vst [vmem:[%s1016_s30 + $0x88] sm:$0xff] %v1019_v59  ;;  %v1024_v62 = vpop.f32.mrb[1].mxu1 }
  0xfe   : > { %474 = vst [vmem:[%s1016_s30 + $0x80] sm:$0xff] %v1024_v62 }
  0xff   : > { %v559_v63 = vadd.f32 %v528_v57, %v527_v61  ;;  %v783_v0 = vpop.f32.mrb[2].mxu0 }
 0x100   : > { %461 = vst [vmem:[%s1016_s30 + $0x18] sm:$0xff] %v783_v0  ;;  %v309_v1 = vpop.f32.mrb[3].mxu0  ;;  %v1029_v2 = vpop.f32.mrb[2].mxu1  ;;  %v530_v6 = vmul.f32 %v783_v0, %v783_v0 }
 0x101   : > { %460 = vst [vmem:[%s1016_s30 + $0x10] sm:$0xff] %v309_v1  ;;  %v491_v3 = vadd.f32 %v490_v60, %v309_v1  ;;  %v529_v4 = vmul.f32 %v309_v1, %v309_v1  ;;  %477 = vst [vmem:[%s1016_s30 + $0x98] sm:$0xff] %v1029_v2  ;;  %v1034_v5 = vpop.f32.mrb[3].mxu1 }
 0x102   : > { %476 = vst [vmem:[%s1016_s30 + $0x90] sm:$0xff] %v1034_v5 }
 0x103   : > { %v560_v7 = vadd.f32 %v559_v63, %v529_v4  ;;  %v786_v8 = vpop.f32.mrb[4].mxu0  ;;  %v492_v9 = vadd.f32 %v783_v0, %v491_v3 }
 0x104   : > { %463 = vst [vmem:[%s1016_s30 + $0x28] sm:$0xff] %v786_v8  ;;  %v319_v10 = vpop.f32.mrb[5].mxu0  ;;  %v1039_v11 = vpop.f32.mrb[4].mxu1  ;;  %v532_v16 = vmul.f32 %v786_v8, %v786_v8 }
 0x105   : > { %462 = vst [vmem:[%s1016_s30 + $0x20] sm:$0xff] %v319_v10  ;;  %v493_v12 = vadd.f32 %v492_v9, %v319_v10  ;;  %v531_v13 = vmul.f32 %v319_v10, %v319_v10  ;;  %v561_v14 = vadd.f32 %v560_v7, %v530_v6  ;;  %479 = vst [vmem:[%s1016_s30 + $0xa8] sm:$0xff] %v1039_v11  ;;  %v1044_v15 = vpop.f32.mrb[5].mxu1 }
 0x106   : > { %478 = vst [vmem:[%s1016_s30 + $0xa0] sm:$0xff] %v1044_v15  ;;  %v543_v9 = vmul.f32 %v1024_v62, %v1024_v62 }
 0x107   : > { %v562_v17 = vadd.f32 %v561_v14, %v531_v13  ;;  %v789_v18 = vpop.f32.mrb[6].mxu0  ;;  %v494_v19 = vadd.f32 %v786_v8, %v493_v12  ;;  %v544_v13 = vmul.f32 %v1019_v59, %v1019_v59 }
 0x108   : > { %465 = vst [vmem:[%s1016_s30 + $0x38] sm:$0xff] %v789_v18  ;;  %v329_v20 = vpop.f32.mrb[7].mxu0  ;;  %v1049_v21 = vpop.f32.mrb[6].mxu1  ;;  %v534_v26 = vmul.f32 %v789_v18, %v789_v18 }
 0x109   : > { %464 = vst [vmem:[%s1016_s30 + $0x30] sm:$0xff] %v329_v20  ;;  %v495_v22 = vadd.f32 %v494_v19, %v329_v20  ;;  %v533_v23 = vmul.f32 %v329_v20, %v329_v20  ;;  %v563_v24 = vadd.f32 %v562_v17, %v532_v16  ;;  %481 = vst [vmem:[%s1016_s30 + $0xb8] sm:$0xff] %v1049_v21  ;;  %v1054_v25 = vpop.f32.mrb[7].mxu1 }
 0x10a   : > { %480 = vst [vmem:[%s1016_s30 + $0xb0] sm:$0xff] %v1054_v25  ;;  %v545_v17 = vmul.f32 %v1034_v5, %v1034_v5  ;;  %v546_v20 = vmul.f32 %v1029_v2, %v1029_v2 }
 0x10b   : > { %v564_v27 = vadd.f32 %v563_v24, %v533_v23  ;;  %v792_v28 = vpop.f32.mrb[8].mxu0  ;;  %v496_v29 = vadd.f32 %v789_v18, %v495_v22 }
 0x10c   : > { %467 = vst [vmem:[%s1016_s30 + $0x48] sm:$0xff] %v792_v28  ;;  %v339_v30 = vpop.f32.mrb[9].mxu0  ;;  %v1059_v31 = vpop.f32.mrb[8].mxu1  ;;  %v536_v36 = vmul.f32 %v792_v28, %v792_v28 }
 0x10d   : > { %466 = vst [vmem:[%s1016_s30 + $0x40] sm:$0xff] %v339_v30  ;;  %v497_v32 = vadd.f32 %v496_v29, %v339_v30  ;;  %v535_v33 = vmul.f32 %v339_v30, %v339_v30  ;;  %v565_v34 = vadd.f32 %v564_v27, %v534_v26  ;;  %483 = vst [vmem:[%s1016_s30 + $0xc8] sm:$0xff] %v1059_v31  ;;  %v1064_v35 = vpop.f32.mrb[9].mxu1 }
 0x10e   : > { %482 = vst [vmem:[%s1016_s30 + $0xc0] sm:$0xff] %v1064_v35 }
 0x10f   : > { %v566_v37 = vadd.f32 %v565_v34, %v535_v33  ;;  %v795_v38 = vpop.f32.mrb[10].mxu0  ;;  %v498_v39 = vadd.f32 %v792_v28, %v497_v32 }
 0x110   : > { %469 = vst [vmem:[%s1016_s30 + $0x58] sm:$0xff] %v795_v38  ;;  %v349_v40 = vpop.f32.mrb[11].mxu0  ;;  %v1069_v41 = vpop.f32.mrb[10].mxu1  ;;  %v538_v46 = vmul.f32 %v795_v38, %v795_v38 }
 0x111   : > { %468 = vst [vmem:[%s1016_s30 + $0x50] sm:$0xff] %v349_v40  ;;  %v499_v42 = vadd.f32 %v498_v39, %v349_v40  ;;  %v537_v43 = vmul.f32 %v349_v40, %v349_v40  ;;  %v567_v44 = vadd.f32 %v566_v37, %v536_v36  ;;  %485 = vst [vmem:[%s1016_s30 + $0xd8] sm:$0xff] %v1069_v41  ;;  %v1074_v45 = vpop.f32.mrb[11].mxu1 }
 0x112   : > { %484 = vst [vmem:[%s1016_s30 + $0xd0] sm:$0xff] %v1074_v45 }
 0x113   : > { %v568_v47 = vadd.f32 %v567_v44, %v537_v43  ;;  %v798_v48 = vpop.f32.mrb[12].mxu0  ;;  %v500_v49 = vadd.f32 %v795_v38, %v499_v42 }
 0x114   : > { %471 = vst [vmem:[%s1016_s30 + $0x68] sm:$0xff] %v798_v48  ;;  %v359_v50 = vpop.f32.mrb[13].mxu0  ;;  %v1079_v51 = vpop.f32.mrb[12].mxu1  ;;  %v540_v56 = vmul.f32 %v798_v48, %v798_v48 }
 0x115   : > { %470 = vst [vmem:[%s1016_s30 + $0x60] sm:$0xff] %v359_v50  ;;  %v501_v52 = vadd.f32 %v500_v49, %v359_v50  ;;  %v539_v53 = vmul.f32 %v359_v50, %v359_v50  ;;  %v569_v54 = vadd.f32 %v568_v47, %v538_v46  ;;  %487 = vst [vmem:[%s1016_s30 + $0xe8] sm:$0xff] %v1079_v51  ;;  %v439_v55 = vpop.f32.mrb[13].mxu1 }
 0x116   : > { %486 = vst [vmem:[%s1016_s30 + $0xe0] sm:$0xff] %v439_v55  ;;  %v555_v43 = vmul.f32 %v439_v55, %v439_v55  ;;  %v556_v47 = vmul.f32 %v1079_v51, %v1079_v51 }
 0x117   : > { %v570_v57 = vadd.f32 %v569_v54, %v539_v53  ;;  %v801_v58 = vpop.f32.mrb[14].mxu0  ;;  %v502_v60 = vadd.f32 %v798_v48, %v501_v52 }
 0x118   : > { %473 = vst [vmem:[%s1016_s30 + $0x78] sm:$0xff] %v801_v58  ;;  %v369_v61 = vpop.f32.mrb[15].mxu0  ;;  %v825_v63 = vpop.f32.mrb[14].mxu1  ;;  %v542_v6 = vmul.f32 %v801_v58, %v801_v58 }
 0x119   : > { %472 = vst [vmem:[%s1016_s30 + $0x70] sm:$0xff] %v369_v61  ;;  %v503_v0 = vadd.f32 %v502_v60, %v369_v61  ;;  %v541_v1 = vmul.f32 %v369_v61, %v369_v61  ;;  %v571_v3 = vadd.f32 %v570_v57, %v540_v56  ;;  %489 = vst [vmem:[%s1016_s30 + $0xf8] sm:$0xff] %v825_v63  ;;  %v449_v4 = vpop.f32.mrb[15].mxu1 }
 0x11a   : > { %488 = vst [vmem:[%s1016_s30 + $0xf0] sm:$0xff] %v449_v4  ;;  %v557_v49 = vmul.f32 %v449_v4, %v449_v4  ;;  %v558_v52 = vmul.f32 %v825_v63, %v825_v63 }
 0x11b   : > { %v504_v7 = vadd.f32 %v801_v58, %v503_v0  ;;  %v572_v8 = vadd.f32 %v571_v3, %v541_v1 }
 0x11d   : > { %v573_v10 = vadd.f32 %v572_v8, %v542_v6  ;;  %v505_v12 = vadd.f32 %v504_v7, %v1024_v62  ;;  %v547_v62 = vmul.f32 %v1044_v15, %v1044_v15 }
 0x11f   : > { %v574_v14 = vadd.f32 %v573_v10, %v543_v9  ;;  %v506_v16 = vadd.f32 %v1019_v59, %v505_v12  ;;  %v548_v59 = vmul.f32 %v1039_v11, %v1039_v11 }
 0x121   : > { %v507_v18 = vadd.f32 %v506_v16, %v1034_v5  ;;  %v575_v19 = vadd.f32 %v574_v14, %v544_v13  ;;  %v549_v5 = vmul.f32 %v1054_v25, %v1054_v25 }
 0x123   : > { %v576_v22 = vadd.f32 %v575_v19, %v545_v17  ;;  %v508_v23 = vadd.f32 %v1029_v2, %v507_v18  ;;  %v550_v2 = vmul.f32 %v1049_v21, %v1049_v21 }
 0x125   : > { %v509_v24 = vadd.f32 %v508_v23, %v1044_v15  ;;  %v577_v26 = vadd.f32 %v576_v22, %v546_v20  ;;  %v551_v15 = vmul.f32 %v1064_v35, %v1064_v35 }
 0x127   : > { %v578_v27 = vadd.f32 %v577_v26, %v547_v62  ;;  %v510_v28 = vadd.f32 %v1039_v11, %v509_v24  ;;  %v552_v11 = vmul.f32 %v1059_v31, %v1059_v31 }
 0x129   : > { %v511_v29 = vadd.f32 %v510_v28, %v1054_v25  ;;  %v579_v30 = vadd.f32 %v578_v27, %v548_v59  ;;  %v553_v25 = vmul.f32 %v1074_v45, %v1074_v45 }
 0x12b   : > { %v580_v32 = vadd.f32 %v579_v30, %v549_v5  ;;  %v512_v33 = vadd.f32 %v1049_v21, %v511_v29  ;;  %v554_v21 = vmul.f32 %v1069_v41, %v1069_v41 }
 0x12d   : > { %v513_v34 = vadd.f32 %v512_v33, %v1064_v35  ;;  %v581_v36 = vadd.f32 %v580_v32, %v550_v2 }
 0x12f   : > { %v582_v37 = vadd.f32 %v581_v36, %v551_v15  ;;  %v514_v38 = vadd.f32 %v1059_v31, %v513_v34 }
 0x131   : > { %v515_v39 = vadd.f32 %v514_v38, %v1074_v45  ;;  %v583_v40 = vadd.f32 %v582_v37, %v552_v11 }
 0x133   : > { %v584_v42 = vadd.f32 %v583_v40, %v553_v25  ;;  %v516_v35 = vadd.f32 %v1069_v41, %v515_v39 }
 0x135   : > { %v517_v44 = vadd.f32 %v516_v35, %v439_v55  ;;  %v585_v46 = vadd.f32 %v584_v42, %v554_v21 }
 0x137   : > { %v586_v31 = vadd.f32 %v585_v46, %v555_v43  ;;  %v518_v48 = vadd.f32 %v1079_v51, %v517_v44 }
 0x139   : > { %v519_v45 = vadd.f32 %v518_v48, %v449_v4  ;;  %v587_v50 = vadd.f32 %v586_v31, %v556_v47 }
 0x13b   : > { %v520_v53 = vadd.f32 %v825_v63, %v519_v45  ;;  %v588_v54 = vadd.f32 %v587_v50, %v557_v49 }
 0x13d   : > { %v521_v56 = vrot.slane %v520_v53, 4  ;;  %v589_v57 = vadd.f32 %v588_v54, %v558_v52 }
 0x13f   : > { %v522_v41 = vadd.f32 %v521_v56, %v520_v53  ;;  %v590_v58 = vrot.slane %v589_v57, 4 }
 0x141   : > { %v523_v55 = vrot.slane %v522_v41, 2  ;;  %v591_v60 = vadd.f32 %v590_v58, %v589_v57 }
 0x143   : > { %v524_v61 = vadd.f32 %v523_v55, %v522_v41  ;;  %v592_v0 = vrot.slane %v591_v60, 2 }
 0x145   : > { %v525_v1 = vrot.slane %v524_v61, 1  ;;  %v593_v3 = vadd.f32 %v592_v0, %v591_v60 }
 0x147   : > { %v594_v51 = vrot.slane %v593_v3, 1  ;;  %v526_v63 = vadd.f32 %v525_v1, %v524_v61 }
 0x149   : > { %v595_v4 = vadd.f32 %v594_v51, %v593_v3 }
 0x14b   : > { %v597_v6 = vsel %vm596_vm0, %v526_v63, %v595_v4 }
 0x14c   : > { %598 = vst [vmem:[%s184_s5] sm:$0x3] %v597_v6 }
 0x14d PF: > { %s14_s12 = sadd.s32 1, %s888_s12  }
 0x14e   : > { %p11_p5 = scmp.ge.s32.totalorder %s14_s12, 4  }
 0x150   :  { %13 = sbr.rel (!%p11_p5) target bundleno = 1 (0x1), region = 70 }

// kernel: bottleneck_forward.6
= control target key start
LH: loop header
LB: loop body
LE: loop exit
PB: predicated region body
PF: predicated region fallthrough
CT: control target
= control target key end

     0   :  { %s1086_s18 = smov 0   ;;  %s1386_s0 = inlined_call_operand.vmem [shape: f32[512,128], index: 0, kind: input, shape index: {}]   ;;  %s1387_s1 = inlined_call_operand.vmem [shape: f32[1,128], index: 1, kind: input, shape index: {}]   ;;  %s1388_s2 = inlined_call_operand.vmem [shape: f32[1,128], index: 2, kind: input, shape index: {}]   ;;  %s1389_s3 = inlined_call_operand.vmem [shape: f32[128,128], index: 3, kind: input, shape index: {}]   ;;  %s1390_s4 = inlined_call_operand.vmem [shape: f32[512,128], index: 4, kind: output, shape index: {0}]   ;;  %s1391_s5 = inlined_call_operand.vmem [shape: f32[2,2,128], index: 5, kind: output, shape index: {1}]  }
   0x1 LB: > { %s1092_s19 = sadd.s32 4294967295, %s1054_s18   ;;  %p854_p0 = scmp.ge.s32.totalorder %s1054_s18, 1  ;;  %s1054_s18 = sphi %s1086_s18, %s16_s18  }
   0x2   : > { %p191_p1 = scmp.lt.s32.totalorder %s1054_s18, 3 }
   0x4   : > { %p192_p2 = pnand %p854_p0, %p191_p1 }
   0x5   : > { %v381_v0 = vld [vmem:[%s1389_s3] sm:$0xff] (!%p192_p2)  ;;  %v382_v1 = vld [vmem:[%s1389_s3 + $0x8] sm:$0xff] (!%p192_p2)  ;;  %v383_v2 = vld [vmem:[%s1389_s3 + $0x10] sm:$0xff] (!%p192_p2)  ;;  %s855_s26 = sshll.u32 (!%p192_p2), %s1092_s19, 5  ;;  %p235_p4 = scmp.lt.s32.totalorder (!%p192_p2), %s1092_s19, 1  ;;  %vm760_vm0 = vcmask (!%p192_p2), 1040384  }
   0x6   : > { %195 = sbr.rel (%p192_p2) target bundleno = 333 (0x14d), region = 36  ;;  %v992_v3 = vpack.c.bf16 (!%p192_p2), %v382_v1, %v381_v0  ;;  %v384_v4 = vld [vmem:[%s1389_s3 + $0x18] sm:$0xff] (!%p192_p2)  ;;  %p224_p3 = scmp.lt.s32.totalorder (!%p192_p2), %s855_s26, 63  ;;  %v385_v6 = vld [vmem:[%s1389_s3 + $0x20] sm:$0xff] (!%p192_p2)  ;;  %v386_v7 = vld [vmem:[%s1389_s3 + $0x28] sm:$0xff] (!%p192_p2) }
   0x7   : > { %v996_v5 = vpack.c.bf16 (!%p192_p2), %v384_v4, %v383_v2  ;;  %v1000_v8 = vpack.c.bf16 (!%p192_p2), %v386_v7, %v385_v6  ;;  %v1121_v9 = vld [vmem:[%s1387_s1] ss:$0 sm:$0xff] (!%p192_p2)  ;;  %v387_v10 = vld [vmem:[%s1389_s3 + $0x30] sm:$0xff] (!%p192_p2)  ;;  %v388_v11 = vld [vmem:[%s1389_s3 + $0x38] sm:$0xff] (!%p192_p2) }
   0x8   : > { %993 = vmatprep.subr.bf16.mxu0 (!%p192_p2), %v992_v3  ;;  %1024 = vmatprep.subr.bf16.mxu1 (!%p192_p2), %v992_v3  ;;  %v1140_v13 = vld [vmem:[%s1388_s2] ss:$0 sm:$0xff] (!%p192_p2)  ;;  %v1004_v15 = vpack.c.bf16 (!%p192_p2), %v388_v11, %v387_v10  ;;  %v390_v17 = vld [vmem:[%s1389_s3 + $0x48] sm:$0xff] (!%p192_p2)  ;;  %v391_v21 = vld [vmem:[%s1389_s3 + $0x50] sm:$0xff] (!%p192_p2) }
   0x9   : > { %995 = vmatpush3.bf16.msra.mxu0 (!%p192_p2), %v992_v3  ;;  %1032 = vmatpush3.bf16.msra.mxu1 (!%p192_p2), %v992_v3  ;;  %v389_v16 = vld [vmem:[%s1389_s3 + $0x40] sm:$0xff] (!%p192_p2)  ;;  %v392_v22 = vld [vmem:[%s1389_s3 + $0x58] sm:$0xff] (!%p192_p2)  ;;  %v394_v26 = vld [vmem:[%s1389_s3 + $0x68] sm:$0xff] (!%p192_p2) }
   0xa   : > { %997 = vmatprep.subr.bf16.mxu0 (!%p192_p2), %v996_v5  ;;  %1025 = vmatprep.subr.bf16.mxu1 (!%p192_p2), %v996_v5  ;;  %v1008_v20 = vpack.c.bf16 (!%p192_p2), %v390_v17, %v389_v16  ;;  %v1012_v23 = vpack.c.bf16 (!%p192_p2), %v392_v22, %v391_v21  ;;  %v393_v25 = vld [vmem:[%s1389_s3 + $0x60] sm:$0xff] (!%p192_p2)  ;;  %v395_v33 = vld [vmem:[%s1389_s3 + $0x70] sm:$0xff] (!%p192_p2)  ;;  %v396_v34 = vld [vmem:[%s1389_s3 + $0x78] sm:$0xff] (!%p192_p2) }
   0xb   : > { %v1016_v30 = vpack.c.bf16 (!%p192_p2), %v394_v26, %v393_v25  ;;  %v1020_v44 = vpack.c.bf16 (!%p192_p2), %v396_v34, %v395_v33 }
   0xd   : > { %s1393_s26 = smov (!%p224_p3, %s855_s26), 63  ;;  %999 = vmatpush3.bf16.msra.mxu0 %v996_v5  ;;  %1033 = vmatpush3.bf16.msra.mxu1 %v996_v5  ;;  %s1395_s19 = smov (!%p235_p4, %s1092_s19), 1 }
   0xe   : > { %s856_s8 = sshll.u32 %s1393_s26, 3  ;;  %1001 = vmatprep.subr.bf16.mxu0 %v1000_v8  ;;  %1026 = vmatprep.subr.bf16.mxu1 %v1000_v8  ;;  %s859_s26 = sshll.u32 %s1395_s19, 1 }
   0xf   : > { %s1134_s17 = scalar_lea.vmem %s1386_s0, %s856_s8  ;;  %s238_s21 = scalar_lea.vmem %s1391_s5, %s859_s26 }
  0x10   : > { %v239_v12 = vld [vmem:[%s1134_s17] sm:$0xff]  ;;  %v240_v27 = vld [vmem:[%s1134_s17 + $0x8] sm:$0xff]  ;;  %v241_v31 = vld [vmem:[%s1134_s17 + $0x10] sm:$0xff] }
  0x11   : > { %v278_v14 = vmul.f32 %v1121_v9, %v239_v12  ;;  %1003 = vmatpush3.bf16.msra.mxu0 %v1000_v8  ;;  %1034 = vmatpush3.bf16.msra.mxu1 %v1000_v8  ;;  %v255_v24 = vld [vmem:[%s1134_s17 + $0x80] sm:$0xff]  ;;  %v256_v29 = vld [vmem:[%s1134_s17 + $0x88] sm:$0xff]  ;;  %v257_v32 = vld [vmem:[%s1134_s17 + $0x90] sm:$0xff]  ;;  %v279_v36 = vmul.f32 %v1121_v9, %v240_v27  ;;  %v280_v40 = vmul.f32 %v1121_v9, %v241_v31 }
  0x12   : > { %1005 = vmatprep.subr.bf16.mxu0 %v1004_v15  ;;  %1027 = vmatprep.subr.bf16.mxu1 %v1004_v15  ;;  %v294_v28 = vmul.f32 %v1121_v9, %v255_v24  ;;  %v242_v37 = vld [vmem:[%s1134_s17 + $0x18] sm:$0xff]  ;;  %v243_v38 = vld [vmem:[%s1134_s17 + $0x20] sm:$0xff]  ;;  %v295_v39 = vmul.f32 %v1121_v9, %v256_v29  ;;  %v296_v42 = vmul.f32 %v1121_v9, %v257_v32  ;;  %v244_v49 = vld [vmem:[%s1134_s17 + $0x28] sm:$0xff] }
  0x13   : > { %v317_v18 = vadd.f32 %v1140_v13, %v278_v14  ;;  %v258_v43 = vld [vmem:[%s1134_s17 + $0x98] sm:$0xff]  ;;  %v259_v45 = vld [vmem:[%s1134_s17 + $0xa0] sm:$0xff]  ;;  %v281_v46 = vmul.f32 %v1121_v9, %v242_v37  ;;  %v282_v47 = vmul.f32 %v1121_v9, %v243_v38  ;;  %v318_v48 = vadd.f32 %v1140_v13, %v279_v36  ;;  %v245_v50 = vld [vmem:[%s1134_s17 + $0x30] sm:$0xff] }
  0x14   : > { %v333_v35 = vadd.f32 %v1140_v13, %v294_v28  ;;  %v334_v51 = vadd.f32 %v1140_v13, %v295_v39  ;;  %v297_v52 = vmul.f32 %v1121_v9, %v258_v43  ;;  %v319_v53 = vadd.f32 %v1140_v13, %v280_v40  ;;  %v260_v56 = vld [vmem:[%s1134_s17 + $0xa8] sm:$0xff]  ;;  %v261_v57 = vld [vmem:[%s1134_s17 + $0xb0] sm:$0xff]  ;;  %v246_v63 = vld [vmem:[%s1134_s17 + $0x38] sm:$0xff] }
  0x15   : > { %v349_v19 = vmax.f32 %v317_v18, 0.0  ;;  %1007 = vmatpush3.bf16.msra.mxu0 %v1004_v15  ;;  %1035 = vmatpush3.bf16.msra.mxu1 %v1004_v15  ;;  %v335_v54 = vadd.f32 %v1140_v13, %v296_v42  ;;  %v298_v55 = vmul.f32 %v1121_v9, %v259_v45  ;;  %v320_v58 = vadd.f32 %v1140_v13, %v281_v46  ;;  %v262_v7 = vld [vmem:[%s1134_s17 + $0xb8] sm:$0xff]  ;;  %v247_v8 = vld [vmem:[%s1134_s17 + $0x40] sm:$0xff]  ;;  %v248_v17 = vld [vmem:[%s1134_s17 + $0x48] sm:$0xff] }
  0x16   : > { %1009 = vmatprep.subr.bf16.mxu0 %v1008_v20  ;;  %1028 = vmatprep.subr.bf16.mxu1 %v1008_v20  ;;  %v365_v41 = vmax.f32 %v333_v35, 0.0  ;;  %v321_v59 = vadd.f32 %v1140_v13, %v282_v47  ;;  %v283_v60 = vmul.f32 %v1121_v9, %v244_v49  ;;  %v284_v61 = vmul.f32 %v1121_v9, %v245_v50  ;;  %v263_v10 = vld [vmem:[%s1134_s17 + $0xc0] sm:$0xff]  ;;  %v249_v22 = vld [vmem:[%s1134_s17 + $0x50] sm:$0xff]  ;;  %v264_v26 = vld [vmem:[%s1134_s17 + $0xc8] sm:$0xff] }
  0x17   : > { %944 = vmatprep.mubr.f32.mxu0 %v349_v19  ;;  %v350_v62 = vmax.f32 %v318_v48, 0.0  ;;  %v366_v0 = vmax.f32 %v334_v51, 0.0  ;;  %v336_v1 = vadd.f32 %v1140_v13, %v297_v52  ;;  %v299_v2 = vmul.f32 %v1121_v9, %v260_v56  ;;  %v265_v27 = vld [vmem:[%s1134_s17 + $0xd0] sm:$0xff]  ;;  %v250_v33 = vld [vmem:[%s1134_s17 + $0x58] sm:$0xff]  ;;  %v251_v34 = vld [vmem:[%s1134_s17 + $0x60] sm:$0xff] }
  0x18   : > { %968 = vmatprep.mubr.f32.mxu1 %v365_v41  ;;  %v351_v3 = vmax.f32 %v319_v53, 0.0  ;;  %v367_v4 = vmax.f32 %v335_v54, 0.0  ;;  %v337_v5 = vadd.f32 %v1140_v13, %v298_v55  ;;  %v300_v6 = vmul.f32 %v1121_v9, %v261_v57  ;;  %v266_v42 = vld [vmem:[%s1134_s17 + $0xd8] sm:$0xff]  ;;  %v267_v43 = vld [vmem:[%s1134_s17 + $0xe0] sm:$0xff]  ;;  %v252_v49 = vld [vmem:[%s1134_s17 + $0x68] sm:$0xff] }
  0x19   : > { %1011 = vmatpush3.bf16.msra.mxu0 %v1008_v20  ;;  %1036 = vmatpush3.bf16.msra.mxu1 %v1008_v20  ;;  %v352_v11 = vmax.f32 %v320_v58, 0.0  ;;  %v322_v12 = vadd.f32 %v1140_v13, %v283_v60  ;;  %v323_v14 = vadd.f32 %v1140_v13, %v284_v61  ;;  %v285_v15 = vmul.f32 %v1121_v9, %v246_v63  ;;  %v268_v57 = vld [vmem:[%s1134_s17 + $0xe8] sm:$0xff]  ;;  %v253_v58 = vld [vmem:[%s1134_s17 + $0x70] sm:$0xff] }
  0x1a   : > { %1013 = vmatprep.subr.bf16.mxu0 %v1012_v23  ;;  %1029 = vmatprep.subr.bf16.mxu1 %v1012_v23  ;;  %v353_v16 = vmax.f32 %v321_v59, 0.0  ;;  %v368_v18 = vmax.f32 %v336_v1, 0.0  ;;  %v338_v19 = vadd.f32 %v1140_v13, %v299_v2  ;;  %v301_v20 = vmul.f32 %v1121_v9, %v262_v7  ;;  %v269_v59 = vld [vmem:[%s1134_s17 + $0xf0] sm:$0xff] }
  0x1b   : > { %v286_v21 = vmul.f32 %v1121_v9, %v247_v8  ;;  %v339_v24 = vadd.f32 %v1140_v13, %v300_v6  ;;  %v302_v25 = vmul.f32 %v1121_v9, %v263_v10  ;;  %v354_v28 = vmax.f32 %v322_v12, 0.0  ;;  %v270_v10 = vld [vmem:[%s1134_s17 + $0xf8] sm:$0xff] }
  0x1c   : > { %v355_v29 = vmax.f32 %v323_v14, 0.0  ;;  %v287_v31 = vmul.f32 %v1121_v9, %v248_v17  ;;  %v288_v32 = vmul.f32 %v1121_v9, %v249_v22  ;;  %v370_v35 = vmax.f32 %v338_v19, 0.0 }
  0x1d   : > { %1015 = vmatpush3.bf16.msra.mxu0 %v1012_v23  ;;  %1037 = vmatpush3.bf16.msra.mxu1 %v1012_v23  ;;  %v369_v23 = vmax.f32 %v337_v5, 0.0  ;;  %v340_v36 = vadd.f32 %v1140_v13, %v301_v20  ;;  %v303_v37 = vmul.f32 %v1121_v9, %v264_v26  ;;  %v325_v38 = vadd.f32 %v1140_v13, %v286_v21  ;;  %v254_v5 = vld [vmem:[%s1134_s17 + $0x78] sm:$0xff]  ;;  %s1266_s17 = scalar_lea.vmem %s1390_s4, %s856_s8 }
  0x1e   : > { %1017 = vmatprep.subr.bf16.mxu0 %v1016_v30  ;;  %1030 = vmatprep.subr.bf16.mxu1 %v1016_v30  ;;  %v371_v39 = vmax.f32 %v339_v24, 0.0  ;;  %v341_v40 = vadd.f32 %v1140_v13, %v302_v25  ;;  %v304_v41 = vmul.f32 %v1121_v9, %v265_v27  ;;  %v326_v45 = vadd.f32 %v1140_v13, %v287_v31 }
  0x1f   : > { %v289_v46 = vmul.f32 %v1121_v9, %v250_v33  ;;  %v290_v47 = vmul.f32 %v1121_v9, %v251_v34  ;;  %v327_v48 = vadd.f32 %v1140_v13, %v288_v32  ;;  %v372_v50 = vmax.f32 %v340_v36, 0.0 }
  0x20   : > { %v342_v51 = vadd.f32 %v1140_v13, %v303_v37  ;;  %v305_v52 = vmul.f32 %v1121_v9, %v266_v42  ;;  %v357_v53 = vmax.f32 %v325_v38, 0.0  ;;  %v373_v54 = vmax.f32 %v341_v40, 0.0 }
  0x21   : > { %1019 = vmatpush3.bf16.msra.mxu0 %v1016_v30  ;;  %1038 = vmatpush3.bf16.msra.mxu1 %v1016_v30  ;;  %v324_v30 = vadd.f32 %v1140_v13, %v285_v15  ;;  %v343_v55 = vadd.f32 %v1140_v13, %v304_v41  ;;  %v306_v56 = vmul.f32 %v1121_v9, %v267_v43  ;;  %v358_v60 = vmax.f32 %v326_v45, 0.0 }
  0x22   : > { %1021 = vmatprep.subr.bf16.mxu0 %v1020_v44  ;;  %1031 = vmatprep.subr.bf16.mxu1 %v1020_v44  ;;  %v328_v61 = vadd.f32 %v1140_v13, %v289_v46  ;;  %v291_v63 = vmul.f32 %v1121_v9, %v252_v49  ;;  %v374_v1 = vmax.f32 %v342_v51, 0.0  ;;  %v344_v2 = vadd.f32 %v1140_v13, %v305_v52 }
  0x23   : > { %v375_v6 = vmax.f32 %v343_v55, 0.0  ;;  %v345_v7 = vadd.f32 %v1140_v13, %v306_v56  ;;  %v308_v8 = vmul.f32 %v1121_v9, %v269_v59  ;;  %v293_v14 = vmul.f32 %v1121_v9, %v254_v5 }
  0x24   : > { %v330_v12 = vadd.f32 %v1140_v13, %v291_v63  ;;  %v376_v15 = vmax.f32 %v344_v2, 0.0  ;;  %v309_v17 = vmul.f32 %v1121_v9, %v270_v10 }
  0x25   : > { %1023 = vmatpush3.bf16.msra.mxu0 %v1020_v44  ;;  %1039 = vmatpush3.bf16.msra.mxu1 %v1020_v44  ;;  %v356_v44 = vmax.f32 %v324_v30, 0.0  ;;  %v377_v20 = vmax.f32 %v345_v7, 0.0  ;;  %v347_v21 = vadd.f32 %v1140_v13, %v308_v8 }
  0x26   : > { %v362_v22 = vmax.f32 %v330_v12, 0.0  ;;  %v348_v25 = vadd.f32 %v1140_v13, %v309_v17 }
  0x28   : > { %945 = vmatmul.mubr.f32.vlgmr.msra.gmra.mrb[0].mxu0 %v350_v62  ;;  %969 = vmatmul.mubr.f32.vlgmr.msra.gmra.mrb[0].mxu1 %v366_v0  ;;  %v329_v62 = vadd.f32 %v1140_v13, %v290_v47  ;;  %v359_v0 = vmax.f32 %v327_v48, 0.0 }
  0x29   : > { %947 = vmatprep.mubr.f32.mxu0 %v351_v3  ;;  %971 = vmatprep.mubr.f32.mxu1 %v367_v4  ;;  %v307_v3 = vmul.f32 %v1121_v9, %v268_v57  ;;  %v292_v4 = vmul.f32 %v1121_v9, %v253_v58  ;;  %v379_v9 = vmax.f32 %v347_v21, 0.0 }
  0x2b   : > { %v331_v19 = vadd.f32 %v1140_v13, %v292_v4 }
  0x2c   : > { %948 = vmatmul.mubr.f32.gmra.mrb[2].mxu0 %v352_v11  ;;  %972 = vmatmul.mubr.f32.gmra.mrb[2].mxu1 %v368_v18  ;;  %v360_v11 = vmax.f32 %v328_v61, 0.0  ;;  %v361_v18 = vmax.f32 %v329_v62, 0.0 }
  0x2d   : > { %950 = vmatprep.mubr.f32.mxu0 %v353_v16  ;;  %974 = vmatprep.mubr.f32.mxu1 %v369_v23  ;;  %v346_v16 = vadd.f32 %v1140_v13, %v307_v3  ;;  %v332_v23 = vadd.f32 %v1140_v13, %v293_v14  ;;  %v363_v26 = vmax.f32 %v331_v19, 0.0 }
  0x2f   : > { %v378_v24 = vmax.f32 %v346_v16, 0.0  ;;  %v364_v27 = vmax.f32 %v332_v23, 0.0 }
  0x30   : > { %951 = vmatmul.mubr.f32.gmra.mrb[4].mxu0 %v354_v28  ;;  %975 = vmatmul.mubr.f32.gmra.mrb[4].mxu1 %v370_v35  ;;  %v380_v28 = vmax.f32 %v348_v25, 0.0 }
  0x31   : > { %953 = vmatprep.mubr.f32.mxu0 %v355_v29  ;;  %977 = vmatprep.mubr.f32.mxu1 %v371_v39 }
  0x34   : > { %954 = vmatmul.mubr.f32.gmra.mrb[6].mxu0 %v356_v44  ;;  %978 = vmatmul.mubr.f32.gmra.mrb[6].mxu1 %v372_v50 }
  0x35   : > { %956 = vmatprep.mubr.f32.mxu0 %v357_v53  ;;  %980 = vmatprep.mubr.f32.mxu1 %v373_v54 }
  0x38   : > { %957 = vmatmul.mubr.f32.gmra.mrb[8].mxu0 %v358_v60  ;;  %981 = vmatmul.mubr.f32.gmra.mrb[8].mxu1 %v374_v1 }
  0x39   : > { %959 = vmatprep.mubr.f32.mxu0 %v359_v0  ;;  %983 = vmatprep.mubr.f32.mxu1 %v375_v6 }
  0x3c   : > { %960 = vmatmul.mubr.f32.gmra.mrb[10].mxu0 %v360_v11  ;;  %984 = vmatmul.mubr.f32.gmra.mrb[10].mxu1 %v376_v15 }
  0x3d   : > { %962 = vmatprep.mubr.f32.mxu0 %v361_v18  ;;  %986 = vmatprep.mubr.f32.mxu1 %v377_v20 }
  0x40   : > { %963 = vmatmul.mubr.f32.gmra.mrb[12].mxu0 %v362_v22  ;;  %987 = vmatmul.mubr.f32.gmra.mrb[12].mxu1 %v378_v24 }
  0x41   : > { %965 = vmatprep.mubr.f32.mxu0 %v363_v26  ;;  %989 = vmatprep.mubr.f32.mxu1 %v379_v9 }
  0x44   : > { %966 = vmatmul.mubr.f32.gmra.mrb[14].mxu0 %v364_v27  ;;  %990 = vmatmul.mubr.f32.gmra.mrb[14].mxu1 %v380_v28 }
  0xfb   : > { %v946_v13 = vpop.f32.mrb[0].mxu0  ;;  %v1268_v29 = vpop.f32.mrb[0].mxu1 }
  0xfc   : > { %623 = vst [vmem:[%s1266_s17 + $0x8] sm:$0xff] %v946_v13  ;;  %v692_v30 = vmul.f32 %v946_v13, %v946_v13  ;;  %v463_v31 = vpop.f32.mrb[1].mxu0  ;;  %639 = vst [vmem:[%s1266_s17 + $0x88] sm:$0xff] %v1268_v29  ;;  %v1273_v32 = vpop.f32.mrb[1].mxu1 }
  0xfd   : > { %622 = vst [vmem:[%s1266_s17] sm:$0xff] %v463_v31  ;;  %v654_v33 = vadd.f32 %v946_v13, %v463_v31  ;;  %v691_v34 = vmul.f32 %v463_v31, %v463_v31  ;;  %638 = vst [vmem:[%s1266_s17 + $0x80] sm:$0xff] %v1273_v32 }
  0xff   : > { %v723_v35 = vadd.f32 %v692_v30, %v691_v34  ;;  %v949_v36 = vpop.f32.mrb[2].mxu0  ;;  %v1278_v37 = vpop.f32.mrb[2].mxu1 }
 0x100   : > { %625 = vst [vmem:[%s1266_s17 + $0x18] sm:$0xff] %v949_v36  ;;  %v473_v38 = vpop.f32.mrb[3].mxu0  ;;  %641 = vst [vmem:[%s1266_s17 + $0x98] sm:$0xff] %v1278_v37  ;;  %v1283_v39 = vpop.f32.mrb[3].mxu1  ;;  %v694_v42 = vmul.f32 %v949_v36, %v949_v36 }
 0x101   : > { %624 = vst [vmem:[%s1266_s17 + $0x10] sm:$0xff] %v473_v38  ;;  %v655_v40 = vadd.f32 %v654_v33, %v473_v38  ;;  %v693_v41 = vmul.f32 %v473_v38, %v473_v38  ;;  %640 = vst [vmem:[%s1266_s17 + $0x90] sm:$0xff] %v1283_v39 }
 0x103   : > { %v724_v43 = vadd.f32 %v723_v35, %v693_v41  ;;  %v952_v44 = vpop.f32.mrb[4].mxu0  ;;  %v656_v45 = vadd.f32 %v949_v36, %v655_v40  ;;  %v1288_v46 = vpop.f32.mrb[4].mxu1 }
 0x104   : > { %627 = vst [vmem:[%s1266_s17 + $0x28] sm:$0xff] %v952_v44  ;;  %v483_v47 = vpop.f32.mrb[5].mxu0  ;;  %643 = vst [vmem:[%s1266_s17 + $0xa8] sm:$0xff] %v1288_v46  ;;  %v1293_v48 = vpop.f32.mrb[5].mxu1  ;;  %v696_v52 = vmul.f32 %v952_v44, %v952_v44 }
 0x105   : > { %626 = vst [vmem:[%s1266_s17 + $0x20] sm:$0xff] %v483_v47  ;;  %v657_v49 = vadd.f32 %v656_v45, %v483_v47  ;;  %v695_v50 = vmul.f32 %v483_v47, %v483_v47  ;;  %v725_v51 = vadd.f32 %v724_v43, %v694_v42  ;;  %642 = vst [vmem:[%s1266_s17 + $0xa0] sm:$0xff] %v1293_v48 }
 0x106   : > { %v707_v45 = vmul.f32 %v1273_v32, %v1273_v32 }
 0x107   : > { %v726_v53 = vadd.f32 %v725_v51, %v695_v50  ;;  %v955_v54 = vpop.f32.mrb[6].mxu0  ;;  %v658_v55 = vadd.f32 %v952_v44, %v657_v49  ;;  %v1298_v56 = vpop.f32.mrb[6].mxu1  ;;  %v708_v50 = vmul.f32 %v1268_v29, %v1268_v29 }
 0x108   : > { %629 = vst [vmem:[%s1266_s17 + $0x38] sm:$0xff] %v955_v54  ;;  %v493_v57 = vpop.f32.mrb[7].mxu0  ;;  %645 = vst [vmem:[%s1266_s17 + $0xb8] sm:$0xff] %v1298_v56  ;;  %v1303_v58 = vpop.f32.mrb[7].mxu1  ;;  %v698_v62 = vmul.f32 %v955_v54, %v955_v54 }
 0x109   : > { %628 = vst [vmem:[%s1266_s17 + $0x30] sm:$0xff] %v493_v57  ;;  %v659_v59 = vadd.f32 %v658_v55, %v493_v57  ;;  %v697_v60 = vmul.f32 %v493_v57, %v493_v57  ;;  %v727_v61 = vadd.f32 %v726_v53, %v696_v52  ;;  %644 = vst [vmem:[%s1266_s17 + $0xb0] sm:$0xff] %v1303_v58 }
 0x10a   : > { %v709_v53 = vmul.f32 %v1283_v39, %v1283_v39  ;;  %v710_v57 = vmul.f32 %v1278_v37, %v1278_v37 }
 0x10b   : > { %v728_v63 = vadd.f32 %v727_v61, %v697_v60  ;;  %v958_v0 = vpop.f32.mrb[8].mxu0  ;;  %v660_v1 = vadd.f32 %v955_v54, %v659_v59  ;;  %v1308_v2 = vpop.f32.mrb[8].mxu1 }
 0x10c   : > { %631 = vst [vmem:[%s1266_s17 + $0x48] sm:$0xff] %v958_v0  ;;  %v503_v3 = vpop.f32.mrb[9].mxu0  ;;  %647 = vst [vmem:[%s1266_s17 + $0xc8] sm:$0xff] %v1308_v2  ;;  %v1313_v4 = vpop.f32.mrb[9].mxu1  ;;  %v700_v8 = vmul.f32 %v958_v0, %v958_v0 }
 0x10d   : > { %630 = vst [vmem:[%s1266_s17 + $0x40] sm:$0xff] %v503_v3  ;;  %v661_v5 = vadd.f32 %v660_v1, %v503_v3  ;;  %v699_v6 = vmul.f32 %v503_v3, %v503_v3  ;;  %v729_v7 = vadd.f32 %v728_v63, %v698_v62  ;;  %646 = vst [vmem:[%s1266_s17 + $0xc0] sm:$0xff] %v1313_v4 }
 0x10f   : > { %v730_v10 = vadd.f32 %v729_v7, %v699_v6  ;;  %v961_v11 = vpop.f32.mrb[10].mxu0  ;;  %v662_v12 = vadd.f32 %v958_v0, %v661_v5  ;;  %v1318_v14 = vpop.f32.mrb[10].mxu1 }
 0x110   : > { %633 = vst [vmem:[%s1266_s17 + $0x58] sm:$0xff] %v961_v11  ;;  %v513_v15 = vpop.f32.mrb[11].mxu0  ;;  %649 = vst [vmem:[%s1266_s17 + $0xd8] sm:$0xff] %v1318_v14  ;;  %v1323_v16 = vpop.f32.mrb[11].mxu1  ;;  %v702_v20 = vmul.f32 %v961_v11, %v961_v11 }
 0x111   : > { %632 = vst [vmem:[%s1266_s17 + $0x50] sm:$0xff] %v513_v15  ;;  %v663_v17 = vadd.f32 %v662_v12, %v513_v15  ;;  %v701_v18 = vmul.f32 %v513_v15, %v513_v15  ;;  %v731_v19 = vadd.f32 %v730_v10, %v700_v8  ;;  %648 = vst [vmem:[%s1266_s17 + $0xd0] sm:$0xff] %v1323_v16 }
 0x113   : > { %v732_v21 = vadd.f32 %v731_v19, %v701_v18  ;;  %v964_v22 = vpop.f32.mrb[12].mxu0  ;;  %v664_v23 = vadd.f32 %v961_v11, %v663_v17  ;;  %v1328_v24 = vpop.f32.mrb[12].mxu1 }
 0x114   : > { %635 = vst [vmem:[%s1266_s17 + $0x68] sm:$0xff] %v964_v22  ;;  %v523_v25 = vpop.f32.mrb[13].mxu0  ;;  %651 = vst [vmem:[%s1266_s17 + $0xe8] sm:$0xff] %v1328_v24  ;;  %v603_v26 = vpop.f32.mrb[13].mxu1  ;;  %v704_v13 = vmul.f32 %v964_v22, %v964_v22 }
 0x115   : > { %634 = vst [vmem:[%s1266_s17 + $0x60] sm:$0xff] %v523_v25  ;;  %v665_v9 = vadd.f32 %v664_v23, %v523_v25  ;;  %v703_v27 = vmul.f32 %v523_v25, %v523_v25  ;;  %v733_v28 = vadd.f32 %v732_v21, %v702_v20  ;;  %650 = vst [vmem:[%s1266_s17 + $0xe0] sm:$0xff] %v603_v26 }
 0x116   : > { %v719_v18 = vmul.f32 %v603_v26, %v603_v26  ;;  %v720_v21 = vmul.f32 %v1328_v24, %v1328_v24 }
 0x117   : > { %v734_v30 = vadd.f32 %v733_v28, %v703_v27  ;;  %v967_v31 = vpop.f32.mrb[14].mxu0  ;;  %v666_v33 = vadd.f32 %v964_v22, %v665_v9  ;;  %v991_v34 = vpop.f32.mrb[14].mxu1 }
 0x118   : > { %637 = vst [vmem:[%s1266_s17 + $0x78] sm:$0xff] %v967_v31  ;;  %v533_v35 = vpop.f32.mrb[15].mxu0  ;;  %653 = vst [vmem:[%s1266_s17 + $0xf8] sm:$0xff] %v991_v34  ;;  %v613_v36 = vpop.f32.mrb[15].mxu1  ;;  %v706_v42 = vmul.f32 %v967_v31, %v967_v31  ;;  %v722_v9 = vmul.f32 %v991_v34, %v991_v34 }
 0x119   : > { %636 = vst [vmem:[%s1266_s17 + $0x70] sm:$0xff] %v533_v35  ;;  %v667_v38 = vadd.f32 %v666_v33, %v533_v35  ;;  %v705_v40 = vmul.f32 %v533_v35, %v533_v35  ;;  %v735_v41 = vadd.f32 %v734_v30, %v704_v13  ;;  %652 = vst [vmem:[%s1266_s17 + $0xf0] sm:$0xff] %v613_v36 }
 0x11a   : > { %v721_v23 = vmul.f32 %v613_v36, %v613_v36 }
 0x11b   : > { %v668_v43 = vadd.f32 %v967_v31, %v667_v38  ;;  %v736_v44 = vadd.f32 %v735_v41, %v705_v40 }
 0x11d   : > { %v737_v47 = vadd.f32 %v736_v44, %v706_v42  ;;  %v669_v49 = vadd.f32 %v668_v43, %v1273_v32  ;;  %v711_v32 = vmul.f32 %v1293_v48, %v1293_v48 }
 0x11f   : > { %v738_v51 = vadd.f32 %v737_v47, %v707_v45  ;;  %v670_v52 = vadd.f32 %v1268_v29, %v669_v49  ;;  %v712_v29 = vmul.f32 %v1288_v46, %v1288_v46 }
 0x121   : > { %v671_v54 = vadd.f32 %v670_v52, %v1283_v39  ;;  %v739_v55 = vadd.f32 %v738_v51, %v708_v50  ;;  %v713_v39 = vmul.f32 %v1303_v58, %v1303_v58 }
 0x123   : > { %v740_v59 = vadd.f32 %v739_v55, %v709_v53  ;;  %v672_v60 = vadd.f32 %v1278_v37, %v671_v54  ;;  %v714_v37 = vmul.f32 %v1298_v56, %v1298_v56 }
 0x125   : > { %v673_v61 = vadd.f32 %v672_v60, %v1293_v48  ;;  %v741_v62 = vadd.f32 %v740_v59, %v710_v57  ;;  %v715_v48 = vmul.f32 %v1313_v4, %v1313_v4 }
 0x127   : > { %v742_v63 = vadd.f32 %v741_v62, %v711_v32  ;;  %v674_v0 = vadd.f32 %v1288_v46, %v673_v61  ;;  %v716_v46 = vmul.f32 %v1308_v2, %v1308_v2 }
 0x129   : > { %v675_v1 = vadd.f32 %v674_v0, %v1303_v58  ;;  %v743_v3 = vadd.f32 %v742_v63, %v712_v29  ;;  %v717_v58 = vmul.f32 %v1323_v16, %v1323_v16 }
 0x12b   : > { %v744_v5 = vadd.f32 %v743_v3, %v713_v39  ;;  %v676_v6 = vadd.f32 %v1298_v56, %v675_v1  ;;  %v718_v56 = vmul.f32 %v1318_v14, %v1318_v14 }
 0x12d   : > { %v677_v7 = vadd.f32 %v676_v6, %v1313_v4  ;;  %v745_v8 = vadd.f32 %v744_v5, %v714_v37 }
 0x12f   : > { %v746_v10 = vadd.f32 %v745_v8, %v715_v48  ;;  %v678_v11 = vadd.f32 %v1308_v2, %v677_v7 }
 0x131   : > { %v679_v12 = vadd.f32 %v678_v11, %v1323_v16  ;;  %v747_v15 = vadd.f32 %v746_v10, %v716_v46 }
 0x133   : > { %v748_v17 = vadd.f32 %v747_v15, %v717_v58  ;;  %v680_v4 = vadd.f32 %v1318_v14, %v679_v12 }
 0x135   : > { %v681_v19 = vadd.f32 %v680_v4, %v603_v26  ;;  %v749_v20 = vadd.f32 %v748_v17, %v718_v56 }
 0x137   : > { %v750_v2 = vadd.f32 %v749_v20, %v719_v18  ;;  %v682_v22 = vadd.f32 %v1328_v24, %v681_v19 }
 0x139   : > { %v683_v16 = vadd.f32 %v682_v22, %v613_v36  ;;  %v751_v25 = vadd.f32 %v750_v2, %v720_v21 }
 0x13b   : > { %v684_v27 = vadd.f32 %v991_v34, %v683_v16  ;;  %v752_v28 = vadd.f32 %v751_v25, %v721_v23 }
 0x13d   : > { %v685_v13 = vrot.slane %v684_v27, 4  ;;  %v753_v30 = vadd.f32 %v752_v28, %v722_v9 }
 0x13f   : > { %v686_v14 = vadd.f32 %v685_v13, %v684_v27  ;;  %v754_v31 = vrot.slane %v753_v30, 4 }
 0x141   : > { %v687_v26 = vrot.slane %v686_v14, 2  ;;  %v755_v33 = vadd.f32 %v754_v31, %v753_v30 }
 0x143   : > { %v688_v35 = vadd.f32 %v687_v26, %v686_v14  ;;  %v756_v38 = vrot.slane %v755_v33, 2 }
 0x145   : > { %v689_v40 = vrot.slane %v688_v35, 1  ;;  %v757_v41 = vadd.f32 %v756_v38, %v755_v33 }
 0x147   : > { %v758_v24 = vrot.slane %v757_v41, 1  ;;  %v690_v34 = vadd.f32 %v689_v40, %v688_v35 }
 0x149   : > { %v759_v36 = vadd.f32 %v758_v24, %v757_v41 }
 0x14b   : > { %v761_v42 = vsel %vm760_vm0, %v690_v34, %v759_v36 }
 0x14c   : > { %762 = vst [vmem:[%s238_s21] sm:$0x3] %v761_v42 }
 0x14d PF: > { %s16_s18 = sadd.s32 1, %s1054_s18  }
 0x14e   : > { %p13_p5 = scmp.ge.s32.totalorder %s16_s18, 4  }
 0x150   :  { %15 = sbr.rel (!%p13_p5) target bundleno = 1 (0x1), region = 78 }

// kernel: bottleneck_forward.7
= control target key start
LH: loop header
LB: loop body
LE: loop exit
PB: predicated region body
PF: predicated region fallthrough
CT: control target
= control target key end

     0   :  { %s585_s15 = smov 0   ;;  %s786_s0 = inlined_call_operand.vmem [shape: f32[512,128], index: 0, kind: input, shape index: {}]   ;;  %s787_s1 = inlined_call_operand.vmem [shape: f32[512,128], index: 1, kind: input, shape index: {}]   ;;  %s788_s2 = inlined_call_operand.vmem [shape: f32[1,128], index: 2, kind: input, shape index: {}]   ;;  %s789_s3 = inlined_call_operand.vmem [shape: f32[1,128], index: 3, kind: input, shape index: {}]   ;;  %s790_s4 = inlined_call_operand.vmem [shape: f32[512,128], index: 4, kind: output, shape index: {}]  }
   0x1 LB: > { %s529_s16 = sadd.s32 4294967295, %s558_s15   ;;  %p533_p0 = scmp.ge.s32.totalorder %s558_s15, 1  ;;  %s558_s15 = sphi %s585_s15, %s14_s15  }
   0x2   : > { %p174_p1 = scmp.lt.s32.totalorder %s558_s15, 3 }
   0x4   : > { %p175_p2 = pnand %p533_p0, %p174_p1 }
   0x5   : > { %s534_s17 = sshll.u32 (!%p175_p2), %s529_s16, 5  ;;  %v598_v0 = vld [vmem:[%s788_s2] ss:$0 sm:$0xff] (!%p175_p2) }
   0x6   : > { %178 = sbr.rel (%p175_p2) target bundleno = 55 (0x37), region = 36  ;;  %p206_p3 = scmp.lt.s32.totalorder (!%p175_p2), %s534_s17, 63  ;;  %v616_v2 = vld [vmem:[%s789_s3] ss:$0 sm:$0xff] (!%p175_p2) }
   0xd   : > { %s792_s17 = smov (!%p206_p3, %s534_s17), 63 }
   0xe   : > { %s593_s18 = sshll.u32 %s792_s17, 3 }
   0xf   : > { %s604_s23 = scalar_lea.vmem %s786_s0, %s593_s18  ;;  %s610_s26 = scalar_lea.vmem %s787_s1, %s593_s18 }
  0x10   : > { %v223_v1 = vld [vmem:[%s604_s23] sm:$0xff]  ;;  %v224_v3 = vld [vmem:[%s604_s23 + $0x8] sm:$0xff]  ;;  %v225_v7 = vld [vmem:[%s604_s23 + $0x10] sm:$0xff]  ;;  %s646_s5 = scalar_lea.vmem %s790_s4, %s593_s18 }
  0x11   : > { %v262_v4 = vmul.f32 %v598_v0, %v223_v1  ;;  %v333_v5 = vld [vmem:[%s610_s26] sm:$0xff]  ;;  %v263_v6 = vmul.f32 %v598_v0, %v224_v3  ;;  %v334_v8 = vld [vmem:[%s610_s26 + $0x8] sm:$0xff]  ;;  %v264_v9 = vmul.f32 %v598_v0, %v225_v7  ;;  %v226_v10 = vld [vmem:[%s604_s23 + $0x18] sm:$0xff] }
  0x12   : > { %v227_v11 = vld [vmem:[%s604_s23 + $0x20] sm:$0xff]  ;;  %v335_v14 = vld [vmem:[%s610_s26 + $0x10] sm:$0xff]  ;;  %v265_v15 = vmul.f32 %v598_v0, %v226_v10  ;;  %v336_v16 = vld [vmem:[%s610_s26 + $0x18] sm:$0xff] }
  0x13   : > { %v301_v12 = vadd.f32 %v616_v2, %v262_v4  ;;  %v302_v13 = vadd.f32 %v616_v2, %v263_v6  ;;  %v266_v17 = vmul.f32 %v598_v0, %v227_v11  ;;  %v228_v18 = vld [vmem:[%s604_s23 + $0x28] sm:$0xff]  ;;  %v303_v19 = vadd.f32 %v616_v2, %v264_v9  ;;  %v337_v20 = vld [vmem:[%s610_s26 + $0x20] sm:$0xff]  ;;  %v229_v22 = vld [vmem:[%s604_s23 + $0x30] sm:$0xff] }
  0x14   : > { %v267_v21 = vmul.f32 %v598_v0, %v228_v18  ;;  %v230_v23 = vld [vmem:[%s604_s23 + $0x38] sm:$0xff]  ;;  %v304_v26 = vadd.f32 %v616_v2, %v265_v15  ;;  %v338_v28 = vld [vmem:[%s610_s26 + $0x28] sm:$0xff]  ;;  %v268_v31 = vmul.f32 %v598_v0, %v229_v22  ;;  %v231_v33 = vld [vmem:[%s604_s23 + $0x40] sm:$0xff] }
  0x15   : > { %v365_v24 = vadd.f32 %v333_v5, %v301_v12  ;;  %v366_v25 = vadd.f32 %v334_v8, %v302_v13  ;;  %v305_v27 = vadd.f32 %v616_v2, %v266_v17  ;;  %v367_v29 = vadd.f32 %v335_v14, %v303_v19  ;;  %v232_v34 = vld [vmem:[%s604_s23 + $0x48] sm:$0xff]  ;;  %v339_v39 = vld [vmem:[%s610_s26 + $0x30] sm:$0xff]  ;;  %v340_v40 = vld [vmem:[%s610_s26 + $0x38] sm:$0xff] }
  0x16   : > { %v306_v30 = vadd.f32 %v616_v2, %v267_v21  ;;  %v269_v32 = vmul.f32 %v598_v0, %v230_v23  ;;  %v368_v37 = vadd.f32 %v336_v16, %v304_v26  ;;  %v233_v41 = vld [vmem:[%s604_s23 + $0x50] sm:$0xff]  ;;  %v307_v44 = vadd.f32 %v616_v2, %v268_v31  ;;  %v234_v46 = vld [vmem:[%s604_s23 + $0x58] sm:$0xff]  ;;  %v235_v47 = vld [vmem:[%s604_s23 + $0x60] sm:$0xff] }
  0x17   : > { %v397_v35 = vmax.f32 %v365_v24, 0.0  ;;  %v398_v36 = vmax.f32 %v366_v25, 0.0  ;;  %v369_v38 = vadd.f32 %v337_v20, %v305_v27  ;;  %v399_v42 = vmax.f32 %v367_v29, 0.0  ;;  %v236_v52 = vld [vmem:[%s604_s23 + $0x68] sm:$0xff]  ;;  %v341_v56 = vld [vmem:[%s610_s26 + $0x40] sm:$0xff]  ;;  %v343_v61 = vld [vmem:[%s610_s26 + $0x50] sm:$0xff] }
  0x18   : > { %v370_v43 = vadd.f32 %v338_v28, %v306_v30  ;;  %v308_v45 = vadd.f32 %v616_v2, %v269_v32  ;;  %v400_v48 = vmax.f32 %v368_v37, 0.0  ;;  %v270_v50 = vmul.f32 %v598_v0, %v231_v33  ;;  %v342_v57 = vld [vmem:[%s610_s26 + $0x48] sm:$0xff]  ;;  %v237_v1 = vld [vmem:[%s604_s23 + $0x70] sm:$0xff]  ;;  %v238_v3 = vld [vmem:[%s604_s23 + $0x78] sm:$0xff] }
  0x19   : > { %429 = vst [vmem:[%s646_s5] sm:$0xff] %v397_v35  ;;  %430 = vst [vmem:[%s646_s5 + $0x8] sm:$0xff] %v398_v36  ;;  %v401_v49 = vmax.f32 %v369_v38, 0.0  ;;  %v271_v51 = vmul.f32 %v598_v0, %v232_v34  ;;  %v371_v54 = vadd.f32 %v339_v39, %v307_v44  ;;  %v272_v58 = vmul.f32 %v598_v0, %v233_v41  ;;  %v344_v7 = vld [vmem:[%s610_s26 + $0x58] sm:$0xff]  ;;  %v345_v8 = vld [vmem:[%s610_s26 + $0x60] sm:$0xff] }
  0x1a   : > { %431 = vst [vmem:[%s646_s5 + $0x10] sm:$0xff] %v399_v42  ;;  %v402_v53 = vmax.f32 %v370_v43, 0.0  ;;  %v372_v55 = vadd.f32 %v340_v40, %v308_v45  ;;  %432 = vst [vmem:[%s646_s5 + $0x18] sm:$0xff] %v400_v48  ;;  %v309_v59 = vadd.f32 %v616_v2, %v270_v50  ;;  %v273_v62 = vmul.f32 %v598_v0, %v234_v46  ;;  %v346_v14 = vld [vmem:[%s610_s26 + $0x68] sm:$0xff]  ;;  %v239_v19 = vld [vmem:[%s604_s23 + $0x80] sm:$0xff] }
  0x1b   : > { %433 = vst [vmem:[%s646_s5 + $0x20] sm:$0xff] %v401_v49  ;;  %v310_v60 = vadd.f32 %v616_v2, %v271_v51  ;;  %v274_v63 = vmul.f32 %v598_v0, %v235_v47  ;;  %v403_v4 = vmax.f32 %v371_v54, 0.0  ;;  %v311_v6 = vadd.f32 %v616_v2, %v272_v58  ;;  %v240_v20 = vld [vmem:[%s604_s23 + $0x88] sm:$0xff]  ;;  %v347_v25 = vld [vmem:[%s610_s26 + $0x70] sm:$0xff]  ;;  %v348_v26 = vld [vmem:[%s610_s26 + $0x78] sm:$0xff] }
  0x1c   : > { %434 = vst [vmem:[%s646_s5 + $0x28] sm:$0xff] %v402_v53  ;;  %v404_v5 = vmax.f32 %v372_v55, 0.0  ;;  %v275_v9 = vmul.f32 %v598_v0, %v236_v52  ;;  %v373_v10 = vadd.f32 %v341_v56, %v309_v59  ;;  %v312_v12 = vadd.f32 %v616_v2, %v273_v62  ;;  %v241_v27 = vld [vmem:[%s604_s23 + $0x90] sm:$0xff]  ;;  %v242_v32 = vld [vmem:[%s604_s23 + $0x98] sm:$0xff]  ;;  %v243_v33 = vld [vmem:[%s604_s23 + $0xa0] sm:$0xff] }
  0x1d   : > { %v374_v11 = vadd.f32 %v342_v57, %v310_v60  ;;  %v313_v13 = vadd.f32 %v616_v2, %v274_v63  ;;  %435 = vst [vmem:[%s646_s5 + $0x30] sm:$0xff] %v403_v4  ;;  %v375_v15 = vadd.f32 %v343_v61, %v311_v6  ;;  %v276_v17 = vmul.f32 %v598_v0, %v237_v1  ;;  %v244_v38 = vld [vmem:[%s604_s23 + $0xa8] sm:$0xff]  ;;  %v349_v42 = vld [vmem:[%s610_s26 + $0x80] sm:$0xff]  ;;  %v351_v47 = vld [vmem:[%s610_s26 + $0x90] sm:$0xff] }
  0x1e   : > { %436 = vst [vmem:[%s646_s5 + $0x38] sm:$0xff] %v404_v5  ;;  %v314_v16 = vadd.f32 %v616_v2, %v275_v9  ;;  %v277_v18 = vmul.f32 %v598_v0, %v238_v3  ;;  %v405_v21 = vmax.f32 %v373_v10, 0.0  ;;  %v376_v23 = vadd.f32 %v344_v7, %v312_v12  ;;  %v350_v43 = vld [vmem:[%s610_s26 + $0x88] sm:$0xff]  ;;  %v245_v50 = vld [vmem:[%s604_s23 + $0xb0] sm:$0xff]  ;;  %v246_v51 = vld [vmem:[%s604_s23 + $0xb8] sm:$0xff] }
  0x1f   : > { %v406_v22 = vmax.f32 %v374_v11, 0.0  ;;  %v377_v24 = vadd.f32 %v345_v8, %v313_v13  ;;  %v407_v28 = vmax.f32 %v375_v15, 0.0  ;;  %v315_v30 = vadd.f32 %v616_v2, %v276_v17  ;;  %v352_v55 = vld [vmem:[%s610_s26 + $0x98] sm:$0xff]  ;;  %v353_v56 = vld [vmem:[%s610_s26 + $0xa0] sm:$0xff]  ;;  %v354_v62 = vld [vmem:[%s610_s26 + $0xa8] sm:$0xff] }
  0x20   : > { %v378_v29 = vadd.f32 %v346_v14, %v314_v16  ;;  %v316_v31 = vadd.f32 %v616_v2, %v277_v18  ;;  %437 = vst [vmem:[%s646_s5 + $0x40] sm:$0xff] %v405_v21  ;;  %v408_v34 = vmax.f32 %v376_v23, 0.0  ;;  %v278_v36 = vmul.f32 %v598_v0, %v239_v19  ;;  %v247_v5 = vld [vmem:[%s604_s23 + $0xc0] sm:$0xff]  ;;  %v248_v6 = vld [vmem:[%s604_s23 + $0xc8] sm:$0xff]  ;;  %v355_v11 = vld [vmem:[%s610_s26 + $0xb0] sm:$0xff] }
  0x21   : > { %438 = vst [vmem:[%s646_s5 + $0x48] sm:$0xff] %v406_v22  ;;  %v409_v35 = vmax.f32 %v377_v24, 0.0  ;;  %v279_v37 = vmul.f32 %v598_v0, %v240_v20  ;;  %439 = vst [vmem:[%s646_s5 + $0x50] sm:$0xff] %v407_v28  ;;  %v379_v40 = vadd.f32 %v347_v25, %v315_v30  ;;  %v280_v44 = vmul.f32 %v598_v0, %v241_v27  ;;  %v356_v12 = vld [vmem:[%s610_s26 + $0xb8] sm:$0xff]  ;;  %v249_v13 = vld [vmem:[%s604_s23 + $0xd0] sm:$0xff] }
  0x22   : > { %v410_v39 = vmax.f32 %v378_v29, 0.0  ;;  %v380_v41 = vadd.f32 %v348_v26, %v316_v31  ;;  %440 = vst [vmem:[%s646_s5 + $0x58] sm:$0xff] %v408_v34  ;;  %v317_v45 = vadd.f32 %v616_v2, %v278_v36  ;;  %v281_v48 = vmul.f32 %v598_v0, %v242_v32  ;;  %v250_v18 = vld [vmem:[%s604_s23 + $0xd8] sm:$0xff]  ;;  %v251_v19 = vld [vmem:[%s604_s23 + $0xe0] sm:$0xff]  ;;  %v252_v24 = vld [vmem:[%s604_s23 + $0xe8] sm:$0xff] }
  0x23   : > { %441 = vst [vmem:[%s646_s5 + $0x60] sm:$0xff] %v409_v35  ;;  %v318_v46 = vadd.f32 %v616_v2, %v279_v37  ;;  %v282_v49 = vmul.f32 %v598_v0, %v243_v33  ;;  %v411_v52 = vmax.f32 %v379_v40, 0.0  ;;  %v319_v54 = vadd.f32 %v616_v2, %v280_v44  ;;  %v357_v28 = vld [vmem:[%s610_s26 + $0xc0] sm:$0xff]  ;;  %v358_v29 = vld [vmem:[%s610_s26 + $0xc8] sm:$0xff]  ;;  %v359_v33 = vld [vmem:[%s610_s26 + $0xd0] sm:$0xff] }
  0x24   : > { %442 = vst [vmem:[%s646_s5 + $0x68] sm:$0xff] %v410_v39  ;;  %v412_v53 = vmax.f32 %v380_v41, 0.0  ;;  %v283_v57 = vmul.f32 %v598_v0, %v244_v38  ;;  %v381_v58 = vadd.f32 %v349_v42, %v317_v45  ;;  %v320_v60 = vadd.f32 %v616_v2, %v281_v48  ;;  %v253_v36 = vld [vmem:[%s604_s23 + $0xf0] sm:$0xff]  ;;  %v254_v37 = vld [vmem:[%s604_s23 + $0xf8] sm:$0xff]  ;;  %v361_v42 = vld [vmem:[%s610_s26 + $0xe0] sm:$0xff] }
  0x25   : > { %v382_v59 = vadd.f32 %v350_v43, %v318_v46  ;;  %v321_v61 = vadd.f32 %v616_v2, %v282_v49  ;;  %443 = vst [vmem:[%s646_s5 + $0x70] sm:$0xff] %v411_v52  ;;  %v383_v63 = vadd.f32 %v351_v47, %v319_v54  ;;  %v284_v3 = vmul.f32 %v598_v0, %v245_v50  ;;  %v360_v41 = vld [vmem:[%s610_s26 + $0xd8] sm:$0xff]  ;;  %v362_v48 = vld [vmem:[%s610_s26 + $0xe8] sm:$0xff] }
  0x26   : > { %444 = vst [vmem:[%s646_s5 + $0x78] sm:$0xff] %v412_v53  ;;  %v322_v1 = vadd.f32 %v616_v2, %v283_v57  ;;  %v285_v4 = vmul.f32 %v598_v0, %v246_v51  ;;  %v413_v7 = vmax.f32 %v381_v58, 0.0  ;;  %v384_v9 = vadd.f32 %v352_v55, %v320_v60  ;;  %v363_v57 = vld [vmem:[%s610_s26 + $0xf0] sm:$0xff]  ;;  %v364_v58 = vld [vmem:[%s610_s26 + $0xf8] sm:$0xff] }
  0x27   : > { %v414_v8 = vmax.f32 %v382_v59, 0.0  ;;  %v385_v10 = vadd.f32 %v353_v56, %v321_v61  ;;  %v415_v14 = vmax.f32 %v383_v63, 0.0  ;;  %v323_v16 = vadd.f32 %v616_v2, %v284_v3 }
  0x28   : > { %v386_v15 = vadd.f32 %v354_v62, %v322_v1  ;;  %v324_v17 = vadd.f32 %v616_v2, %v285_v4  ;;  %445 = vst [vmem:[%s646_s5 + $0x80] sm:$0xff] %v413_v7  ;;  %v416_v20 = vmax.f32 %v384_v9, 0.0  ;;  %v286_v22 = vmul.f32 %v598_v0, %v247_v5 }
  0x29   : > { %446 = vst [vmem:[%s646_s5 + $0x88] sm:$0xff] %v414_v8  ;;  %v417_v21 = vmax.f32 %v385_v10, 0.0  ;;  %v287_v23 = vmul.f32 %v598_v0, %v248_v6  ;;  %447 = vst [vmem:[%s646_s5 + $0x90] sm:$0xff] %v415_v14  ;;  %v387_v26 = vadd.f32 %v355_v11, %v323_v16  ;;  %v288_v30 = vmul.f32 %v598_v0, %v249_v13 }
  0x2a   : > { %v418_v25 = vmax.f32 %v386_v15, 0.0  ;;  %v388_v27 = vadd.f32 %v356_v12, %v324_v17  ;;  %448 = vst [vmem:[%s646_s5 + $0x98] sm:$0xff] %v416_v20  ;;  %v325_v31 = vadd.f32 %v616_v2, %v286_v22  ;;  %v289_v34 = vmul.f32 %v598_v0, %v250_v18 }
  0x2b   : > { %449 = vst [vmem:[%s646_s5 + $0xa0] sm:$0xff] %v417_v21  ;;  %v326_v32 = vadd.f32 %v616_v2, %v287_v23  ;;  %v290_v35 = vmul.f32 %v598_v0, %v251_v19  ;;  %v419_v38 = vmax.f32 %v387_v26, 0.0  ;;  %v327_v40 = vadd.f32 %v616_v2, %v288_v30 }
  0x2c   : > { %450 = vst [vmem:[%s646_s5 + $0xa8] sm:$0xff] %v418_v25  ;;  %v420_v39 = vmax.f32 %v388_v27, 0.0  ;;  %v291_v43 = vmul.f32 %v598_v0, %v252_v24  ;;  %v389_v44 = vadd.f32 %v357_v28, %v325_v31  ;;  %v328_v46 = vadd.f32 %v616_v2, %v289_v34 }
  0x2d   : > { %v390_v45 = vadd.f32 %v358_v29, %v326_v32  ;;  %v329_v47 = vadd.f32 %v616_v2, %v290_v35  ;;  %451 = vst [vmem:[%s646_s5 + $0xb0] sm:$0xff] %v419_v38  ;;  %v391_v49 = vadd.f32 %v359_v33, %v327_v40  ;;  %v292_v51 = vmul.f32 %v598_v0, %v253_v36 }
  0x2e   : > { %452 = vst [vmem:[%s646_s5 + $0xb8] sm:$0xff] %v420_v39  ;;  %v330_v50 = vadd.f32 %v616_v2, %v291_v43  ;;  %v293_v52 = vmul.f32 %v598_v0, %v254_v37  ;;  %v421_v53 = vmax.f32 %v389_v44, 0.0  ;;  %v392_v55 = vadd.f32 %v360_v41, %v328_v46 }
  0x2f   : > { %v422_v54 = vmax.f32 %v390_v45, 0.0  ;;  %v393_v56 = vadd.f32 %v361_v42, %v329_v47  ;;  %v423_v59 = vmax.f32 %v391_v49, 0.0  ;;  %v331_v61 = vadd.f32 %v616_v2, %v292_v51 }
  0x30   : > { %v394_v60 = vadd.f32 %v362_v48, %v330_v50  ;;  %v332_v62 = vadd.f32 %v616_v2, %v293_v52  ;;  %453 = vst [vmem:[%s646_s5 + $0xc0] sm:$0xff] %v421_v53  ;;  %v424_v0 = vmax.f32 %v392_v55, 0.0 }
  0x31   : > { %454 = vst [vmem:[%s646_s5 + $0xc8] sm:$0xff] %v422_v54  ;;  %v425_v63 = vmax.f32 %v393_v56, 0.0  ;;  %455 = vst [vmem:[%s646_s5 + $0xd0] sm:$0xff] %v423_v59  ;;  %v395_v3 = vadd.f32 %v363_v57, %v331_v61 }
  0x32   : > { %v426_v1 = vmax.f32 %v394_v60, 0.0  ;;  %v396_v4 = vadd.f32 %v364_v58, %v332_v62  ;;  %456 = vst [vmem:[%s646_s5 + $0xd8] sm:$0xff] %v424_v0 }
  0x33   : > { %457 = vst [vmem:[%s646_s5 + $0xe0] sm:$0xff] %v425_v63  ;;  %v427_v5 = vmax.f32 %v395_v3, 0.0 }
  0x34   : > { %458 = vst [vmem:[%s646_s5 + $0xe8] sm:$0xff] %v426_v1  ;;  %v428_v6 = vmax.f32 %v396_v4, 0.0 }
  0x35   : > { %459 = vst [vmem:[%s646_s5 + $0xf0] sm:$0xff] %v427_v5 }
  0x36   : > { %460 = vst [vmem:[%s646_s5 + $0xf8] sm:$0xff] %v428_v6 }
  0x37 PF: > { %s14_s15 = sadd.s32 1, %s558_s15  }
  0x38   : > { %p11_p4 = scmp.ge.s32.totalorder %s14_s15, 4  }
  0x3a   :  { %13 = sbr.rel (!%p11_p4) target bundleno = 1 (0x1), region = 69 }

// kernel: bottleneck_forward.5
= control target key start
LH: loop header
LB: loop body
LE: loop exit
PB: predicated region body
PF: predicated region fallthrough
CT: control target
= control target key end

     0   :  { %s3424_s18 = smov 0   ;;  %s5090_s0 = inlined_call_operand.vmem [shape: f32[2,16,16,128], index: 0, kind: input, shape index: {}]   ;;  %s5091_s1 = inlined_call_operand.vmem [shape: f32[1,128], index: 1, kind: input, shape index: {}]   ;;  %s5092_s2 = inlined_call_operand.vmem [shape: f32[1,128], index: 2, kind: input, shape index: {}]   ;;  %s5093_s3 = inlined_call_operand.vmem [shape: f32[1152,128], index: 3, kind: input, shape index: {}]   ;;  %s5094_s4 = inlined_call_operand.vmem [shape: f32[2,16,16,128], index: 4, kind: output, shape index: {0}]   ;;  %s5095_s5 = inlined_call_operand.vmem [shape: f32[2,2,128], index: 5, kind: output, shape index: {1}]  }
   0x1 LB: > { %s2815_s19 = sadd.s32 4294967295, %s3390_s18   ;;  %p2819_p0 = scmp.ge.s32.totalorder %s3390_s18, 1  ;;  %s3390_s18 = sphi %s3424_s18, %s16_s18  }
   0x2   : > { %p190_p1 = scmp.lt.s32.totalorder %s3390_s18, 3 }
   0x4   : > { %p191_p2 = pnand %p2819_p0, %p190_p1 }
   0x6   : > { %194 = sbr.rel (%p191_p2) target bundleno = 646 (0x286), region = 36 }
   0xd   : > { %v1319_v0 = vld [vmem:[%s5093_s3] sm:$0xff]  ;;  %v1320_v1 = vld [vmem:[%s5093_s3 + $0x8] sm:$0xff]  ;;  %v5107_v3 = vmov 0.0|0.0   ;;  %v1321_v6 = vld [vmem:[%s5093_s3 + $0x10] sm:$0xff]  ;;  %v3393_v8 = vmov 0.0   ;;  %p222_p3 = scmp.lt.s32.totalorder %s2815_s19, 1 }
   0xe   : > { %v1351_v2 = vld [vmem:[%s5093_s3 + $0x100] sm:$0xff]  ;;  %2959 = vmatprep.subr.bf16.mxu1 %v5107_v3  ;;  %3007 = vmatprep.subr.bf16.mxu0 %v5107_v3  ;;  %v2960_v4 = vpack.c.bf16 %v1320_v1, %v1319_v0  ;;  %v1352_v5 = vld [vmem:[%s5093_s3 + $0x108] sm:$0xff]  ;;  %v1322_v7 = vld [vmem:[%s5093_s3 + $0x18] sm:$0xff]  ;;  %378 = vst [vmem:[#allocation2] sm:$0xff] %v3393_v8  ;;  %vm2726_vm0 = vcmask 1040384  }
   0xf   : > { %379 = vst [vmem:[#allocation2 + $0x8] sm:$0xff] %v3393_v8  ;;  %380 = vst [vmem:[#allocation2 + $0x10] sm:$0x3] %v3393_v8  ;;  %v3008_v9 = vpack.c.bf16 %v1352_v5, %v1351_v2  ;;  %v1353_v10 = vld [vmem:[%s5093_s3 + $0x110] sm:$0xff]  ;;  %v1354_v11 = vld [vmem:[%s5093_s3 + $0x118] sm:$0xff]  ;;  %v2963_v12 = vpack.c.bf16 %v1322_v7, %v1321_v6  ;;  %s5193_s19 = smov (!%p222_p3, %s2815_s19), 1 }
  0x10   : > { %382 = vst [vmem:[#allocation2 + $0x198] sm:$0xff] %v3393_v8  ;;  %383 = vst [vmem:[#allocation2 + $0x1a0] sm:$0xff] %v3393_v8  ;;  %2961 = vmatpush1.bf16.msra.mxu1 %v2960_v4  ;;  %v3011_v13 = vpack.c.bf16 %v1354_v11, %v1353_v10  ;;  %v1323_v14 = vld [vmem:[%s5093_s3 + $0x20] sm:$0xff]  ;;  %v1324_v15 = vld [vmem:[%s5093_s3 + $0x28] sm:$0xff]  ;;  %s2829_s12 = sshll.u32 %s5193_s19, 8 }
  0x11   : > { %384 = vst [vmem:[#allocation2 + $0x1a8] sm:$0x3] %v3393_v8  ;;  %386 = vst [vmem:[#allocation2 + $0x18] sm:$0x1] %v3393_v8  ;;  %3009 = vmatpush1.bf16.msra.mxu0 %v3008_v9  ;;  %2962 = vmatprep.subr.bf16.mxu1 %v5107_v3  ;;  %v1355_v16 = vld [vmem:[%s5093_s3 + $0x120] sm:$0xff]  ;;  %v1356_v17 = vld [vmem:[%s5093_s3 + $0x128] sm:$0xff]  ;;  %v2966_v18 = vpack.c.bf16 %v1324_v15, %v1323_v14  ;;  %s3568_s25 = scalar_lea.vmem %s5090_s0, %s2829_s12  ;;  %s4848_s9 = scalar_lea.vmem %s5094_s4, %s2829_s12 }
  0x12   : > { %387 = vst [vmem:[#allocation2 + $0x30] sm:$0x1] %v3393_v8  ;;  %388 = vst [vmem:[#allocation2 + $0x48] sm:$0x1] %v3393_v8  ;;  %3010 = vmatprep.subr.bf16.mxu0 %v5107_v3  ;;  %v3014_v19 = vpack.c.bf16 %v1356_v17, %v1355_v16  ;;  %v1325_v20 = vld [vmem:[%s5093_s3 + $0x30] sm:$0xff]  ;;  %v1326_v21 = vld [vmem:[%s5093_s3 + $0x38] sm:$0xff] }
  0x13   : > { %389 = vst [vmem:[#allocation2 + $0x60] sm:$0x1] %v3393_v8  ;;  %390 = vst [vmem:[#allocation2 + $0x78] sm:$0x1] %v3393_v8  ;;  %v1357_v22 = vld [vmem:[%s5093_s3 + $0x130] sm:$0xff]  ;;  %v1358_v23 = vld [vmem:[%s5093_s3 + $0x138] sm:$0xff]  ;;  %v2969_v24 = vpack.c.bf16 %v1326_v21, %v1325_v20 }
  0x14   : > { %391 = vst [vmem:[#allocation2 + $0x90] sm:$0x1] %v3393_v8  ;;  %392 = vst [vmem:[#allocation2 + $0xa8] sm:$0x1] %v3393_v8  ;;  %2964 = vmatpush1.bf16.msra.mxu1 %v2963_v12  ;;  %v3017_v25 = vpack.c.bf16 %v1358_v23, %v1357_v22  ;;  %v1327_v26 = vld [vmem:[%s5093_s3 + $0x40] sm:$0xff]  ;;  %v1328_v27 = vld [vmem:[%s5093_s3 + $0x48] sm:$0xff] }
  0x15   : > { %393 = vst [vmem:[#allocation2 + $0xc0] sm:$0x1] %v3393_v8  ;;  %394 = vst [vmem:[#allocation2 + $0xd8] sm:$0x1] %v3393_v8  ;;  %3012 = vmatpush1.bf16.msra.mxu0 %v3011_v13  ;;  %2965 = vmatprep.subr.bf16.mxu1 %v5107_v3  ;;  %v1359_v28 = vld [vmem:[%s5093_s3 + $0x140] sm:$0xff]  ;;  %v1360_v29 = vld [vmem:[%s5093_s3 + $0x148] sm:$0xff]  ;;  %v2972_v30 = vpack.c.bf16 %v1328_v27, %v1327_v26 }
  0x16   : > { %395 = vst [vmem:[#allocation2 + $0xf0] sm:$0x1] %v3393_v8  ;;  %396 = vst [vmem:[#allocation2 + $0x108] sm:$0x1] %v3393_v8  ;;  %3013 = vmatprep.subr.bf16.mxu0 %v5107_v3  ;;  %v3020_v31 = vpack.c.bf16 %v1360_v29, %v1359_v28  ;;  %v1329_v32 = vld [vmem:[%s5093_s3 + $0x50] sm:$0xff]  ;;  %v1330_v33 = vld [vmem:[%s5093_s3 + $0x58] sm:$0xff] }
  0x17   : > { %397 = vst [vmem:[#allocation2 + $0x120] sm:$0x1] %v3393_v8  ;;  %398 = vst [vmem:[#allocation2 + $0x138] sm:$0x1] %v3393_v8  ;;  %v1361_v34 = vld [vmem:[%s5093_s3 + $0x150] sm:$0xff]  ;;  %v1362_v35 = vld [vmem:[%s5093_s3 + $0x158] sm:$0xff]  ;;  %v2975_v36 = vpack.c.bf16 %v1330_v33, %v1329_v32 }
  0x18   : > { %399 = vst [vmem:[#allocation2 + $0x150] sm:$0x1] %v3393_v8  ;;  %400 = vst [vmem:[#allocation2 + $0x168] sm:$0x1] %v3393_v8  ;;  %2967 = vmatpush1.bf16.msra.mxu1 %v2966_v18  ;;  %v3023_v37 = vpack.c.bf16 %v1362_v35, %v1361_v34  ;;  %v1331_v38 = vld [vmem:[%s5093_s3 + $0x60] sm:$0xff]  ;;  %v1332_v39 = vld [vmem:[%s5093_s3 + $0x68] sm:$0xff] }
  0x19   : > { %401 = vst [vmem:[#allocation2 + $0x180] sm:$0x1] %v3393_v8  ;;  %404 = vst [vmem:[#allocation2 + $0x29] sm:$0x1] %v3393_v8  ;;  %3015 = vmatpush1.bf16.msra.mxu0 %v3014_v19  ;;  %2968 = vmatprep.subr.bf16.mxu1 %v5107_v3  ;;  %v1363_v40 = vld [vmem:[%s5093_s3 + $0x160] sm:$0xff]  ;;  %v1364_v41 = vld [vmem:[%s5093_s3 + $0x168] sm:$0xff]  ;;  %v2978_v46 = vpack.c.bf16 %v1332_v39, %v1331_v38 }
  0x1a   : > { %405 = vst [vmem:[#allocation2 + $0x41] sm:$0x1] %v3393_v8  ;;  %406 = vst [vmem:[#allocation2 + $0x59] sm:$0x1] %v3393_v8  ;;  %3016 = vmatprep.subr.bf16.mxu0 %v5107_v3  ;;  %v518_v42 = vld [vmem:[#allocation2 + $0x1] sm:$0xff]  ;;  %v1333_v47 = vld [vmem:[%s5093_s3 + $0x70] sm:$0xff]  ;;  %v3026_v50 = vpack.c.bf16 %v1364_v41, %v1363_v40 }
  0x1b   : > { %407 = vst [vmem:[#allocation2 + $0x71] sm:$0x1] %v3393_v8  ;;  %408 = vst [vmem:[#allocation2 + $0x89] sm:$0x1] %v3393_v8  ;;  %v236_v43 = vld [vmem:[%s3568_s25] sm:$0xff]  ;;  %1527 = vmatprep.mubr.f32.mxu1 %v518_v42  ;;  %v1334_v48 = vld [vmem:[%s5093_s3 + $0x78] sm:$0xff] }
  0x1c   : > { %409 = vst [vmem:[#allocation2 + $0xa1] sm:$0x1] %v3393_v8  ;;  %410 = vst [vmem:[#allocation2 + $0xb9] sm:$0x1] %v3393_v8  ;;  %2970 = vmatpush1.bf16.msra.mxu1 %v2969_v24  ;;  %v3588_v44 = vld [vmem:[%s5091_s1] ss:$0 sm:$0xff]  ;;  %v2981_v57 = vpack.c.bf16 %v1334_v48, %v1333_v47 }
  0x1d   : > { %411 = vst [vmem:[#allocation2 + $0xd1] sm:$0x1] %v3393_v8  ;;  %412 = vst [vmem:[#allocation2 + $0xe9] sm:$0x1] %v3393_v8  ;;  %3018 = vmatpush1.bf16.msra.mxu0 %v3017_v25  ;;  %2971 = vmatprep.subr.bf16.mxu1 %v5107_v3  ;;  %v3593_v45 = vld [vmem:[%s5092_s2] ss:$0 sm:$0xff]  ;;  %v275_v49 = vmul.f32 %v3588_v44, %v236_v43 }
  0x1e   : > { %413 = vst [vmem:[#allocation2 + $0x101] sm:$0x1] %v3393_v8  ;;  %414 = vst [vmem:[#allocation2 + $0x119] sm:$0x1] %v3393_v8  ;;  %3019 = vmatprep.subr.bf16.mxu0 %v5107_v3  ;;  %v237_v51 = vld [vmem:[%s3568_s25 + $0x8] sm:$0xff]  ;;  %v1365_v52 = vld [vmem:[%s5093_s3 + $0x170] sm:$0xff] }
  0x1f   : > { %415 = vst [vmem:[#allocation2 + $0x131] sm:$0x1] %v3393_v8  ;;  %416 = vst [vmem:[#allocation2 + $0x149] sm:$0x1] %v3393_v8  ;;  %v1366_v53 = vld [vmem:[%s5093_s3 + $0x178] sm:$0xff]  ;;  %v3612_v54 = vadd.f32 %v3593_v45, %v275_v49  ;;  %v276_v55 = vmul.f32 %v3588_v44, %v237_v51  ;;  %v238_v56 = vld [vmem:[%s3568_s25 + $0x10] sm:$0xff] }
  0x20   : > { %417 = vst [vmem:[#allocation2 + $0x161] sm:$0x1] %v3393_v8  ;;  %418 = vst [vmem:[#allocation2 + $0x179] sm:$0x1] %v3393_v8  ;;  %2973 = vmatpush1.bf16.msra.mxu1 %v2972_v30  ;;  %v3619_v58 = vld [vmem:[%s5093_s3 + $0x80] sm:$0xff]  ;;  %v277_v59 = vmul.f32 %v3588_v44, %v238_v56  ;;  %v239_v60 = vld [vmem:[%s3568_s25 + $0x18] sm:$0xff]  ;;  %v3029_v6 = vpack.c.bf16 %v1366_v53, %v1365_v52 }
  0x21   : > { %419 = vst [vmem:[#allocation2 + $0x191] sm:$0x1] %v3393_v8  ;;  %385 = vst [vmem:[#allocation2] sm:$0x1] %v3393_v8  ;;  %3021 = vmatpush1.bf16.msra.mxu0 %v3020_v31  ;;  %2974 = vmatprep.subr.bf16.mxu1 %v5107_v3  ;;  %v240_v61 = vld [vmem:[%s3568_s25 + $0x20] sm:$0xff]  ;;  %v1336_v62 = vld [vmem:[%s5093_s3 + $0x88] sm:$0xff]  ;;  %v3629_v0 = vadd.f32 %v3593_v45, %v276_v55  ;;  %v278_v1 = vmul.f32 %v3588_v44, %v239_v60 }
  0x22   : > { %402 = vst [vmem:[#allocation2 + $0x198] sm:$0x1] %v3393_v8  ;;  %403 = vst [vmem:[#allocation2 + $0x11] sm:$0x1] %v3393_v8  ;;  %3022 = vmatprep.subr.bf16.mxu0 %v5107_v3  ;;  %v346_v63 = vmax.f32 %v3612_v54, 0.0  ;;  %v279_v2 = vmul.f32 %v3588_v44, %v240_v61  ;;  %v241_v4 = vld [vmem:[%s3568_s25 + $0x28] sm:$0xff]  ;;  %v3637_v7 = vadd.f32 %v3593_v45, %v277_v59 }
  0x23   : > { %420 = vst [vmem:[#allocation2 + $0x1a9] sm:$0x1] %v3393_v8  ;;  %v242_v5 = vld [vmem:[%s3568_s25 + $0x30] sm:$0xff]  ;;  %v280_v9 = vmul.f32 %v3588_v44, %v241_v4  ;;  %v243_v10 = vld [vmem:[%s3568_s25 + $0x38] sm:$0xff]  ;;  %v1367_v11 = vld [vmem:[%s5093_s3 + $0x180] sm:$0xff]  ;;  %v347_v13 = vmax.f32 %v3629_v0, 0.0  ;;  %v3652_v14 = vadd.f32 %v3593_v45, %v278_v1  ;;  %v2984_v18 = vpack.c.bf16 %v1336_v62, %v3619_v58 }
  0x24   : > { %2976 = vmatpush1.bf16.msra.mxu1 %v2975_v36  ;;  %v1368_v12 = vld [vmem:[%s5093_s3 + $0x188] sm:$0xff]  ;;  %422 = vst [vmem:[#allocation2 + $0x19] sm:$0xff] %v346_v63  ;;  %v3655_v15 = vadd.f32 %v3593_v45, %v279_v2  ;;  %v281_v16 = vmul.f32 %v3588_v44, %v242_v5  ;;  %v244_v17 = vld [vmem:[%s3568_s25 + $0x40] sm:$0xff]  ;;  %v348_v19 = vmax.f32 %v3637_v7, 0.0  ;;  %v282_v21 = vmul.f32 %v3588_v44, %v243_v10  ;;  %v246_v23 = vld [vmem:[%s3568_s25 + $0x50] sm:$0xff]  ;;  %s2824_s12 = sshll.u32 %s5193_s19, 1 }
  0x25   : > { %3024 = vmatpush1.bf16.msra.mxu0 %v3023_v37  ;;  %2977 = vmatprep.subr.bf16.mxu1 %v5107_v3  ;;  %v3662_v20 = vadd.f32 %v3593_v45, %v280_v9  ;;  %v245_v22 = vld [vmem:[%s3568_s25 + $0x48] sm:$0xff]  ;;  %v1337_v24 = vld [vmem:[%s5093_s3 + $0x90] sm:$0xff]  ;;  %423 = vst [vmem:[#allocation2 + $0x21] sm:$0xff] %v347_v13  ;;  %v349_v25 = vmax.f32 %v3652_v14, 0.0  ;;  %v283_v28 = vmul.f32 %v3588_v44, %v244_v17  ;;  %v247_v29 = vld [vmem:[%s3568_s25 + $0x58] sm:$0xff]  ;;  %s235_s13 = scalar_lea.vmem %s5095_s5, %s2824_s12 }
  0x26   : > { %3025 = vmatprep.subr.bf16.mxu0 %v5107_v3  ;;  %v350_v26 = vmax.f32 %v3655_v15, 0.0  ;;  %v3675_v27 = vadd.f32 %v3593_v45, %v281_v16  ;;  %v248_v30 = vld [vmem:[%s3568_s25 + $0x60] sm:$0xff]  ;;  %v3032_v31 = vpack.c.bf16 %v1368_v12, %v1367_v11  ;;  %v1338_v32 = vld [vmem:[%s5093_s3 + $0x98] sm:$0xff]  ;;  %v1369_v33 = vld [vmem:[%s5093_s3 + $0x190] sm:$0xff]  ;;  %424 = vst [vmem:[#allocation2 + $0x31] sm:$0xff] %v348_v19  ;;  %v3694_v36 = vadd.f32 %v3593_v45, %v282_v21 }
  0x27   : > { %v1370_v34 = vld [vmem:[%s5093_s3 + $0x198] sm:$0xff]  ;;  %v351_v35 = vmax.f32 %v3662_v20, 0.0  ;;  %v284_v37 = vmul.f32 %v3588_v44, %v245_v22  ;;  %425 = vst [vmem:[#allocation2 + $0x39] sm:$0xff] %v349_v25  ;;  %v3704_v39 = vadd.f32 %v3593_v45, %v283_v28  ;;  %v285_v40 = vmul.f32 %v3588_v44, %v246_v23  ;;  %v249_v41 = vld [vmem:[%s3568_s25 + $0x68] sm:$0xff]  ;;  %v3711_v42 = vld [vmem:[%s5093_s3 + $0xa0] sm:$0xff] }
  0x28   : > { %2979 = vmatpush1.bf16.msra.mxu1 %v2978_v46  ;;  %426 = vst [vmem:[#allocation2 + $0x49] sm:$0xff] %v350_v26  ;;  %v352_v38 = vmax.f32 %v3675_v27, 0.0  ;;  %v353_v43 = vmax.f32 %v3694_v36, 0.0  ;;  %v286_v47 = vmul.f32 %v3588_v44, %v247_v29  ;;  %v287_v48 = vmul.f32 %v3588_v44, %v248_v30  ;;  %v250_v49 = vld [vmem:[%s3568_s25 + $0x70] sm:$0xff]  ;;  %v1340_v52 = vld [vmem:[%s5093_s3 + $0xa8] sm:$0xff]  ;;  %v1371_v53 = vld [vmem:[%s5093_s3 + $0x1a0] sm:$0xff] }
  0x29   : > { %3027 = vmatpush1.bf16.msra.mxu0 %v3026_v50  ;;  %2980 = vmatprep.subr.bf16.mxu1 %v5107_v3  ;;  %427 = vst [vmem:[#allocation2 + $0x51] sm:$0xff] %v351_v35  ;;  %v3717_v46 = vadd.f32 %v3593_v45, %v284_v37  ;;  %v2987_v50 = vpack.c.bf16 %v1338_v32, %v1337_v24  ;;  %v354_v55 = vmax.f32 %v3704_v39, 0.0  ;;  %v1372_v58 = vld [vmem:[%s5093_s3 + $0x1a8] sm:$0xff]  ;;  %v252_v2 = vld [vmem:[%s3568_s25 + $0x80] sm:$0xff]  ;;  %v254_v22 = vld [vmem:[%s3568_s25 + $0x90] sm:$0xff] }
  0x2a   : > { %3028 = vmatprep.subr.bf16.mxu0 %v5107_v3  ;;  %v3035_v51 = vpack.c.bf16 %v1370_v34, %v1369_v33  ;;  %428 = vst [vmem:[#allocation2 + $0x61] sm:$0xff] %v352_v38  ;;  %v324_v56 = vadd.f32 %v3593_v45, %v285_v40  ;;  %429 = vst [vmem:[#allocation2 + $0x69] sm:$0xff] %v353_v43  ;;  %v325_v61 = vadd.f32 %v3593_v45, %v286_v47  ;;  %v1341_v23 = vld [vmem:[%s5093_s3 + $0xb0] sm:$0xff]  ;;  %v1342_v24 = vld [vmem:[%s5093_s3 + $0xb8] sm:$0xff] }
  0x2b   : > { %v3737_v59 = vld [vmem:[#allocation2 + $0x18] sm:$0xff]  ;;  %v355_v60 = vmax.f32 %v3717_v46, 0.0  ;;  %v3744_v62 = vadd.f32 %v3593_v45, %v287_v48  ;;  %v288_v1 = vmul.f32 %v3588_v44, %v249_v41  ;;  %430 = vst [vmem:[#allocation2 + $0x79] sm:$0xff] %v354_v55  ;;  %v289_v5 = vmul.f32 %v3588_v44, %v250_v49  ;;  %v1373_v32 = vld [vmem:[%s5093_s3 + $0x1b0] sm:$0xff]  ;;  %v1427_v14 = vld [vmem:[%s5093_s3 + $0x360] sm:$0xff] }
  0x2c   : > { %2982 = vmatpush1.bf16.msra.mxu1 %v2981_v57  ;;  %v251_v57 = vld [vmem:[%s3568_s25 + $0x78] sm:$0xff]  ;;  %1752 = vmatprep.mubr.f32.mxu0 %v3737_v59  ;;  %v3752_v4 = vmax.f32 %v324_v56, 0.0  ;;  %v3758_v9 = vmax.f32 %v325_v61, 0.0  ;;  %v2990_v16 = vpack.c.bf16 %v1340_v52, %v3711_v42  ;;  %v3038_v17 = vpack.c.bf16 %v1372_v58, %v1371_v53  ;;  %v1375_v56 = vld [vmem:[%s5093_s3 + $0x1c0] sm:$0xff]  ;;  %v1425_v7 = vld [vmem:[%s5093_s3 + $0x350] sm:$0xff] }
  0x2d   : > { %3030 = vmatpush1.bf16.msra.mxu0 %v3029_v6  ;;  %2983 = vmatprep.subr.bf16.mxu1 %v5107_v3  ;;  %v253_v6 = vld [vmem:[%s3568_s25 + $0x88] sm:$0xff]  ;;  %431 = vst [vmem:[#allocation2 + $0x81] sm:$0xff] %v355_v60  ;;  %v358_v10 = vmax.f32 %v3744_v62, 0.0  ;;  %v3762_v11 = vadd.f32 %v3593_v45, %v288_v1  ;;  %v290_v12 = vmul.f32 %v3588_v44, %v251_v57  ;;  %v1374_v33 = vld [vmem:[%s5093_s3 + $0x1b8] sm:$0xff]  ;;  %v256_v61 = vld [vmem:[%s3568_s25 + $0xa0] sm:$0xff] }
  0x2e   : > { %3031 = vmatprep.subr.bf16.mxu0 %v5107_v3  ;;  %432 = vst [vmem:[#allocation2 + $0x91] sm:$0xff] %v3752_v4  ;;  %v291_v21 = vmul.f32 %v3588_v44, %v252_v2  ;;  %433 = vst [vmem:[#allocation2 + $0x99] sm:$0xff] %v3758_v9  ;;  %v292_v30 = vmul.f32 %v3588_v44, %v253_v6  ;;  %v2993_v47 = vpack.c.bf16 %v1342_v24, %v1341_v23  ;;  %v1376_v57 = vld [vmem:[%s5093_s3 + $0x1c8] sm:$0xff]  ;;  %v255_v58 = vld [vmem:[%s3568_s25 + $0x98] sm:$0xff] }
  0x2f   : > { %434 = vst [vmem:[#allocation2 + $0xa9] sm:$0xff] %v358_v10  ;;  %v359_v28 = vmax.f32 %v3762_v11, 0.0  ;;  %v3784_v29 = vadd.f32 %v3593_v45, %v290_v12  ;;  %v3041_v49 = vpack.c.bf16 %v1374_v33, %v1373_v32  ;;  %v294_v2 = vmul.f32 %v3588_v44, %v255_v58  ;;  %v1345_v12 = vld [vmem:[%s5093_s3 + $0xd0] sm:$0xff]  ;;  %v1347_v33 = vld [vmem:[%s5093_s3 + $0xe0] sm:$0xff]  ;;  %v1390_v54 = vld [vmem:[%s5093_s3 + $0x238] sm:$0xff] }
  0x30   : > { %2985 = vmatpush1.bf16.msra.mxu1 %v2984_v18  ;;  %v3768_v18 = vadd.f32 %v3593_v45, %v289_v5  ;;  %v3797_v37 = vadd.f32 %v3593_v45, %v291_v21  ;;  %v3803_v41 = vadd.f32 %v3593_v45, %v292_v30  ;;  %v295_v5 = vmul.f32 %v3588_v44, %v256_v61  ;;  %v1378_v21 = vld [vmem:[%s5093_s3 + $0x1d8] sm:$0xff] }
  0x31   : > { %3033 = vmatpush1.bf16.msra.mxu0 %v3032_v31  ;;  %2986 = vmatprep.subr.bf16.mxu1 %v5107_v3  ;;  %v293_v31 = vmul.f32 %v3588_v44, %v254_v22  ;;  %435 = vst [vmem:[#allocation2 + $0xb1] sm:$0xff] %v359_v28  ;;  %v5103_v40 = vmax.f32 %v3784_v29, 0.0  ;;  %v3044_v6 = vpack.c.bf16 %v1376_v57, %v1375_v56  ;;  %v258_v57 = vld [vmem:[%s3568_s25 + $0xb0] sm:$0xff]  ;;  %v1414_v62 = vld [vmem:[%s5093_s3 + $0x2f8] sm:$0xff] }
  0x32   : > { %3034 = vmatprep.subr.bf16.mxu0 %v5107_v3  ;;  %v5104_v34 = vmax.f32 %v3768_v18, 0.0  ;;  %v5102_v48 = vmax.f32 %v3797_v37, 0.0  ;;  %v5101_v52 = vmax.f32 %v3803_v41, 0.0  ;;  %v3854_v22 = vadd.f32 %v3593_v45, %v294_v2 }
  0x33   : > { %v3806_v42 = vadd.f32 %v3593_v45, %v293_v31  ;;  %437 = vst [vmem:[#allocation2 + $0xc9] sm:$0xff] %v5103_v40  ;;  %v3857_v23 = vadd.f32 %v3593_v45, %v295_v5  ;;  %v1349_v5 = vld [vmem:[%s5093_s3 + $0xf0] sm:$0xff] }
  0x34   : > { %2988 = vmatpush1.bf16.msra.mxu1 %v2987_v50  ;;  %436 = vst [vmem:[#allocation2 + $0xc1] sm:$0xff] %v5104_v34  ;;  %v1343_v50 = vld [vmem:[%s5093_s3 + $0xc0] sm:$0xff]  ;;  %438 = vst [vmem:[#allocation2 + $0xd9] sm:$0xff] %v5102_v48  ;;  %v5099_v30 = vmax.f32 %v3854_v22, 0.0  ;;  %v649_v34 = vld [vmem:[#allocation2 + $0x38] sm:$0xff] }
  0x35   : > { %3036 = vmatpush1.bf16.msra.mxu0 %v3035_v51  ;;  %2989 = vmatprep.subr.bf16.mxu1 %v5107_v3  ;;  %v1344_v51 = vld [vmem:[%s5093_s3 + $0xc8] sm:$0xff]  ;;  %v5100_v53 = vmax.f32 %v3806_v42, 0.0  ;;  %439 = vst [vmem:[#allocation2 + $0xe1] sm:$0xff] %v5101_v52  ;;  %v5098_v31 = vmax.f32 %v3857_v23, 0.0 }
  0x36   : > { %3037 = vmatprep.subr.bf16.mxu0 %v5107_v3  ;;  %v2996_v1 = vpack.c.bf16 %v1344_v51, %v1343_v50  ;;  %v1379_v50 = vld [vmem:[%s5093_s3 + $0x1e0] sm:$0xff]  ;;  %v1380_v51 = vld [vmem:[%s5093_s3 + $0x1e8] sm:$0xff]  ;;  %441 = vst [vmem:[#allocation2 + $0xf9] sm:$0xff] %v5099_v30 }
  0x37   : > { %440 = vst [vmem:[#allocation2 + $0xf1] sm:$0xff] %v5100_v53  ;;  %442 = vst [vmem:[#allocation2 + $0x109] sm:$0xff] %v5098_v31  ;;  %v3050_v2 = vpack.c.bf16 %v1380_v51, %v1379_v50  ;;  %v519_v31 = vld [vmem:[#allocation2 + $0x9] sm:$0xff]  ;;  %v264_v30 = vld [vmem:[%s3568_s25 + $0xe0] sm:$0xff] }
  0x38   : > { %2991 = vmatpush1.bf16.msra.mxu1 %v2990_v16  ;;  %v1346_v16 = vld [vmem:[%s5093_s3 + $0xd8] sm:$0xff]  ;;  %v303_v53 = vmul.f32 %v3588_v44, %v264_v30 }
  0x39   : > { %3039 = vmatpush1.bf16.msra.mxu0 %v3038_v17  ;;  %2992 = vmatprep.subr.bf16.mxu1 %v5107_v3  ;;  %v1377_v17 = vld [vmem:[%s5093_s3 + $0x1d0] sm:$0xff]  ;;  %v2999_v24 = vpack.c.bf16 %v1346_v16, %v1345_v12  ;;  %v259_v12 = vld [vmem:[%s3568_s25 + $0xb8] sm:$0xff] }
  0x3a   : > { %3040 = vmatprep.subr.bf16.mxu0 %v5107_v3  ;;  %v3047_v32 = vpack.c.bf16 %v1378_v21, %v1377_v17  ;;  %v1381_v16 = vld [vmem:[%s5093_s3 + $0x1f0] sm:$0xff]  ;;  %v1382_v17 = vld [vmem:[%s5093_s3 + $0x1f8] sm:$0xff]  ;;  %v342_v30 = vadd.f32 %v3593_v45, %v303_v53 }
  0x3b   : > { %v3982_v53 = vld [vmem:[#allocation2 + $0x30] sm:$0xff] }
  0x3c   : > { %2994 = vmatpush1.bf16.msra.mxu1 %v2993_v47  ;;  %v1348_v47 = vld [vmem:[%s5093_s3 + $0xe8] sm:$0xff] }
  0x3d   : > { %3042 = vmatpush1.bf16.msra.mxu0 %v3041_v49  ;;  %2995 = vmatprep.subr.bf16.mxu1 %v5107_v3  ;;  %v257_v49 = vld [vmem:[%s3568_s25 + $0xa8] sm:$0xff]  ;;  %v3002_v58 = vpack.c.bf16 %v1348_v47, %v1347_v33  ;;  %v260_v33 = vld [vmem:[%s3568_s25 + $0xc0] sm:$0xff] }
  0x3e   : > { %3043 = vmatprep.subr.bf16.mxu0 %v5107_v3  ;;  %v296_v56 = vmul.f32 %v3588_v44, %v257_v49  ;;  %v299_v47 = vmul.f32 %v3588_v44, %v260_v33 }
  0x40   : > { %2997 = vmatpush1.bf16.msra.mxu1 %v2996_v1  ;;  %v3883_v61 = vadd.f32 %v3593_v45, %v296_v56  ;;  %v297_v1 = vmul.f32 %v3588_v44, %v258_v57  ;;  %v261_v56 = vld [vmem:[%s3568_s25 + $0xc8] sm:$0xff]  ;;  %v3053_v57 = vpack.c.bf16 %v1382_v17, %v1381_v16  ;;  %v1415_v16 = vld [vmem:[%s5093_s3 + $0x300] sm:$0xff] }
  0x41   : > { %3045 = vmatpush1.bf16.msra.mxu0 %v3044_v6  ;;  %2998 = vmatprep.subr.bf16.mxu1 %v5107_v3  ;;  %v1350_v6 = vld [vmem:[%s5093_s3 + $0xf8] sm:$0xff]  ;;  %v1416_v17 = vld [vmem:[%s5093_s3 + $0x308] sm:$0xff] }
  0x42   : > { %3046 = vmatprep.subr.bf16.mxu0 %v5107_v3  ;;  %v5097_v21 = vmax.f32 %v3883_v61, 0.0  ;;  %v3005_v49 = vpack.c.bf16 %v1350_v6, %v1349_v5  ;;  %v1384_v5 = vld [vmem:[%s5093_s3 + $0x208] sm:$0xff]  ;;  %v262_v6 = vld [vmem:[%s3568_s25 + $0xd0] sm:$0xff] }
  0x44   : > { %3000 = vmatpush1.bf16.msra.mxu1 %v2999_v24  ;;  %v3903_v24 = vadd.f32 %v3593_v45, %v297_v1  ;;  %443 = vst [vmem:[#allocation2 + $0x111] sm:$0xff] %v5097_v21  ;;  %v338_v1 = vadd.f32 %v3593_v45, %v299_v47  ;;  %v301_v47 = vmul.f32 %v3588_v44, %v262_v6 }
  0x45   : > { %3048 = vmatpush1.bf16.msra.mxu0 %v3047_v32  ;;  %3001 = vmatprep.subr.bf16.mxu1 %v5107_v3  ;;  %v298_v32 = vmul.f32 %v3588_v44, %v259_v12  ;;  %v300_v12 = vmul.f32 %v3588_v44, %v261_v56  ;;  %v454_v56 = vld [vmem:[#allocation2] sm:$0xff] }
  0x46   : > { %3049 = vmatprep.subr.bf16.mxu0 %v5107_v3  ;;  %v5096_v50 = vmax.f32 %v3903_v24, 0.0 }
  0x47   : > { %v337_v51 = vadd.f32 %v3593_v45, %v298_v32  ;;  %v3934_v32 = vmax.f32 %v338_v1, 0.0  ;;  %v339_v33 = vadd.f32 %v3593_v45, %v300_v12  ;;  %v1385_v1 = vld [vmem:[%s5093_s3 + $0x210] sm:$0xff] }
  0x48   : > { %3003 = vmatpush1.bf16.msra.mxu1 %v3002_v58  ;;  %v1383_v58 = vld [vmem:[%s5093_s3 + $0x200] sm:$0xff]  ;;  %444 = vst [vmem:[#allocation2 + $0x121] sm:$0xff] %v5096_v50  ;;  %v263_v50 = vld [vmem:[%s3568_s25 + $0xd8] sm:$0xff] }
  0x49   : > { %3051 = vmatpush1.bf16.msra.mxu0 %v3050_v2  ;;  %3004 = vmatprep.subr.bf16.mxu1 %v5107_v3  ;;  %v3925_v2 = vmax.f32 %v337_v51, 0.0  ;;  %v582_v51 = vld [vmem:[#allocation2 + $0x2] sm:$0xff]  ;;  %v3056_v21 = vpack.c.bf16 %v1384_v5, %v1383_v58  ;;  %446 = vst [vmem:[#allocation2 + $0x139] sm:$0xff] %v3934_v32  ;;  %v3945_v12 = vmax.f32 %v339_v33, 0.0  ;;  %v302_v6 = vmul.f32 %v3588_v44, %v263_v50  ;;  %v1386_v58 = vld [vmem:[%s5093_s3 + $0x218] sm:$0xff]  ;;  %v1417_v50 = vld [vmem:[%s5093_s3 + $0x310] sm:$0xff] }
  0x4a   : > { %3052 = vmatprep.subr.bf16.mxu0 %v5107_v3  ;;  %v3956_v5 = vpack.c.bf16 %v1416_v17, %v1415_v16  ;;  %v265_v33 = vld [vmem:[%s3568_s25 + $0xe8] sm:$0xff]  ;;  %v266_v17 = vld [vmem:[%s3568_s25 + $0xf0] sm:$0xff]  ;;  %v3059_v40 = vpack.c.bf16 %v1386_v58, %v1385_v1  ;;  %v3991_v58 = vmax.f32 %v342_v30, 0.0 }
  0x4b   : > { %445 = vst [vmem:[#allocation2 + $0x129] sm:$0xff] %v3925_v2  ;;  %447 = vst [vmem:[#allocation2 + $0x141] sm:$0xff] %v3945_v12  ;;  %v341_v48 = vadd.f32 %v3593_v45, %v302_v6  ;;  %v304_v16 = vmul.f32 %v3588_v44, %v265_v33  ;;  %v1419_v33 = vld [vmem:[%s5093_s3 + $0x320] sm:$0xff] }
  0x4c   : > { %3006 = vmatpush1.bf16.msra.mxu1 %v3005_v49  ;;  %v340_v49 = vadd.f32 %v3593_v45, %v301_v47  ;;  %v1418_v47 = vld [vmem:[%s5093_s3 + $0x318] sm:$0xff]  ;;  %450 = vst [vmem:[#allocation2 + $0x169] sm:$0xff] %v3991_v58 }
  0x4d   : > { %3054 = vmatpush1.bf16.msra.mxu0 %v3053_v57  ;;  %3183 = vmatprep.subr.bf16.mxu1 %v5107_v3  ;;  %v3951_v57 = vld [vmem:[#allocation2 + $0x20] sm:$0xff]  ;;  %v3978_v6 = vmax.f32 %v341_v48, 0.0  ;;  %v3989_v1 = vpack.c.bf16 %v1418_v47, %v1417_v50  ;;  %v267_v48 = vld [vmem:[%s3568_s25 + $0xf8] sm:$0xff] }
  0x4e   : > { %3055 = vmatprep.subr.bf16.mxu0 %v5107_v3  ;;  %v3967_v52 = vmax.f32 %v340_v49, 0.0  ;;  %v1387_v49 = vld [vmem:[%s5093_s3 + $0x220] sm:$0xff]  ;;  %v306_v47 = vmul.f32 %v3588_v44, %v267_v48 }
  0x4f   : > { %1528 = vmatmul.mubr.f32.vlgmr.msra.gmra.mrb[0].mxu1 %v454_v56  ;;  %v583_v56 = vld [vmem:[#allocation2 + $0xa] sm:$0xff]  ;;  %449 = vst [vmem:[#allocation2 + $0x159] sm:$0xff] %v3978_v6  ;;  %v1391_v48 = vld [vmem:[%s5093_s3 + $0x240] sm:$0xff] }
  0x50   : > { %1753 = vmatmul.mubr.f32.vlgmr.msra.gmra.mrb[0].mxu0 %v582_v51  ;;  %1532 = vmatprep.mubr.f32.mxu1 %v519_v31  ;;  %448 = vst [vmem:[#allocation2 + $0x151] sm:$0xff] %v3967_v52  ;;  %v343_v51 = vadd.f32 %v3593_v45, %v304_v16  ;;  %v305_v31 = vmul.f32 %v3588_v44, %v266_v17  ;;  %v1420_v16 = vld [vmem:[%s5093_s3 + $0x328] sm:$0xff]  ;;  %v1389_v44 = vld [vmem:[%s5093_s3 + $0x230] sm:$0xff] }
  0x51   : > { %3057 = vmatpush1.bf16.msra.mxu0 %v3056_v21  ;;  %1757 = vmatprep.mubr.f32.mxu0 %v3951_v57  ;;  %v1388_v21 = vld [vmem:[%s5093_s3 + $0x228] sm:$0xff] }
  0x52   : > { %3058 = vmatprep.subr.bf16.mxu0 %v5107_v3  ;;  %3199 = vmatpush1.bf16.msra.mxu1 %v3956_v5  ;;  %v4003_v17 = vmax.f32 %v343_v51, 0.0  ;;  %v4006_v50 = vadd.f32 %v3593_v45, %v305_v31  ;;  %v3062_v30 = vpack.c.bf16 %v1388_v21, %v1387_v49  ;;  %v4016_v31 = vadd.f32 %v3593_v45, %v306_v47  ;;  %v1421_v45 = vld [vmem:[%s5093_s3 + $0x330] sm:$0xff]  ;;  %v650_v21 = vld [vmem:[#allocation2 + $0x48] sm:$0xff] }
  0x53   : > { %1533 = vmatmul.mubr.f32.gmra.mrb[2].mxu1 %v3393_v8  ;;  %3184 = vmatprep.subr.bf16.mxu1 %v5107_v3  ;;  %v584_v8 = vld [vmem:[#allocation2 + $0x1a] sm:$0xff]  ;;  %v3065_v49 = vpack.c.bf16 %v1390_v54, %v1389_v44  ;;  %v586_v47 = vld [vmem:[#allocation2 + $0x32] sm:$0xff] }
  0x54   : > { %5138 = vst [vmem:[#allocation4_spill] sm:$0xff] %v4003_v17  ;;  %5139 = vst [vmem:[#allocation5_spill] sm:$0xff] %v4006_v50  ;;  %1758 = vmatmul.mubr.f32.gmra.mrb[2].mxu0 %v583_v56  ;;  %1537 = vmatprep.mubr.f32.mxu1 %v346_v63  ;;  %v5106_v51 = vmax.f32 %v4006_v50, 0.0  ;;  %v4026_v63 = vpack.c.bf16 %v1420_v16, %v1419_v33  ;;  %v5105_v56 = vmax.f32 %v4016_v31, 0.0  ;;  %v1392_v33 = vld [vmem:[%s5093_s3 + $0x248] sm:$0xff]  ;;  %v1394_v44 = vld [vmem:[%s5093_s3 + $0x258] sm:$0xff] }
  0x55   : > { %1762 = vmatprep.mubr.f32.mxu0 %v3982_v53  ;;  %3060 = vmatpush1.bf16.msra.mxu0 %v3059_v40  ;;  %451 = vst [vmem:[#allocation2 + $0x171] sm:$0xff] %v4003_v17  ;;  %5140 = vst [vmem:[#allocation6_spill] sm:$0xff] %v4016_v31  ;;  %v1422_v40 = vld [vmem:[%s5093_s3 + $0x338] sm:$0xff]  ;;  %v1424_v16 = vld [vmem:[%s5093_s3 + $0x348] sm:$0xff] }
  0x56   : > { %3061 = vmatprep.subr.bf16.mxu0 %v5107_v3  ;;  %3200 = vmatpush1.bf16.msra.mxu1 %v3989_v1  ;;  %452 = vst [vmem:[#allocation2 + $0x181] sm:$0xff] %v5106_v51  ;;  %453 = vst [vmem:[#allocation2 + $0x189] sm:$0xff] %v5105_v56  ;;  %v4051_v0 = vpack.c.bf16 %v1422_v40, %v1421_v45  ;;  %v587_v45 = vld [vmem:[#allocation2 + $0x3a] sm:$0xff]  ;;  %v5141_v51 = vmax.f32 %v3768_v18, 0.0  ;;  %v5142_v18 = vmax.f32 %v3784_v29, 0.0  ;;  %v5144_v29 = vmax.f32 %v3803_v41, 0.0 }
  0x57   : > { %1538 = vmatmul.mubr.f32.gmra.mrb[4].mxu1 %v3737_v59  ;;  %3185 = vmatprep.subr.bf16.mxu1 %v5107_v3  ;;  %v585_v59 = vld [vmem:[#allocation2 + $0x22] sm:$0xff]  ;;  %v4327_v56 = vld [vmem:[#allocation2 + $0xd8] sm:$0xff]  ;;  %v5148_v41 = vmax.f32 %v3854_v22, 0.0  ;;  %v5152_v22 = vmax.f32 %v3883_v61, 0.0  ;;  %v4424_v61 = vld [vmem:[#allocation2 + $0x12a] sm:$0xff] }
  0x58   : > { %1763 = vmatmul.mubr.f32.gmra.mrb[4].mxu0 %v584_v8  ;;  %1542 = vmatprep.mubr.f32.mxu1 %v347_v13  ;;  %v1423_v13 = vld [vmem:[%s5093_s3 + $0x340] sm:$0xff]  ;;  %v3068_v8 = vpack.c.bf16 %v1392_v33, %v1391_v48  ;;  %v4102_v33 = vld [vmem:[#allocation2 + $0x4a] sm:$0xff]  ;;  %v4409_v50 = vld [vmem:[#allocation2 + $0x138] sm:$0xff]  ;;  %5156 = vst [vmem:[#allocation13_spill] sm:$0xff] %v4424_v61 }
  0x59   : > { %1767 = vmatprep.mubr.f32.mxu0 %v649_v34  ;;  %3063 = vmatpush1.bf16.msra.mxu0 %v3062_v30  ;;  %v651_v30 = vld [vmem:[#allocation2 + $0x50] sm:$0xff]  ;;  %v4071_v54 = vpack.c.bf16 %v1424_v16, %v1423_v13  ;;  %v4400_v31 = vld [vmem:[#allocation2 + $0x128] sm:$0xff] }
  0x5a   : > { %3064 = vmatprep.subr.bf16.mxu0 %v5107_v3  ;;  %3201 = vmatpush1.bf16.msra.mxu1 %v4026_v63  ;;  %v1397_v16 = vld [vmem:[%s5093_s3 + $0x270] sm:$0xff] }
  0x5b   : > { %1543 = vmatmul.mubr.f32.gmra.mrb[6].mxu1 %v3951_v57  ;;  %3186 = vmatprep.subr.bf16.mxu1 %v5107_v3  ;;  %v1393_v57 = vld [vmem:[%s5093_s3 + $0x250] sm:$0xff] }
  0x5c   : > { %1768 = vmatmul.mubr.f32.gmra.mrb[6].mxu0 %v585_v59  ;;  %1547 = vmatprep.mubr.f32.mxu1 %v348_v19  ;;  %v1426_v19 = vld [vmem:[%s5093_s3 + $0x358] sm:$0xff]  ;;  %v3071_v40 = vpack.c.bf16 %v1394_v44, %v1393_v57  ;;  %v652_v59 = vld [vmem:[#allocation2 + $0x60] sm:$0xff] }
  0x5d   : > { %1772 = vmatprep.mubr.f32.mxu0 %v650_v21  ;;  %3066 = vmatpush1.bf16.msra.mxu0 %v3065_v49  ;;  %v1396_v49 = vld [vmem:[%s5093_s3 + $0x268] sm:$0xff]  ;;  %v4091_v48 = vpack.c.bf16 %v1426_v19, %v1425_v7  ;;  %v4124_v57 = vld [vmem:[#allocation2 + $0x52] sm:$0xff]  ;;  %v1399_v7 = vld [vmem:[%s5093_s3 + $0x280] sm:$0xff] }
  0x5e   : > { %3067 = vmatprep.subr.bf16.mxu0 %v5107_v3  ;;  %3202 = vmatpush1.bf16.msra.mxu1 %v4051_v0  ;;  %v654_v44 = vld [vmem:[#allocation2 + $0x78] sm:$0xff]  ;;  %v1400_v19 = vld [vmem:[%s5093_s3 + $0x288] sm:$0xff] }
  0x5f   : > { %1548 = vmatmul.mubr.f32.gmra.mrb[8].mxu1 %v3982_v53  ;;  %3187 = vmatprep.subr.bf16.mxu1 %v5107_v3  ;;  %v1395_v53 = vld [vmem:[%s5093_s3 + $0x260] sm:$0xff] }
  0x60   : > { %1773 = vmatmul.mubr.f32.gmra.mrb[8].mxu0 %v586_v47  ;;  %1552 = vmatprep.mubr.f32.mxu1 %v349_v25  ;;  %v1428_v25 = vld [vmem:[%s5093_s3 + $0x368] sm:$0xff]  ;;  %v3074_v13 = vpack.c.bf16 %v1396_v49, %v1395_v53  ;;  %v1398_v47 = vld [vmem:[%s5093_s3 + $0x278] sm:$0xff]  ;;  %v655_v53 = vld [vmem:[#allocation2 + $0x80] sm:$0xff] }
  0x61   : > { %1777 = vmatprep.mubr.f32.mxu0 %v651_v30  ;;  %3069 = vmatpush1.bf16.msra.mxu0 %v3068_v8  ;;  %v4112_v15 = vpack.c.bf16 %v1428_v25, %v1427_v14  ;;  %v1430_v8 = vld [vmem:[%s5093_s3 + $0x378] sm:$0xff]  ;;  %v1401_v49 = vld [vmem:[%s5093_s3 + $0x290] sm:$0xff] }
  0x62   : > { %3070 = vmatprep.subr.bf16.mxu0 %v5107_v3  ;;  %3203 = vmatpush1.bf16.msra.mxu1 %v4071_v54  ;;  %v1402_v14 = vld [vmem:[%s5093_s3 + $0x298] sm:$0xff] }
  0x63   : > { %1553 = vmatmul.mubr.f32.gmra.mrb[10].mxu1 %v649_v34  ;;  %3188 = vmatprep.subr.bf16.mxu1 %v5107_v3  ;;  %v653_v34 = vld [vmem:[#allocation2 + $0x68] sm:$0xff]  ;;  %v1434_v25 = vld [vmem:[%s5093_s3 + $0x398] sm:$0xff] }
  0x64   : > { %1778 = vmatmul.mubr.f32.gmra.mrb[10].mxu0 %v587_v45  ;;  %1557 = vmatprep.mubr.f32.mxu1 %v350_v26  ;;  %v1429_v26 = vld [vmem:[%s5093_s3 + $0x370] sm:$0xff]  ;;  %v1432_v45 = vld [vmem:[%s5093_s3 + $0x388] sm:$0xff] }
  0x65   : > { %1782 = vmatprep.mubr.f32.mxu0 %v652_v59  ;;  %3072 = vmatpush1.bf16.msra.mxu0 %v3071_v40  ;;  %v4134_v20 = vpack.c.bf16 %v1430_v8, %v1429_v26  ;;  %v4146_v40 = vld [vmem:[#allocation2 + $0x62] sm:$0xff] }
  0x66   : > { %3073 = vmatprep.subr.bf16.mxu0 %v5107_v3  ;;  %3204 = vmatpush1.bf16.msra.mxu1 %v4091_v48  ;;  %v1404_v26 = vld [vmem:[%s5093_s3 + $0x2a8] sm:$0xff] }
  0x67   : > { %1558 = vmatmul.mubr.f32.gmra.mrb[12].mxu1 %v650_v21  ;;  %3189 = vmatprep.subr.bf16.mxu1 %v5107_v3  ;;  %v3077_v21 = vpack.c.bf16 %v1398_v47, %v1397_v16  ;;  %v4170_v16 = vld [vmem:[#allocation2 + $0x90] sm:$0xff]  ;;  %v1403_v47 = vld [vmem:[%s5093_s3 + $0x2a0] sm:$0xff]  ;;  %v1436_v8 = vld [vmem:[%s5093_s3 + $0x3a8] sm:$0xff] }
  0x68   : > { %1783 = vmatmul.mubr.f32.gmra.mrb[12].mxu0 %v4102_v33  ;;  %1562 = vmatprep.mubr.f32.mxu1 %v351_v35  ;;  %v1431_v35 = vld [vmem:[%s5093_s3 + $0x380] sm:$0xff] }
  0x69   : > { %1787 = vmatprep.mubr.f32.mxu0 %v653_v34  ;;  %3075 = vmatpush1.bf16.msra.mxu0 %v3074_v13  ;;  %v4156_v27 = vpack.c.bf16 %v1432_v45, %v1431_v35  ;;  %v4168_v13 = vld [vmem:[#allocation2 + $0x6a] sm:$0xff]  ;;  %v1406_v35 = vld [vmem:[%s5093_s3 + $0x2b8] sm:$0xff] }
  0x6a   : > { %3076 = vmatprep.subr.bf16.mxu0 %v5107_v3  ;;  %3205 = vmatpush1.bf16.msra.mxu1 %v4112_v15  ;;  %v1438_v45 = vld [vmem:[%s5093_s3 + $0x3b8] sm:$0xff] }
  0x6b   : > { %1563 = vmatmul.mubr.f32.gmra.mrb[14].mxu1 %v651_v30  ;;  %3190 = vmatprep.subr.bf16.mxu1 %v5107_v3  ;;  %v3080_v30 = vpack.c.bf16 %v1400_v19, %v1399_v7  ;;  %v4195_v7 = vld [vmem:[#allocation2 + $0x98] sm:$0xff]  ;;  %v1405_v19 = vld [vmem:[%s5093_s3 + $0x2b0] sm:$0xff] }
  0x6c   : > { %1788 = vmatmul.mubr.f32.gmra.mrb[14].mxu0 %v4124_v57  ;;  %1567 = vmatprep.mubr.f32.mxu1 %v352_v38  ;;  %v1433_v38 = vld [vmem:[%s5093_s3 + $0x390] sm:$0xff] }
  0x6d   : > { %1792 = vmatprep.mubr.f32.mxu0 %v654_v44  ;;  %3078 = vmatpush1.bf16.msra.mxu0 %v3077_v21  ;;  %v4180_v36 = vpack.c.bf16 %v1434_v25, %v1433_v38  ;;  %v4193_v21 = vld [vmem:[#allocation2 + $0x7a] sm:$0xff]  ;;  %v1408_v38 = vld [vmem:[%s5093_s3 + $0x2c8] sm:$0xff] }
  0x6e   : > { %3079 = vmatprep.subr.bf16.mxu0 %v5107_v3  ;;  %3206 = vmatpush1.bf16.msra.mxu1 %v4134_v20  ;;  %v1440_v25 = vld [vmem:[%s5093_s3 + $0x3c8] sm:$0xff] }
  0x6f   : > { %1568 = vmatmul.mubr.f32.gmra.mrb[16].mxu1 %v652_v59  ;;  %3191 = vmatprep.subr.bf16.mxu1 %v5107_v3  ;;  %v3083_v59 = vpack.c.bf16 %v1402_v14, %v1401_v49  ;;  %v4220_v49 = vld [vmem:[#allocation2 + $0xa8] sm:$0xff]  ;;  %v1407_v14 = vld [vmem:[%s5093_s3 + $0x2c0] sm:$0xff] }
  0x70   : > { %1793 = vmatmul.mubr.f32.gmra.mrb[16].mxu0 %v4146_v40  ;;  %1572 = vmatprep.mubr.f32.mxu1 %v353_v43  ;;  %v1435_v43 = vld [vmem:[%s5093_s3 + $0x3a0] sm:$0xff] }
  0x71   : > { %1797 = vmatprep.mubr.f32.mxu0 %v655_v53  ;;  %3081 = vmatpush1.bf16.msra.mxu0 %v3080_v30  ;;  %v4205_v39 = vpack.c.bf16 %v1436_v8, %v1435_v43  ;;  %v4218_v30 = vld [vmem:[#allocation2 + $0x82] sm:$0xff]  ;;  %v1410_v43 = vld [vmem:[%s5093_s3 + $0x2d8] sm:$0xff] }
  0x72   : > { %3082 = vmatprep.subr.bf16.mxu0 %v5107_v3  ;;  %3207 = vmatpush1.bf16.msra.mxu1 %v4156_v27 }
  0x73   : > { %1573 = vmatmul.mubr.f32.gmra.mrb[18].mxu1 %v653_v34  ;;  %3192 = vmatprep.subr.bf16.mxu1 %v5107_v3  ;;  %v3086_v34 = vpack.c.bf16 %v1404_v26, %v1403_v47  ;;  %v4244_v47 = vld [vmem:[#allocation2 + $0xb0] sm:$0xff] }
  0x74   : > { %1798 = vmatmul.mubr.f32.gmra.mrb[18].mxu0 %v4168_v13  ;;  %1577 = vmatprep.mubr.f32.mxu1 %v354_v55  ;;  %v1437_v55 = vld [vmem:[%s5093_s3 + $0x3b0] sm:$0xff] }
  0x75   : > { %1802 = vmatprep.mubr.f32.mxu0 %v4170_v16  ;;  %3084 = vmatpush1.bf16.msra.mxu0 %v3083_v59  ;;  %v4230_v46 = vpack.c.bf16 %v1438_v45, %v1437_v55  ;;  %v4242_v59 = vld [vmem:[#allocation2 + $0x92] sm:$0xff]  ;;  %v4269_v45 = vld [vmem:[#allocation2 + $0xc0] sm:$0xff] }
  0x76   : > { %3085 = vmatprep.subr.bf16.mxu0 %v5107_v3  ;;  %3208 = vmatpush1.bf16.msra.mxu1 %v4180_v36  ;;  %v1409_v26 = vld [vmem:[%s5093_s3 + $0x2d0] sm:$0xff] }
  0x77   : > { %1578 = vmatmul.mubr.f32.gmra.mrb[20].mxu1 %v654_v44  ;;  %3193 = vmatprep.subr.bf16.mxu1 %v5107_v3  ;;  %v3089_v44 = vpack.c.bf16 %v1406_v35, %v1405_v19  ;;  %v1442_v19 = vld [vmem:[%s5093_s3 + $0x3d8] sm:$0xff]  ;;  %v3095_v55 = vpack.c.bf16 %v1410_v43, %v1409_v26  ;;  %v4295_v43 = vld [vmem:[#allocation2 + $0xc8] sm:$0xff] }
  0x78   : > { %1803 = vmatmul.mubr.f32.gmra.mrb[20].mxu0 %v4193_v21  ;;  %1582 = vmatprep.mubr.f32.mxu1 %v355_v60  ;;  %v1439_v60 = vld [vmem:[%s5093_s3 + $0x3c0] sm:$0xff] }
  0x79   : > { %1807 = vmatprep.mubr.f32.mxu0 %v4195_v7  ;;  %3087 = vmatpush1.bf16.msra.mxu0 %v3086_v34  ;;  %v4254_v8 = vpack.c.bf16 %v1440_v25, %v1439_v60  ;;  %v1441_v34 = vld [vmem:[%s5093_s3 + $0x3d0] sm:$0xff]  ;;  %v4267_v35 = vld [vmem:[#allocation2 + $0x9a] sm:$0xff]  ;;  %v1444_v25 = vld [vmem:[%s5093_s3 + $0x3e8] sm:$0xff] }
  0x7a   : > { %3088 = vmatprep.subr.bf16.mxu0 %v5107_v3  ;;  %3209 = vmatpush1.bf16.msra.mxu1 %v4205_v39  ;;  %v1443_v60 = vld [vmem:[%s5093_s3 + $0x3e0] sm:$0xff] }
  0x7b   : > { %1583 = vmatmul.mubr.f32.gmra.mrb[22].mxu1 %v655_v53  ;;  %3194 = vmatprep.subr.bf16.mxu1 %v5107_v3  ;;  %v3092_v53 = vpack.c.bf16 %v1408_v38, %v1407_v14  ;;  %v1412_v14 = vld [vmem:[%s5093_s3 + $0x2e8] sm:$0xff]  ;;  %v4279_v38 = vpack.c.bf16 %v1442_v19, %v1441_v34  ;;  %v1413_v34 = vld [vmem:[%s5093_s3 + $0x2f0] sm:$0xff] }
  0x7c   : > { %1808 = vmatmul.mubr.f32.gmra.mrb[22].mxu0 %v4218_v30  ;;  %1587 = vmatprep.mubr.f32.mxu1 %v3752_v4  ;;  %v1445_v19 = vld [vmem:[%s5093_s3 + $0x3f0] sm:$0xff] }
  0x7d   : > { %1812 = vmatprep.mubr.f32.mxu0 %v4220_v49  ;;  %3090 = vmatpush1.bf16.msra.mxu0 %v3089_v44  ;;  %v1411_v44 = vld [vmem:[%s5093_s3 + $0x2e0] sm:$0xff] }
  0x7e   : > { %3091 = vmatprep.subr.bf16.mxu0 %v5107_v3  ;;  %3210 = vmatpush1.bf16.msra.mxu1 %v4230_v46  ;;  %v3098_v26 = vpack.c.bf16 %v1412_v14, %v1411_v44  ;;  %v1447_v44 = vld [vmem:[%s5093_s3 + $0x400] sm:$0xff]  ;;  %v1448_v14 = vld [vmem:[%s5093_s3 + $0x408] sm:$0xff] }
  0x7f   : > { %1588 = vmatmul.mubr.f32.gmra.mrb[24].mxu1 %v4170_v16  ;;  %3195 = vmatprep.subr.bf16.mxu1 %v5107_v3 }
  0x80   : > { %1813 = vmatmul.mubr.f32.gmra.mrb[24].mxu0 %v4242_v59  ;;  %1592 = vmatprep.mubr.f32.mxu1 %v3758_v9 }
  0x81   : > { %1817 = vmatprep.mubr.f32.mxu0 %v4244_v47  ;;  %3093 = vmatpush1.bf16.msra.mxu0 %v3092_v53  ;;  %v4293_v53 = vld [vmem:[#allocation2 + $0xaa] sm:$0xff] }
  0x82   : > { %3094 = vmatprep.subr.bf16.mxu0 %v5107_v3  ;;  %3211 = vmatpush1.bf16.msra.mxu1 %v4254_v8 }
  0x83   : > { %1593 = vmatmul.mubr.f32.gmra.mrb[26].mxu1 %v4195_v7  ;;  %3196 = vmatprep.subr.bf16.mxu1 %v5107_v3 }
  0x84   : > { %1818 = vmatmul.mubr.f32.gmra.mrb[26].mxu0 %v4267_v35  ;;  %1597 = vmatprep.mubr.f32.mxu1 %v358_v10  ;;  %v4305_v10 = vpack.c.bf16 %v1444_v25, %v1443_v60  ;;  %v4325_v60 = vld [vmem:[#allocation2 + $0xb2] sm:$0xff]  ;;  %v3101_v25 = vpack.c.bf16 %v1414_v62, %v1413_v34  ;;  %v4343_v34 = vld [vmem:[#allocation2 + $0xe0] sm:$0xff] }
  0x85   : > { %1822 = vmatprep.mubr.f32.mxu0 %v4269_v45  ;;  %3096 = vmatpush1.bf16.msra.mxu0 %v3095_v55  ;;  %v1446_v55 = vld [vmem:[%s5093_s3 + $0x3f8] sm:$0xff]  ;;  %v4355_v62 = vld [vmem:[#allocation2 + $0xf0] sm:$0xff] }
  0x86   : > { %3097 = vmatprep.subr.bf16.mxu0 %v5107_v3  ;;  %3212 = vmatpush1.bf16.msra.mxu1 %v4279_v38  ;;  %v4331_v11 = vpack.c.bf16 %v1446_v55, %v1445_v19  ;;  %v5143_v19 = vmax.f32 %v3797_v37, 0.0  ;;  %v4362_v55 = vld [vmem:[#allocation2 + $0xda] sm:$0xff]  ;;  %v5146_v37 = vmax.f32 %v3806_v42, 0.0  ;;  %v5150_v42 = vmax.f32 %v3857_v23, 0.0 }
  0x87   : > { %1598 = vmatmul.mubr.f32.gmra.mrb[28].mxu1 %v4220_v49  ;;  %3197 = vmatprep.subr.bf16.mxu1 %v5107_v3  ;;  %v5154_v23 = vmax.f32 %v3903_v24, 0.0  ;;  %v4432_v24 = vld [vmem:[#allocation2 + $0x13a] sm:$0xff] }
  0x88   : > { %1823 = vmatmul.mubr.f32.gmra.mrb[28].mxu0 %v4293_v53  ;;  %1602 = vmatprep.mubr.f32.mxu1 %v359_v28  ;;  %v4335_v28 = vpack.c.bf16 %v1448_v14, %v1447_v44  ;;  %v4364_v44 = vld [vmem:[#allocation2 + $0xf8] sm:$0xff]  ;;  %v4371_v14 = vld [vmem:[#allocation2 + $0xe2] sm:$0xff]  ;;  %5157 = vst [vmem:[#allocation14_spill] sm:$0xff] %v4432_v24 }
  0x89   : > { %1827 = vmatprep.mubr.f32.mxu0 %v4295_v43  ;;  %3099 = vmatpush1.bf16.msra.mxu0 %v3098_v26  ;;  %v4341_v26 = vld [vmem:[#allocation2 + $0xc2] sm:$0xff]  ;;  %5145 = vst [vmem:[#allocation7_spill] sm:$0xff] %v4371_v14 }
  0x8a   : > { %3100 = vmatprep.subr.bf16.mxu0 %v5107_v3  ;;  %3213 = vmatpush1.bf16.msra.mxu1 %v4305_v10 }
  0x8b   : > { %1603 = vmatmul.mubr.f32.gmra.mrb[30].mxu1 %v4244_v47  ;;  %3198 = vmatprep.subr.bf16.mxu1 %v5107_v3 }
  0x8c   : > { %1828 = vmatmul.mubr.f32.gmra.mrb[30].mxu0 %v4325_v60  ;;  %1607 = vmatprep.mubr.f32.mxu1 %v5141_v51  ;;  %v4353_v51 = vld [vmem:[#allocation2 + $0xca] sm:$0xff] }
  0x8d   : > { %1832 = vmatprep.mubr.f32.mxu0 %v4327_v56  ;;  %3102 = vmatpush1.bf16.msra.mxu0 %v3101_v25  ;;  %v4373_v25 = vld [vmem:[#allocation2 + $0x108] sm:$0xff] }
  0x8e   : > { %3214 = vmatpush1.bf16.msra.mxu1 %v4331_v11  ;;  %3103 = vmatprep.subr.bf16.mxu0 %v5107_v3  ;;  %v4391_v3 = vld [vmem:[#allocation2 + $0x120] sm:$0xff] }
  0x8f   : > { %1608 = vmatmul.mubr.f32.gmra.mrb[32].mxu1 %v4269_v45  ;;  %3152 = vmatprep.subr.bf16.mxu1 %v4335_v28 }
  0x90   : > { %1833 = vmatmul.mubr.f32.gmra.mrb[32].mxu0 %v4341_v26  ;;  %1612 = vmatprep.mubr.f32.mxu1 %v5142_v18  ;;  %v4380_v18 = vld [vmem:[#allocation2 + $0xf2] sm:$0xff] }
  0x91   : > { %1837 = vmatprep.mubr.f32.mxu0 %v4343_v34  ;;  %5147 = vst [vmem:[#allocation8_spill] sm:$0xff] %v4380_v18 }
  0x93   : > { %1613 = vmatmul.mubr.f32.gmra.mrb[34].mxu1 %v4295_v43 }
  0x94   : > { %1838 = vmatmul.mubr.f32.gmra.mrb[34].mxu0 %v4353_v51  ;;  %1617 = vmatprep.mubr.f32.mxu1 %v5143_v19  ;;  %v4382_v19 = vld [vmem:[#allocation2 + $0x110] sm:$0xff] }
  0x95   : > { %1842 = vmatprep.mubr.f32.mxu0 %v4355_v62 }
  0x97   : > { %1618 = vmatmul.mubr.f32.gmra.mrb[36].mxu1 %v4327_v56 }
  0x98   : > { %1843 = vmatmul.mubr.f32.gmra.mrb[36].mxu0 %v4362_v55  ;;  %1622 = vmatprep.mubr.f32.mxu1 %v5144_v29  ;;  %v4389_v29 = vld [vmem:[#allocation2 + $0xfa] sm:$0xff] }
  0x99   : > { %1847 = vmatprep.mubr.f32.mxu0 %v4364_v44  ;;  %5149 = vst [vmem:[#allocation9_spill] sm:$0xff] %v4389_v29 }
  0x9b   : > { %1623 = vmatmul.mubr.f32.gmra.mrb[38].mxu1 %v4343_v34 }
  0x9c   : > { %1848 = vmatmul.mubr.f32.gmra.mrb[38].mxu0 %v4371_v14  ;;  %1627 = vmatprep.mubr.f32.mxu1 %v5146_v37  ;;  %v4398_v37 = vld [vmem:[#allocation2 + $0x10a] sm:$0xff] }
  0x9d   : > { %1852 = vmatprep.mubr.f32.mxu0 %v4373_v25  ;;  %5151 = vst [vmem:[#allocation10_spill] sm:$0xff] %v4398_v37  ;;  %v4466_v14 = vld [vmem:[#allocation2 + $0x188] sm:$0xff] }
  0x9e   : > { %5166 = vst [vmem:[#allocation23_spill] sm:$0xff] %v4466_v14 }
  0x9f   : > { %1628 = vmatmul.mubr.f32.gmra.mrb[40].mxu1 %v4355_v62 }
  0xa0   : > { %1853 = vmatmul.mubr.f32.gmra.mrb[40].mxu0 %v4380_v18  ;;  %1632 = vmatprep.mubr.f32.mxu1 %v5148_v41  ;;  %v4407_v41 = vld [vmem:[#allocation2 + $0x112] sm:$0xff]  ;;  %v4458_v18 = vld [vmem:[#allocation2 + $0x180] sm:$0xff] }
  0xa1   : > { %1857 = vmatprep.mubr.f32.mxu0 %v4382_v19  ;;  %5153 = vst [vmem:[#allocation11_spill] sm:$0xff] %v4407_v41  ;;  %5164 = vst [vmem:[#allocation21_spill] sm:$0xff] %v4458_v18 }
  0xa3   : > { %1633 = vmatmul.mubr.f32.gmra.mrb[42].mxu1 %v4364_v44 }
  0xa4   : > { %1858 = vmatmul.mubr.f32.gmra.mrb[42].mxu0 %v4389_v29  ;;  %1637 = vmatprep.mubr.f32.mxu1 %v5150_v42  ;;  %v4416_v42 = vld [vmem:[#allocation2 + $0x122] sm:$0xff]  ;;  %v4450_v29 = vld [vmem:[#allocation2 + $0x170] sm:$0xff] }
  0xa5   : > { %1862 = vmatprep.mubr.f32.mxu0 %v4391_v3  ;;  %5155 = vst [vmem:[#allocation12_spill] sm:$0xff] %v4416_v42  ;;  %5162 = vst [vmem:[#allocation19_spill] sm:$0xff] %v4450_v29 }
  0xa7   : > { %1638 = vmatmul.mubr.f32.gmra.mrb[44].mxu1 %v4373_v25 }
  0xa8   : > { %1863 = vmatmul.mubr.f32.gmra.mrb[44].mxu0 %v4398_v37  ;;  %1642 = vmatprep.mubr.f32.mxu1 %v5152_v22  ;;  %v4418_v37 = vld [vmem:[#allocation2 + $0x140] sm:$0xff]  ;;  %v4426_v22 = vld [vmem:[#allocation2 + $0x150] sm:$0xff] }
  0xa9   : > { %1867 = vmatprep.mubr.f32.mxu0 %v4400_v31 }
  0xab   : > { %1643 = vmatmul.mubr.f32.gmra.mrb[46].mxu1 %v4382_v19 }
  0xac   : > { %1868 = vmatmul.mubr.f32.gmra.mrb[46].mxu0 %v4407_v41  ;;  %1647 = vmatprep.mubr.f32.mxu1 %v5154_v23  ;;  %v4434_v23 = vld [vmem:[#allocation2 + $0x158] sm:$0xff]  ;;  %v4442_v41 = vld [vmem:[#allocation2 + $0x168] sm:$0xff] }
  0xad   : > { %1872 = vmatprep.mubr.f32.mxu0 %v4409_v50  ;;  %5158 = vst [vmem:[#allocation15_spill] sm:$0xff] %v4434_v23  ;;  %5160 = vst [vmem:[#allocation17_spill] sm:$0xff] %v4442_v41 }
  0xaf   : > { %1648 = vmatmul.mubr.f32.gmra.mrb[48].mxu1 %v4391_v3 }
  0xb0   : > { %1873 = vmatmul.mubr.f32.gmra.mrb[48].mxu0 %v4416_v42  ;;  %1652 = vmatprep.mubr.f32.mxu1 %v3925_v2  ;;  %v4440_v42 = vld [vmem:[#allocation2 + $0x142] sm:$0xff] }
  0xb1   : > { %1877 = vmatprep.mubr.f32.mxu0 %v4418_v37  ;;  %5159 = vst [vmem:[#allocation16_spill] sm:$0xff] %v4440_v42 }
  0xb3   : > { %1653 = vmatmul.mubr.f32.gmra.mrb[50].mxu1 %v4400_v31 }
  0xb4   : > { %1878 = vmatmul.mubr.f32.gmra.mrb[50].mxu0 %v4424_v61  ;;  %1657 = vmatprep.mubr.f32.mxu1 %v3934_v32  ;;  %v4448_v61 = vld [vmem:[#allocation2 + $0x152] sm:$0xff] }
  0xb5   : > { %1882 = vmatprep.mubr.f32.mxu0 %v4426_v22  ;;  %5161 = vst [vmem:[#allocation18_spill] sm:$0xff] %v4448_v61 }
  0xb7   : > { %1658 = vmatmul.mubr.f32.gmra.mrb[52].mxu1 %v4409_v50 }
  0xb8   : > { %1883 = vmatmul.mubr.f32.gmra.mrb[52].mxu0 %v4432_v24  ;;  %1662 = vmatprep.mubr.f32.mxu1 %v3945_v12  ;;  %v4456_v24 = vld [vmem:[#allocation2 + $0x15a] sm:$0xff] }
  0xb9   : > { %1887 = vmatprep.mubr.f32.mxu0 %v4434_v23  ;;  %5163 = vst [vmem:[#allocation20_spill] sm:$0xff] %v4456_v24 }
  0xbb   : > { %1663 = vmatmul.mubr.f32.gmra.mrb[54].mxu1 %v4418_v37 }
  0xbc   : > { %1888 = vmatmul.mubr.f32.gmra.mrb[54].mxu0 %v4440_v42  ;;  %1667 = vmatprep.mubr.f32.mxu1 %v3967_v52  ;;  %v4464_v42 = vld [vmem:[#allocation2 + $0x16a] sm:$0xff] }
  0xbd   : > { %1892 = vmatprep.mubr.f32.mxu0 %v4442_v41  ;;  %5165 = vst [vmem:[#allocation22_spill] sm:$0xff] %v4464_v42 }
  0xbf   : > { %1668 = vmatmul.mubr.f32.gmra.mrb[56].mxu1 %v4426_v22 }
  0xc0   : > { %1893 = vmatmul.mubr.f32.gmra.mrb[56].mxu0 %v4448_v61  ;;  %1672 = vmatprep.mubr.f32.mxu1 %v3978_v6  ;;  %v4472_v61 = vld [vmem:[#allocation2 + $0x172] sm:$0xff] }
  0xc1   : > { %1897 = vmatprep.mubr.f32.mxu0 %v4450_v29  ;;  %5167 = vst [vmem:[#allocation24_spill] sm:$0xff] %v4472_v61 }
  0xc3   : > { %1673 = vmatmul.mubr.f32.gmra.mrb[58].mxu1 %v4434_v23  ;;  %v774_v23 = vld [vmem:[#allocation2 + $0x1a] sm:$0xff] }
  0xc4   : > { %1898 = vmatmul.mubr.f32.gmra.mrb[58].mxu0 %v4456_v24  ;;  %1677 = vmatprep.mubr.f32.mxu1 %v3991_v58  ;;  %v1449_v24 = vld [vmem:[%s5093_s3 + $0x410] sm:$0xff] }
  0xc5   : > { %1902 = vmatprep.mubr.f32.mxu0 %v4458_v18  ;;  %v710_v18 = vld [vmem:[#allocation2 + $0x19] sm:$0xff] }
  0xc7   : > { %1678 = vmatmul.mubr.f32.gmra.mrb[60].mxu1 %v4442_v41  ;;  %v5168_v41 = vmov 0.0|0.0  }
  0xc8   : > { %1903 = vmatmul.mubr.f32.gmra.mrb[60].mxu0 %v4464_v42  ;;  %1682 = vmatprep.mubr.f32.mxu1 %v4003_v17  ;;  %v1450_v42 = vld [vmem:[%s5093_s3 + $0x418] sm:$0xff] }
  0xc9   : > { %1907 = vmatprep.mubr.f32.mxu0 %v4466_v14  ;;  %v775_v14 = vld [vmem:[#allocation2 + $0x22] sm:$0xff]  ;;  %v3155_v17 = vpack.c.bf16 %v1450_v42, %v1449_v24  ;;  %v4515_v42 = vld [vmem:[#allocation2 + $0xb1] sm:$0xff] }
  0xca   : > { %v4531_v24 = vld [vmem:[#allocation2 + $0xc1] sm:$0xff] }
  0xcb   : > { %1683 = vmatmul.mubr.f32.gmra.mrb[62].mxu1 %v4450_v29  ;;  %v4492_v29 = vld [vmem:[#allocation2 + $0x32] sm:$0xff] }
  0xcc   : > { %1908 = vmatmul.mubr.f32.gmra.mrb[62].mxu0 %v4472_v61  ;;  %2242 = vmatprep.mubr.f32.mxu1 %v3752_v4  ;;  %v1451_v4 = vld [vmem:[%s5093_s3 + $0x420] sm:$0xff]  ;;  %v1452_v61 = vld [vmem:[%s5093_s3 + $0x428] sm:$0xff] }
  0xcd   : > { %1977 = vmatprep.mubr.f32.mxu0 %v774_v23  ;;  %v711_v23 = vld [vmem:[#allocation2 + $0x21] sm:$0xff] }
  0xcf   : > { %2243 = vmatmul.mubr.f32.vlgmr.msra.gmra.mrb[64].mxu1 %v4170_v16  ;;  %v4497_v16 = vld [vmem:[#allocation2 + $0xa9] sm:$0xff] }
  0xd0   : > { %1978 = vmatmul.mubr.f32.vlgmr.msra.gmra.mrb[0].mxu0 %v710_v18  ;;  %2247 = vmatprep.mubr.f32.mxu1 %v3758_v9  ;;  %v3159_v9 = vpack.c.bf16 %v1452_v61, %v1451_v4  ;;  %v1455_v61 = vld [vmem:[%s5093_s3 + $0x440] sm:$0xff]  ;;  %v1457_v4 = vld [vmem:[%s5093_s3 + $0x450] sm:$0xff] }
  0xd1   : > { %3105 = vmatpush1.bf16.msra.mxu0 %v3956_v5  ;;  %1982 = vmatprep.mubr.f32.mxu0 %v775_v14  ;;  %v1453_v5 = vld [vmem:[%s5093_s3 + $0x430] sm:$0xff]  ;;  %v1454_v14 = vld [vmem:[%s5093_s3 + $0x438] sm:$0xff] }
  0xd2   : > { %3106 = vmatprep.subr.bf16.mxu0 %v5168_v41  ;;  %3154 = vmatpush3.bf16.msra.mxu1 %v4335_v28  ;;  %v4507_v28 = vld [vmem:[#allocation2 + $0x31] sm:$0xff]  ;;  %v3163_v18 = vpack.c.bf16 %v1454_v14, %v1453_v5  ;;  %v4563_v14 = vld [vmem:[#allocation2 + $0xd9] sm:$0xff] }
  0xd3   : > { %2248 = vmatmul.mubr.f32.gmra.mrb[66].mxu1 %v4195_v7  ;;  %3156 = vmatprep.subr.bf16.mxu1 %v3155_v17  ;;  %v4510_v7 = vld [vmem:[#allocation2 + $0x3a] sm:$0xff]  ;;  %v4557_v5 = vld [vmem:[#allocation2 + $0x51] sm:$0xff] }
  0xd4   : > { %1983 = vmatmul.mubr.f32.gmra.mrb[2].mxu0 %v711_v23  ;;  %2252 = vmatprep.mubr.f32.mxu1 %v4497_v16  ;;  %v4541_v23 = vld [vmem:[#allocation2 + $0x49] sm:$0xff] }
  0xd5   : > { %1987 = vmatprep.mubr.f32.mxu0 %v4492_v29  ;;  %3108 = vmatpush1.bf16.msra.mxu0 %v3989_v1  ;;  %v1456_v1 = vld [vmem:[%s5093_s3 + $0x448] sm:$0xff] }
  0xd6   : > { %3109 = vmatprep.subr.bf16.mxu0 %v5168_v41  ;;  %3158 = vmatpush3.bf16.msra.mxu1 %v3155_v17  ;;  %v4525_v17 = vld [vmem:[#allocation2 + $0x39] sm:$0xff] }
  0xd7   : > { %2253 = vmatmul.mubr.f32.gmra.mrb[68].mxu1 %v4220_v49  ;;  %3160 = vmatprep.subr.bf16.mxu1 %v3159_v9  ;;  %v3167_v49 = vpack.c.bf16 %v1456_v1, %v1455_v61  ;;  %v4579_v61 = vld [vmem:[#allocation2 + $0xe1] sm:$0xff]  ;;  %v3376_v1 = vld [vmem:[#allocation2 + $0x139] sm:$0xff] }
  0xd8   : > { %1988 = vmatmul.mubr.f32.gmra.mrb[4].mxu0 %v4507_v28  ;;  %2257 = vmatprep.mubr.f32.mxu1 %v4515_v42 }
  0xd9   : > { %1992 = vmatprep.mubr.f32.mxu0 %v4510_v7  ;;  %3111 = vmatpush1.bf16.msra.mxu0 %v4026_v63  ;;  %v1458_v63 = vld [vmem:[%s5093_s3 + $0x458] sm:$0xff] }
  0xda   : > { %3112 = vmatprep.subr.bf16.mxu0 %v5168_v41  ;;  %3162 = vmatpush3.bf16.msra.mxu1 %v3159_v9  ;;  %v4547_v9 = vld [vmem:[#allocation2 + $0xc9] sm:$0xff] }
  0xdb   : > { %2258 = vmatmul.mubr.f32.gmra.mrb[70].mxu1 %v4244_v47  ;;  %3164 = vmatprep.subr.bf16.mxu1 %v3163_v18  ;;  %v3171_v47 = vpack.c.bf16 %v1458_v63, %v1457_v4  ;;  %v971_v4 = vld [vmem:[#allocation2 + $0x62] sm:$0xff] }
  0xdc   : > { %1993 = vmatmul.mubr.f32.gmra.mrb[6].mxu0 %v4525_v17  ;;  %2262 = vmatprep.mubr.f32.mxu1 %v4531_v24 }
  0xdd   : > { %1997 = vmatprep.mubr.f32.mxu0 %v4102_v33  ;;  %3114 = vmatpush1.bf16.msra.mxu0 %v4051_v0  ;;  %v1459_v33 = vld [vmem:[%s5093_s3 + $0x460] sm:$0xff]  ;;  %v1460_v0 = vld [vmem:[%s5093_s3 + $0x468] sm:$0xff] }
  0xde   : > { %3115 = vmatprep.subr.bf16.mxu0 %v5168_v41  ;;  %3166 = vmatpush3.bf16.msra.mxu1 %v3163_v18  ;;  %v4573_v18 = vld [vmem:[#allocation2 + $0x61] sm:$0xff] }
  0xdf   : > { %2263 = vmatmul.mubr.f32.gmra.mrb[72].mxu1 %v4269_v45  ;;  %3168 = vmatprep.subr.bf16.mxu1 %v3167_v49  ;;  %v3175_v45 = vpack.c.bf16 %v1460_v0, %v1459_v33  ;;  %v5188_v33 = vld [vmem:[#allocation18_spill] sm:$0xff] }
  0xe0   : > { %1998 = vmatmul.mubr.f32.gmra.mrb[8].mxu0 %v4541_v23  ;;  %2267 = vmatprep.mubr.f32.mxu1 %v4547_v9  ;;  %v973_v0 = vld [vmem:[#allocation2 + $0x7a] sm:$0xff] }
  0xe1   : > { %2002 = vmatprep.mubr.f32.mxu0 %v4124_v57  ;;  %3117 = vmatpush1.bf16.msra.mxu0 %v4071_v54  ;;  %v1461_v57 = vld [vmem:[%s5093_s3 + $0x470] sm:$0xff]  ;;  %v1462_v54 = vld [vmem:[%s5093_s3 + $0x478] sm:$0xff] }
  0xe2   : > { %3118 = vmatprep.subr.bf16.mxu0 %v5168_v41  ;;  %3170 = vmatpush3.bf16.msra.mxu1 %v3167_v49  ;;  %v970_v49 = vld [vmem:[#allocation2 + $0x52] sm:$0xff] }
  0xe3   : > { %2268 = vmatmul.mubr.f32.gmra.mrb[74].mxu1 %v4295_v43  ;;  %3172 = vmatprep.subr.bf16.mxu1 %v3171_v47  ;;  %v3179_v43 = vpack.c.bf16 %v1462_v54, %v1461_v57  ;;  %v974_v57 = vld [vmem:[#allocation2 + $0x82] sm:$0xff]  ;;  %v5189_v54 = vld [vmem:[#allocation20_spill] sm:$0xff] }
  0xe4   : > { %2003 = vmatmul.mubr.f32.gmra.mrb[10].mxu0 %v4557_v5  ;;  %2272 = vmatprep.mubr.f32.mxu1 %v4563_v14 }
  0xe5   : > { %2007 = vmatprep.mubr.f32.mxu0 %v4146_v40  ;;  %3120 = vmatpush1.bf16.msra.mxu0 %v4091_v48  ;;  %v4583_v40 = vld [vmem:[#allocation2 + $0x69] sm:$0xff]  ;;  %v4593_v48 = vld [vmem:[#allocation2 + $0x79] sm:$0xff] }
  0xe6   : > { %3121 = vmatprep.subr.bf16.mxu0 %v5168_v41  ;;  %3174 = vmatpush3.bf16.msra.mxu1 %v3171_v47 }
  0xe7   : > { %2273 = vmatmul.mubr.f32.gmra.mrb[76].mxu1 %v4327_v56  ;;  %3176 = vmatprep.subr.bf16.mxu1 %v3175_v45  ;;  %v4589_v56 = vld [vmem:[#allocation2 + $0xf1] sm:$0xff] }
  0xe8   : > { %2008 = vmatmul.mubr.f32.gmra.mrb[12].mxu0 %v4573_v18  ;;  %2277 = vmatprep.mubr.f32.mxu1 %v4579_v61 }
  0xe9   : > { %2012 = vmatprep.mubr.f32.mxu0 %v4168_v13  ;;  %3123 = vmatpush1.bf16.msra.mxu0 %v4112_v15  ;;  %v4599_v15 = vld [vmem:[#allocation2 + $0xf9] sm:$0xff]  ;;  %v4603_v13 = vld [vmem:[#allocation2 + $0x81] sm:$0xff] }
  0xea   : > { %3124 = vmatprep.subr.bf16.mxu0 %v5168_v41  ;;  %3178 = vmatpush3.bf16.msra.mxu1 %v3175_v45 }
  0xeb   : > { %2278 = vmatmul.mubr.f32.gmra.mrb[78].mxu1 %v4343_v34  ;;  %3180 = vmatprep.subr.bf16.mxu1 %v3179_v43  ;;  %v934_v34 = vld [vmem:[#allocation2 + $0x1a1] sm:$0xff] }
  0xec   : > { %2013 = vmatmul.mubr.f32.gmra.mrb[14].mxu0 %v4583_v40  ;;  %2282 = vmatprep.mubr.f32.mxu1 %v4589_v56 }
  0xed   : > { %2017 = vmatprep.mubr.f32.mxu0 %v4193_v21  ;;  %3126 = vmatpush1.bf16.msra.mxu0 %v4134_v20  ;;  %v3369_v20 = vld [vmem:[#allocation2 + $0x109] sm:$0xff]  ;;  %v3370_v21 = vld [vmem:[#allocation2 + $0x91] sm:$0xff] }
  0xee   : > { %3127 = vmatprep.subr.bf16.mxu0 %v5168_v41  ;;  %3182 = vmatpush3.bf16.msra.mxu1 %v3179_v43  ;;  %v975_v43 = vld [vmem:[#allocation2 + $0x92] sm:$0xff] }
  0xef   : > { %2283 = vmatmul.mubr.f32.gmra.mrb[80].mxu1 %v4355_v62 }
  0xf0   : > { %2018 = vmatmul.mubr.f32.gmra.mrb[16].mxu0 %v4593_v48  ;;  %2287 = vmatprep.mubr.f32.mxu1 %v4599_v15 }
  0xf1   : > { %2022 = vmatprep.mubr.f32.mxu0 %v4218_v30  ;;  %3129 = vmatpush1.bf16.msra.mxu0 %v4156_v27  ;;  %v3371_v30 = vld [vmem:[#allocation2 + $0x111] sm:$0xff]  ;;  %v3372_v27 = vld [vmem:[#allocation2 + $0x99] sm:$0xff] }
  0xf2   : > { %3130 = vmatprep.subr.bf16.mxu0 %v5168_v41 }
  0xf3   : > { %2288 = vmatmul.mubr.f32.gmra.mrb[82].mxu1 %v4364_v44 }
  0xf4   : > { %2023 = vmatmul.mubr.f32.gmra.mrb[18].mxu0 %v4603_v13  ;;  %2292 = vmatprep.mubr.f32.mxu1 %v3369_v20 }
  0xf5   : > { %2027 = vmatprep.mubr.f32.mxu0 %v4242_v59  ;;  %3132 = vmatpush1.bf16.msra.mxu0 %v4180_v36  ;;  %v3373_v59 = vld [vmem:[#allocation2 + $0x121] sm:$0xff] }
  0xf6   : > { %3133 = vmatprep.subr.bf16.mxu0 %v5168_v41 }
  0xf7   : > { %2293 = vmatmul.mubr.f32.gmra.mrb[84].mxu1 %v4373_v25  ;;  %v3374_v25 = vld [vmem:[#allocation2 + $0x8] sm:$0xff] }
  0xf8   : > { %2028 = vmatmul.mubr.f32.gmra.mrb[20].mxu0 %v3370_v21  ;;  %2297 = vmatprep.mubr.f32.mxu1 %v3371_v30  ;;  %v5190_v21 = vld [vmem:[#allocation22_spill] sm:$0xff] }
  0xf9   : > { %2032 = vmatprep.mubr.f32.mxu0 %v4267_v35  ;;  %3135 = vmatpush1.bf16.msra.mxu0 %v4205_v39  ;;  %v5178_v39 = vld [vmem:[#allocation10_spill] sm:$0xff]  ;;  %v5182_v35 = vld [vmem:[#allocation11_spill] sm:$0xff] }
  0xfa   : > { %3136 = vmatprep.subr.bf16.mxu0 %v5168_v41 }
  0xfb   : > { %2298 = vmatmul.mubr.f32.gmra.mrb[86].mxu1 %v4382_v19 }
  0xfc   : > { %2033 = vmatmul.mubr.f32.gmra.mrb[22].mxu0 %v3372_v27  ;;  %2302 = vmatprep.mubr.f32.mxu1 %v3373_v59 }
  0xfd   : > { %2037 = vmatprep.mubr.f32.mxu0 %v4293_v53  ;;  %3138 = vmatpush1.bf16.msra.mxu0 %v4230_v46  ;;  %v5180_v46 = vld [vmem:[#allocation6_spill] sm:$0xff] }
  0xfe   : > { %3139 = vmatprep.subr.bf16.mxu0 %v5168_v41 }
  0xff   : > { %2303 = vmatmul.mubr.f32.gmra.mrb[88].mxu1 %v4391_v3  ;;  %v5169_v3 = vld [vmem:[#allocation7_spill] sm:$0xff] }
 0x100   : > { %2038 = vmatmul.mubr.f32.gmra.mrb[24].mxu0 %v4497_v16  ;;  %2307 = vmatprep.mubr.f32.mxu1 %v3925_v2  ;;  %v5170_v2 = vld [vmem:[#allocation15_spill] sm:$0xff] }
 0x101   : > { %2042 = vmatprep.mubr.f32.mxu0 %v4325_v60  ;;  %3141 = vmatpush1.bf16.msra.mxu0 %v4254_v8  ;;  %v5181_v8 = vmax.f32 %v5180_v46, 0.0 }
 0x102   : > { %3142 = vmatprep.subr.bf16.mxu0 %v5168_v41 }
 0x103   : > { %2308 = vmatmul.mubr.f32.gmra.mrb[90].mxu1 %v4400_v31  ;;  %v5175_v31 = vld [vmem:[#allocation19_spill] sm:$0xff] }
 0x104   : > { %2043 = vmatmul.mubr.f32.gmra.mrb[26].mxu0 %v4515_v42  ;;  %2312 = vmatprep.mubr.f32.mxu1 %v3934_v32  ;;  %v5171_v32 = vld [vmem:[#allocation8_spill] sm:$0xff] }
 0x105   : > { %2047 = vmatprep.mubr.f32.mxu0 %v4341_v26  ;;  %3144 = vmatpush1.bf16.msra.mxu0 %v4279_v38  ;;  %v933_v38 = vld [vmem:[#allocation2 + $0x199] sm:$0xff]  ;;  %v5184_v26 = vld [vmem:[#allocation12_spill] sm:$0xff] }
 0x106   : > { %3145 = vmatprep.subr.bf16.mxu0 %v5168_v41 }
 0x107   : > { %2313 = vmatmul.mubr.f32.gmra.mrb[92].mxu1 %v4409_v50  ;;  %v5174_v50 = vld [vmem:[#allocation9_spill] sm:$0xff] }
 0x108   : > { %2048 = vmatmul.mubr.f32.gmra.mrb[28].mxu0 %v4531_v24  ;;  %2317 = vmatprep.mubr.f32.mxu1 %v3945_v12  ;;  %v5173_v12 = vld [vmem:[#allocation4_spill] sm:$0xff] }
 0x109   : > { %2052 = vmatprep.mubr.f32.mxu0 %v4353_v51  ;;  %3147 = vmatpush1.bf16.msra.mxu0 %v4305_v10  ;;  %v5183_v10 = vld [vmem:[#allocation23_spill] sm:$0xff]  ;;  %v5187_v24 = vld [vmem:[#allocation16_spill] sm:$0xff] }
 0x10a   : > { %3148 = vmatprep.subr.bf16.mxu0 %v5168_v41  ;;  %v5186_v41 = vld [vmem:[#allocation14_spill] sm:$0xff] }
 0x10b   : > { %2318 = vmatmul.mubr.f32.gmra.mrb[94].mxu1 %v4418_v37  ;;  %v3375_v37 = vld [vmem:[#allocation2 + $0x129] sm:$0xff] }
 0x10c   : > { %2053 = vmatmul.mubr.f32.gmra.mrb[30].mxu0 %v4547_v9  ;;  %2322 = vmatprep.mubr.f32.mxu1 %v3967_v52  ;;  %v5172_v52 = vld [vmem:[#allocation17_spill] sm:$0xff]  ;;  %v972_v9 = vld [vmem:[#allocation2 + $0x6a] sm:$0xff] }
 0x10d   : > { %2057 = vmatprep.mubr.f32.mxu0 %v4362_v55  ;;  %3150 = vmatpush1.bf16.msra.mxu0 %v4331_v11  ;;  %v869_v11 = vld [vmem:[#allocation2 + $0x198] sm:$0xff] }
 0x10e   : > { %v5185_v55 = vld [vmem:[#allocation13_spill] sm:$0xff] }
 0x10f   : > { %2323 = vmatmul.mubr.f32.gmra.mrb[96].mxu1 %v4426_v22  ;;  %v969_v22 = vld [vmem:[#allocation2 + $0x4a] sm:$0xff] }
 0x110   : > { %2058 = vmatmul.mubr.f32.gmra.mrb[32].mxu0 %v4563_v14  ;;  %2327 = vmatprep.mubr.f32.mxu1 %v3978_v6  ;;  %v5176_v6 = vld [vmem:[#allocation5_spill] sm:$0xff] }
 0x111   : > { %2062 = vmatprep.mubr.f32.mxu0 %v5169_v3  ;;  %v5177_v36 = vmax.f32 %v5176_v6, 0.0  ;;  %v3378_v14 = vld [vmem:[#allocation2 + $0x151] sm:$0xff]  ;;  %v3380_v3 = vld [vmem:[#allocation2 + $0x169] sm:$0xff] }
 0x112   : > { %v3381_v6 = vld [vmem:[#allocation2 + $0x171] sm:$0xff] }
 0x113   : > { %2328 = vmatmul.mubr.f32.gmra.mrb[98].mxu1 %v5170_v2  ;;  %v978_v2 = vld [vmem:[#allocation2 + $0xb2] sm:$0xff] }
 0x114   : > { %2063 = vmatmul.mubr.f32.gmra.mrb[34].mxu0 %v4579_v61  ;;  %2332 = vmatprep.mubr.f32.mxu1 %v3991_v58  ;;  %v5179_v58 = vld [vmem:[#allocation21_spill] sm:$0xff] }
 0x115   : > { %2067 = vmatprep.mubr.f32.mxu0 %v5171_v32  ;;  %v5191_v32 = vld [vmem:[#allocation24_spill] sm:$0xff] }
 0x117   : > { %2333 = vmatmul.mubr.f32.gmra.mrb[100].mxu1 %v5172_v52  ;;  %v979_v52 = vld [vmem:[#allocation2 + $0xc2] sm:$0xff] }
 0x118   : > { %2068 = vmatmul.mubr.f32.gmra.mrb[36].mxu0 %v4589_v56  ;;  %2337 = vmatprep.mubr.f32.mxu1 %v5173_v12  ;;  %v4691_v12 = vld [vmem:[#allocation2 + $0x182] sm:$0xff] }
 0x119   : > { %2072 = vmatprep.mubr.f32.mxu0 %v5174_v50 }
 0x11b   : > { %2338 = vmatmul.mubr.f32.gmra.mrb[102].mxu1 %v5175_v31 }
 0x11c   : > { %2073 = vmatmul.mubr.f32.gmra.mrb[38].mxu0 %v4599_v15  ;;  %2342 = vmatprep.mubr.f32.mxu1 %v5177_v36  ;;  %v3379_v15 = vld [vmem:[#allocation2 + $0x159] sm:$0xff]  ;;  %v980_v36 = vld [vmem:[#allocation2 + $0xca] sm:$0xff] }
 0x11d   : > { %2077 = vmatprep.mubr.f32.mxu0 %v5178_v39  ;;  %v981_v39 = vld [vmem:[#allocation2 + $0xda] sm:$0xff] }
 0x11f   : > { %2343 = vmatmul.mubr.f32.gmra.mrb[104].mxu1 %v5179_v58  ;;  %v4696_v58 = vld [vmem:[#allocation2 + $0x18a] sm:$0xff] }
 0x120   : > { %2078 = vmatmul.mubr.f32.gmra.mrb[40].mxu0 %v3369_v20  ;;  %2347 = vmatprep.mubr.f32.mxu1 %v5181_v8  ;;  %v976_v20 = vld [vmem:[#allocation2 + $0x9a] sm:$0xff] }
 0x121   : > { %2082 = vmatprep.mubr.f32.mxu0 %v5182_v35  ;;  %v3382_v35 = vld [vmem:[#allocation2 + $0x181] sm:$0xff] }
 0x122   : > { %v4664_v53 = vpop.f32.mrb[0].mxu1 }
 0x123   : > { %2348 = vmatmul.mubr.f32.gmra.mrb[106].mxu1 %v5183_v10  ;;  %v1531_v60 = vpop.f32.mrb[1].mxu1  ;;  %v983_v10 = vld [vmem:[#allocation2 + $0xf2] sm:$0xff] }
 0x124   : > { %2083 = vmatmul.mubr.f32.gmra.mrb[42].mxu0 %v3371_v30  ;;  %2352 = vmatprep.mubr.f32.mxu1 %v933_v38  ;;  %v977_v30 = vld [vmem:[#allocation2 + $0xaa] sm:$0xff]  ;;  %v982_v38 = vld [vmem:[#allocation2 + $0xe2] sm:$0xff] }
 0x125   : > { %2087 = vmatprep.mubr.f32.mxu0 %v5184_v26 }
 0x126   : > { %v4668_v51 = vpop.f32.mrb[2].mxu1 }
 0x127   : > { %2353 = vmatmul.mubr.f32.gmra.mrb[108].mxu1 %v869_v11  ;;  %v1536_v62 = vpop.f32.mrb[3].mxu1 }
 0x128   : > { %2088 = vmatmul.mubr.f32.gmra.mrb[44].mxu0 %v3373_v59  ;;  %2357 = vmatprep.mubr.f32.mxu1 %v934_v34  ;;  %v3383_v34 = vld [vmem:[#allocation2 + $0x189] sm:$0xff]  ;;  %v984_v62 = vld [vmem:[#allocation2 + $0xfa] sm:$0xff] }
 0x129   : > { %2092 = vmatprep.mubr.f32.mxu0 %v5185_v55 }
 0x12a   : > { %v4671_v44 = vpop.f32.mrb[4].mxu1 }
 0x12b   : > { %2358 = vmatmul.mubr.f32.gmra.mrb[110].mxu1 %v3374_v25  ;;  %v1541_v19 = vpop.f32.mrb[5].mxu1  ;;  %v839_v25 = vld [vmem:[#allocation2 + $0x30] sm:$0xff] }
 0x12c   : > { %2093 = vmatmul.mubr.f32.gmra.mrb[46].mxu0 %v3375_v37  ;;  %2911 = vmatprep.mubr.f32.mxu1 %v4492_v29  ;;  %v3377_v29 = vld [vmem:[#allocation2 + $0x141] sm:$0xff]  ;;  %v985_v19 = vld [vmem:[#allocation2 + $0x10a] sm:$0xff] }
 0x12d   : > { %2097 = vmatprep.mubr.f32.mxu0 %v5186_v41 }
 0x12e   : > { %v4675_v16 = vpop.f32.mrb[6].mxu1 }
 0x12f   : > { %2912 = vmatmul.mubr.f32.vlgmr.msra.gmra.mrb[112].mxu1 %v4510_v7  ;;  %v1546_v42 = vpop.f32.mrb[7].mxu1 }
 0x130   : > { %2098 = vmatmul.mubr.f32.gmra.mrb[48].mxu0 %v3376_v1  ;;  %2914 = vmatprep.mubr.f32.mxu1 %v969_v22  ;;  %v986_v42 = vld [vmem:[#allocation2 + $0x112] sm:$0xff] }
 0x131   : > { %2102 = vmatprep.mubr.f32.mxu0 %v5187_v24  ;;  %v840_v1 = vld [vmem:[#allocation2 + $0x38] sm:$0xff] }
 0x132   : > { %v4679_v63 = vpop.f32.mrb[8].mxu1 }
 0x133   : > { %2915 = vmatmul.mubr.f32.gmra.mrb[114].mxu1 %v970_v49  ;;  %v1551_v47 = vpop.f32.mrb[9].mxu1 }
 0x134   : > { %2103 = vmatmul.mubr.f32.gmra.mrb[50].mxu0 %v3377_v29  ;;  %2917 = vmatprep.mubr.f32.mxu1 %v971_v4 }
 0x135   : > { %2107 = vmatprep.mubr.f32.mxu0 %v5188_v33 }
 0x136   : > { %v4682_v7 = vpop.f32.mrb[10].mxu1 }
 0x137   : > { %2918 = vmatmul.mubr.f32.gmra.mrb[116].mxu1 %v972_v9  ;;  %v1556_v45 = vpop.f32.mrb[11].mxu1 }
 0x138   : > { %2108 = vmatmul.mubr.f32.gmra.mrb[52].mxu0 %v3378_v14  ;;  %2920 = vmatprep.mubr.f32.mxu1 %v973_v0 }
 0x139   : > { %2112 = vmatprep.mubr.f32.mxu0 %v5189_v54 }
 0x13a   : > { %v4685_v61 = vpop.f32.mrb[12].mxu1 }
 0x13b   : > { %2921 = vmatmul.mubr.f32.gmra.mrb[118].mxu1 %v974_v57  ;;  %v1561_v56 = vpop.f32.mrb[13].mxu1  ;;  %v846_v57 = vld [vmem:[#allocation2 + $0x80] sm:$0xff] }
 0x13c   : > { %2113 = vmatmul.mubr.f32.gmra.mrb[54].mxu0 %v3379_v15  ;;  %2923 = vmatprep.mubr.f32.mxu1 %v975_v43 }
 0x13d   : > { %2117 = vmatprep.mubr.f32.mxu0 %v5190_v21 }
 0x13e   : > { %v4688_v27 = vpop.f32.mrb[14].mxu1 }
 0x13f   : > { %2924 = vmatmul.mubr.f32.gmra.mrb[120].mxu1 %v976_v20  ;;  %v1566_v59 = vpop.f32.mrb[15].mxu1 }
 0x140   : > { %2118 = vmatmul.mubr.f32.gmra.mrb[56].mxu0 %v3380_v3  ;;  %2926 = vmatprep.mubr.f32.mxu1 %v977_v30 }
 0x141   : > { %2122 = vmatprep.mubr.f32.mxu0 %v5191_v32 }
 0x142   : > { %v4693_v50 = vpop.f32.mrb[16].mxu1 }
 0x143   : > { %2927 = vmatmul.mubr.f32.gmra.mrb[122].mxu1 %v978_v2  ;;  %v1571_v31 = vpop.f32.mrb[17].mxu1 }
 0x144   : > { %2123 = vmatmul.mubr.f32.gmra.mrb[58].mxu0 %v3381_v6  ;;  %2929 = vmatprep.mubr.f32.mxu1 %v979_v52 }
 0x145   : > { %2127 = vmatprep.mubr.f32.mxu0 %v4691_v12 }
 0x146   : > { %v4698_v46 = vpop.f32.mrb[18].mxu1 }
 0x147   : > { %2930 = vmatmul.mubr.f32.gmra.mrb[124].mxu1 %v980_v36  ;;  %v1576_v8 = vpop.f32.mrb[19].mxu1 }
 0x148   : > { %2128 = vmatmul.mubr.f32.gmra.mrb[60].mxu0 %v3382_v35  ;;  %2932 = vmatprep.mubr.f32.mxu1 %v981_v39 }
 0x149   : > { %2132 = vmatprep.mubr.f32.mxu0 %v4696_v58 }
 0x14a   : > { %v4701_v60 = vpop.f32.mrb[20].mxu1 }
 0x14b   : > { %2933 = vmatmul.mubr.f32.gmra.mrb[126].mxu1 %v982_v38  ;;  %v1581_v11 = vpop.f32.mrb[21].mxu1 }
 0x14c   : > { %2133 = vmatmul.mubr.f32.gmra.mrb[62].mxu0 %v3383_v34  ;;  %2935 = vmatprep.mubr.f32.mxu1 %v983_v10 }
 0x14d   : > { %2202 = vmatprep.mubr.f32.mxu0 %v4507_v28  ;;  %v841_v28 = vld [vmem:[#allocation2 + $0x48] sm:$0xff] }
 0x14e   : > { %v4704_v37 = vpop.f32.mrb[22].mxu1 }
 0x14f   : > { %2936 = vmatmul.mubr.f32.gmra.mrb[128].mxu1 %v984_v62  ;;  %v1586_v22 = vpop.f32.mrb[23].mxu1 }
 0x150   : > { %2203 = vmatmul.mubr.f32.vlgmr.msra.gmra.mrb[0].mxu0 %v839_v25  ;;  %2938 = vmatprep.mubr.f32.mxu1 %v985_v19 }
 0x151   : > { %2207 = vmatprep.mubr.f32.mxu0 %v4525_v17  ;;  %v842_v17 = vld [vmem:[#allocation2 + $0x50] sm:$0xff] }
 0x152   : > { %v4707_v49 = vpop.f32.mrb[24].mxu1 }
 0x153   : > { %2939 = vmatmul.mubr.f32.gmra.mrb[130].mxu1 %v986_v42  ;;  %v1591_v4 = vpop.f32.mrb[25].mxu1 }
 0x154   : > { %2208 = vmatmul.mubr.f32.gmra.mrb[2].mxu0 %v840_v1  ;;  %2941 = vmatprep.mubr.f32.mxu1 %v5184_v26 }
 0x155   : > { %2212 = vmatprep.mubr.f32.mxu0 %v4541_v23  ;;  %v843_v23 = vld [vmem:[#allocation2 + $0x60] sm:$0xff] }
 0x156   : > { %v4711_v47 = vpop.f32.mrb[26].mxu1 }
 0x157   : > { %2942 = vmatmul.mubr.f32.gmra.mrb[132].mxu1 %v5185_v55  ;;  %v1596_v29 = vpop.f32.mrb[27].mxu1 }
 0x158   : > { %2213 = vmatmul.mubr.f32.gmra.mrb[4].mxu0 %v841_v28  ;;  %2944 = vmatprep.mubr.f32.mxu1 %v5186_v41 }
 0x159   : > { %2217 = vmatprep.mubr.f32.mxu0 %v4557_v5  ;;  %v844_v5 = vld [vmem:[#allocation2 + $0x68] sm:$0xff] }
 0x15a   : > { %v4716_v9 = vpop.f32.mrb[28].mxu1 }
 0x15b   : > { %2945 = vmatmul.mubr.f32.gmra.mrb[134].mxu1 %v5187_v24  ;;  %v1601_v0 = vpop.f32.mrb[29].mxu1 }
 0x15c   : > { %2218 = vmatmul.mubr.f32.gmra.mrb[6].mxu0 %v842_v17  ;;  %2947 = vmatprep.mubr.f32.mxu1 %v5188_v33  ;;  %v997_v33 = vld [vmem:[#allocation2 + $0x19a] sm:$0xff] }
 0x15d   : > { %2222 = vmatprep.mubr.f32.mxu0 %v4573_v18  ;;  %v845_v18 = vld [vmem:[#allocation2 + $0x78] sm:$0xff] }
 0x15e   : > { %v4721_v26 = vpop.f32.mrb[30].mxu1 }
 0x15f   : > { %2948 = vmatmul.mubr.f32.gmra.mrb[136].mxu1 %v5189_v54  ;;  %v1606_v55 = vpop.f32.mrb[31].mxu1 }
 0x160   : > { %2223 = vmatmul.mubr.f32.gmra.mrb[8].mxu0 %v843_v23  ;;  %2950 = vmatprep.mubr.f32.mxu1 %v5190_v21 }
 0x161   : > { %2227 = vmatprep.mubr.f32.mxu0 %v4583_v40  ;;  %v998_v40 = vld [vmem:[#allocation2 + $0x1a2] sm:$0xff] }
 0x162   : > { %v4726_v41 = vpop.f32.mrb[32].mxu1 }
 0x163   : > { %2951 = vmatmul.mubr.f32.gmra.mrb[138].mxu1 %v5191_v32  ;;  %v1611_v24 = vpop.f32.mrb[33].mxu1 }
 0x164   : > { %2228 = vmatmul.mubr.f32.gmra.mrb[10].mxu0 %v844_v5  ;;  %2953 = vmatprep.mubr.f32.mxu1 %v4691_v12 }
 0x165   : > { %2232 = vmatprep.mubr.f32.mxu0 %v4593_v48 }
 0x166   : > { %v4731_v45 = vpop.f32.mrb[34].mxu1 }
 0x167   : > { %2954 = vmatmul.mubr.f32.gmra.mrb[140].mxu1 %v4696_v58  ;;  %v1616_v14 = vpop.f32.mrb[35].mxu1 }
 0x168   : > { %2233 = vmatmul.mubr.f32.gmra.mrb[12].mxu0 %v845_v18  ;;  %2956 = vmatprep.mubr.f32.mxu1 %v997_v33 }
 0x169   : > { %2237 = vmatprep.mubr.f32.mxu0 %v4603_v13 }
 0x16a   : > { %v4735_v54 = vpop.f32.mrb[36].mxu1 }
 0x16b   : > { %2957 = vmatmul.mubr.f32.gmra.mrb[142].mxu1 %v998_v40  ;;  %v1621_v43 = vpop.f32.mrb[37].mxu1 }
 0x16c   : > { %2238 = vmatmul.mubr.f32.gmra.mrb[14].mxu0 %v846_v57 }
 0x16e   : > { %v4737_v56 = vpop.f32.mrb[38].mxu1 }
 0x16f   : > { %v1626_v48 = vpop.f32.mrb[39].mxu1 }
 0x172   : > { %v4739_v15 = vpop.f32.mrb[40].mxu1 }
 0x173   : > { %v1631_v20 = vpop.f32.mrb[41].mxu1 }
 0x176   : > { %v4741_v21 = vpop.f32.mrb[42].mxu1 }
 0x177   : > { %v1636_v30 = vpop.f32.mrb[43].mxu1 }
 0x17a   : > { %v4743_v59 = vpop.f32.mrb[44].mxu1 }
 0x17b   : > { %v1641_v3 = vpop.f32.mrb[45].mxu1 }
 0x17e   : > { %v4745_v2 = vpop.f32.mrb[46].mxu1 }
 0x17f   : > { %v1646_v13 = vpop.f32.mrb[47].mxu1 }
 0x182   : > { %v4747_v32 = vpop.f32.mrb[48].mxu1 }
 0x183   : > { %v1651_v52 = vpop.f32.mrb[49].mxu1 }
 0x186   : > { %v4749_v12 = vpop.f32.mrb[50].mxu1 }
 0x187   : > { %v1656_v31 = vpop.f32.mrb[51].mxu1 }
 0x18a   : > { %v4751_v6 = vpop.f32.mrb[52].mxu1 }
 0x18b   : > { %v1661_v36 = vpop.f32.mrb[53].mxu1 }
 0x18e   : > { %v4753_v39 = vpop.f32.mrb[54].mxu1 }
 0x18f   : > { %v1666_v58 = vpop.f32.mrb[55].mxu1 }
 0x192   : > { %v4755_v8 = vpop.f32.mrb[56].mxu1 }
 0x193   : > { %v1671_v35 = vpop.f32.mrb[57].mxu1 }
 0x196   : > { %v4757_v38 = vpop.f32.mrb[58].mxu1 }
 0x197   : > { %v1676_v10 = vpop.f32.mrb[59].mxu1 }
 0x19a   : > { %v4759_v11 = vpop.f32.mrb[60].mxu1 }
 0x19b   : > { %v1681_v34 = vpop.f32.mrb[61].mxu1 }
 0x19e   : > { %v4761_v62 = vpop.f32.mrb[62].mxu1 }
 0x19f   : > { %v1686_v25 = vpop.f32.mrb[63].mxu1 }
 0x1a2   : > { %v2244_v19 = vpop.f32.mrb[64].mxu1 }
 0x1a3   : > { %v2246_v22 = vpop.f32.mrb[65].mxu1 }
 0x1a6   : > { %v2249_v42 = vpop.f32.mrb[66].mxu1 }
 0x1a7   : > { %v2251_v1 = vpop.f32.mrb[67].mxu1 }
 0x1aa   : > { %v2254_v4 = vpop.f32.mrb[68].mxu1 }
 0x1ab   : > { %v2256_v28 = vpop.f32.mrb[69].mxu1 }
 0x1ae   : > { %v2259_v29 = vpop.f32.mrb[70].mxu1 }
 0x1af   : > { %v2261_v17 = vpop.f32.mrb[71].mxu1 }
 0x1b2   : > { %v2264_v0 = vpop.f32.mrb[72].mxu1 }
 0x1b3   : > { %v2266_v23 = vpop.f32.mrb[73].mxu1 }
 0x1b6   : > { %v2269_v55 = vpop.f32.mrb[74].mxu1 }
 0x1b7   : > { %v2271_v5 = vpop.f32.mrb[75].mxu1 }
 0x1ba   : > { %v2274_v24 = vpop.f32.mrb[76].mxu1 }
 0x1bb   : > { %v2276_v18 = vpop.f32.mrb[77].mxu1 }
 0x1be   : > { %v2279_v33 = vpop.f32.mrb[78].mxu1 }
 0x1bf   : > { %v2281_v14 = vpop.f32.mrb[79].mxu1 }
 0x1c2   : > { %v2284_v40 = vpop.f32.mrb[80].mxu1 }
 0x1c3   : > { %v2019_v57 = vpop.f32.mrb[16].mxu0  ;;  %v2286_v43 = vpop.f32.mrb[81].mxu1 }
 0x1c4   : > { %v3223_v48 = vadd.f32 %v2019_v57, %v4693_v50  ;;  %v2021_v20 = vpop.f32.mrb[17].mxu0 }
 0x1c6   : > { %v4764_v30 = vadd.f32 %v3223_v48, %v2244_v19  ;;  %v2289_v3 = vpop.f32.mrb[82].mxu1 }
 0x1c7   : > { %v2024_v13 = vpop.f32.mrb[18].mxu0  ;;  %v2291_v52 = vpop.f32.mrb[83].mxu1 }
 0x1c8   : > { %v3225_v31 = vadd.f32 %v2024_v13, %v4698_v46  ;;  %v2026_v36 = vpop.f32.mrb[19].mxu0 }
 0x1ca   : > { %v4767_v58 = vadd.f32 %v3225_v31, %v2249_v42  ;;  %v2294_v35 = vpop.f32.mrb[84].mxu1 }
 0x1cb   : > { %v2029_v10 = vpop.f32.mrb[20].mxu0  ;;  %v2296_v34 = vpop.f32.mrb[85].mxu1 }
 0x1cc   : > { %v3227_v25 = vadd.f32 %v2029_v10, %v4701_v60  ;;  %v2031_v22 = vpop.f32.mrb[21].mxu0 }
 0x1ce   : > { %v4770_v1 = vadd.f32 %v3227_v25, %v2254_v4  ;;  %v2299_v50 = vpop.f32.mrb[86].mxu1 }
 0x1cf   : > { %v2034_v28 = vpop.f32.mrb[22].mxu0  ;;  %v2301_v19 = vpop.f32.mrb[87].mxu1 }
 0x1d0   : > { %v3229_v17 = vadd.f32 %v2034_v28, %v4704_v37  ;;  %v2036_v23 = vpop.f32.mrb[23].mxu0 }
 0x1d2   : > { %v4773_v5 = vadd.f32 %v3229_v17, %v2259_v29  ;;  %v2304_v46 = vpop.f32.mrb[88].mxu1 }
 0x1d3   : > { %v2039_v18 = vpop.f32.mrb[24].mxu0  ;;  %v2306_v42 = vpop.f32.mrb[89].mxu1 }
 0x1d4   : > { %v3231_v14 = vadd.f32 %v2039_v18, %v4707_v49  ;;  %v2041_v57 = vpop.f32.mrb[25].mxu0 }
 0x1d6   : > { %v4776_v43 = vadd.f32 %v3231_v14, %v2264_v0  ;;  %v2309_v60 = vpop.f32.mrb[90].mxu1 }
 0x1d7   : > { %v2044_v48 = vpop.f32.mrb[26].mxu0  ;;  %v2311_v4 = vpop.f32.mrb[91].mxu1 }
 0x1d8   : > { %v3233_v20 = vadd.f32 %v2044_v48, %v4711_v47  ;;  %v2046_v13 = vpop.f32.mrb[27].mxu0 }
 0x1da   : > { %v4779_v52 = vadd.f32 %v3233_v20, %v2269_v55  ;;  %v2314_v37 = vpop.f32.mrb[92].mxu1 }
 0x1db   : > { %v2049_v31 = vpop.f32.mrb[28].mxu0  ;;  %v2316_v29 = vpop.f32.mrb[93].mxu1 }
 0x1dc   : > { %v3235_v36 = vadd.f32 %v2049_v31, %v4716_v9  ;;  %v2051_v10 = vpop.f32.mrb[29].mxu0 }
 0x1de   : > { %v4782_v34 = vadd.f32 %v3235_v36, %v2274_v24  ;;  %v2319_v49 = vpop.f32.mrb[94].mxu1 }
 0x1df   : > { %v2054_v25 = vpop.f32.mrb[30].mxu0  ;;  %v2321_v0 = vpop.f32.mrb[95].mxu1 }
 0x1e0   : > { %v3237_v22 = vadd.f32 %v2054_v25, %v4721_v26  ;;  %v2056_v28 = vpop.f32.mrb[31].mxu0 }
 0x1e2   : > { %v4785_v19 = vadd.f32 %v3237_v22, %v2279_v33  ;;  %v2324_v47 = vpop.f32.mrb[96].mxu1 }
 0x1e3   : > { %v2059_v17 = vpop.f32.mrb[32].mxu0  ;;  %v2326_v55 = vpop.f32.mrb[97].mxu1 }
 0x1e4   : > { %v3239_v23 = vadd.f32 %v2059_v17, %v4726_v41  ;;  %v2061_v18 = vpop.f32.mrb[33].mxu0 }
 0x1e6   : > { %v4788_v42 = vadd.f32 %v3239_v23, %v2284_v40  ;;  %v2329_v9 = vpop.f32.mrb[98].mxu1 }
 0x1e7   : > { %v2064_v14 = vpop.f32.mrb[34].mxu0  ;;  %v2331_v24 = vpop.f32.mrb[99].mxu1 }
 0x1e8   : > { %v3241_v57 = vadd.f32 %v2064_v14, %v4731_v45  ;;  %v2066_v48 = vpop.f32.mrb[35].mxu0 }
 0x1ea   : > { %v4791_v4 = vadd.f32 %v3241_v57, %v2289_v3  ;;  %v2334_v26 = vpop.f32.mrb[100].mxu1 }
 0x1eb   : > { %v2069_v20 = vpop.f32.mrb[36].mxu0  ;;  %v2336_v33 = vpop.f32.mrb[101].mxu1 }
 0x1ec   : > { %v3243_v13 = vadd.f32 %v2069_v20, %v4735_v54  ;;  %v2071_v31 = vpop.f32.mrb[37].mxu0 }
 0x1ee   : > { %v4794_v29 = vadd.f32 %v3243_v13, %v2294_v35  ;;  %v2339_v41 = vpop.f32.mrb[102].mxu1 }
 0x1ef   : > { %v2074_v36 = vpop.f32.mrb[38].mxu0  ;;  %v2341_v40 = vpop.f32.mrb[103].mxu1 }
 0x1f0   : > { %v3245_v10 = vadd.f32 %v2074_v36, %v4737_v56  ;;  %v2076_v25 = vpop.f32.mrb[39].mxu0 }
 0x1f2   : > { %v4797_v0 = vadd.f32 %v3245_v10, %v2299_v50  ;;  %v2344_v45 = vpop.f32.mrb[104].mxu1 }
 0x1f3   : > { %v2079_v22 = vpop.f32.mrb[40].mxu0  ;;  %v2346_v3 = vpop.f32.mrb[105].mxu1 }
 0x1f4   : > { %v3247_v28 = vadd.f32 %v2079_v22, %v4739_v15  ;;  %v2081_v17 = vpop.f32.mrb[41].mxu0 }
 0x1f6   : > { %v4800_v55 = vadd.f32 %v3247_v28, %v2304_v46  ;;  %v4802_v54 = vpop.f32.mrb[106].mxu1 }
 0x1f7   : > { %v2084_v35 = vpop.f32.mrb[42].mxu0  ;;  %v2351_v23 = vpop.f32.mrb[107].mxu1 }
 0x1f8   : > { %v3249_v18 = vadd.f32 %v2084_v35, %v4741_v21  ;;  %v2086_v14 = vpop.f32.mrb[43].mxu0 }
 0x1fa   : > { %v4805_v24 = vpop.f32.mrb[108].mxu1  ;;  %v4807_v56 = vadd.f32 %v3249_v18, %v2309_v60 }
 0x1fb   : > { %v2089_v50 = vpop.f32.mrb[44].mxu0  ;;  %v2356_v57 = vpop.f32.mrb[109].mxu1 }
 0x1fc   : > { %v3251_v48 = vadd.f32 %v2089_v50, %v4743_v59  ;;  %v2091_v20 = vpop.f32.mrb[45].mxu0 }
 0x1fe   : > { %v4810_v15 = vpop.f32.mrb[110].mxu1  ;;  %v4812_v46 = vadd.f32 %v3251_v48, %v2314_v37 }
 0x1ff   : > { %v2094_v33 = vpop.f32.mrb[46].mxu0  ;;  %v2361_v13 = vpop.f32.mrb[111].mxu1 }
 0x200   : > { %v3253_v31 = vadd.f32 %v2094_v33, %v4745_v2  ;;  %v2096_v36 = vpop.f32.mrb[47].mxu0 }
 0x202   : > { %v4815_v21 = vpop.f32.mrb[112].mxu1  ;;  %v4817_v40 = vadd.f32 %v3253_v31, %v2319_v49 }
 0x203   : > { %v2099_v60 = vpop.f32.mrb[48].mxu0  ;;  %v4819_v10 = vpop.f32.mrb[113].mxu1 }
 0x204   : > { %v3255_v25 = vadd.f32 %v2099_v60, %v4747_v32  ;;  %v2101_v59 = vpop.f32.mrb[49].mxu0 }
 0x206   : > { %v4822_v22 = vpop.f32.mrb[114].mxu1  ;;  %v4824_v3 = vadd.f32 %v3255_v25, %v2324_v47 }
 0x207   : > { %v2104_v37 = vpop.f32.mrb[50].mxu0  ;;  %v4826_v28 = vpop.f32.mrb[115].mxu1 }
 0x208   : > { %v3257_v2 = vadd.f32 %v2104_v37, %v4749_v12  ;;  %v2106_v17 = vpop.f32.mrb[51].mxu0 }
 0x20a   : > { %v4829_v35 = vpop.f32.mrb[116].mxu1  ;;  %v4831_v49 = vadd.f32 %v3257_v2, %v2329_v9 }
 0x20b   : > { %v2109_v23 = vpop.f32.mrb[52].mxu0  ;;  %v4833_v18 = vpop.f32.mrb[117].mxu1 }
 0x20c   : > { %v3259_v32 = vadd.f32 %v2109_v23, %v4751_v6  ;;  %v2111_v14 = vpop.f32.mrb[53].mxu0 }
 0x20e   : > { %v4836_v50 = vpop.f32.mrb[118].mxu1  ;;  %v4838_v47 = vadd.f32 %v3259_v32, %v2334_v26 }
 0x20f   : > { %v2114_v57 = vpop.f32.mrb[54].mxu0  ;;  %v4840_v48 = vpop.f32.mrb[119].mxu1 }
 0x210   : > { %v3261_v12 = vadd.f32 %v2114_v57, %v4753_v39  ;;  %v2116_v20 = vpop.f32.mrb[55].mxu0 }
 0x212   : > { %v2925_v6 = vpop.f32.mrb[120].mxu1  ;;  %v4850_v9 = vadd.f32 %v3261_v12, %v2339_v41 }
 0x213   : > { %v2119_v33 = vpop.f32.mrb[56].mxu0  ;;  %v4853_v26 = vadd.f32 %v4767_v58, %v2925_v6  ;;  %v2469_v13 = vpop.f32.mrb[121].mxu1 }
 0x214   : > { %v3263_v39 = vadd.f32 %v2119_v33, %v4755_v8  ;;  %v2121_v31 = vpop.f32.mrb[57].mxu0  ;;  %v4857_v36 = vadd.f32 %v4764_v30, %v2469_v13 }
 0x215   : > { %2597 = vst [vmem:[%s4848_s9 + $0x48] sm:$0xff] %v4853_v26 }
 0x216   : > { %2596 = vst [vmem:[%s4848_s9 + $0x40] sm:$0xff] %v4857_v36  ;;  %v2928_v60 = vpop.f32.mrb[122].mxu1  ;;  %v4863_v41 = vadd.f32 %v3263_v39, %v2344_v45 }
 0x217   : > { %v2124_v25 = vpop.f32.mrb[58].mxu0  ;;  %v4866_v58 = vadd.f32 %v4773_v5, %v2928_v60  ;;  %v2479_v59 = vpop.f32.mrb[123].mxu1 }
 0x218   : > { %v3265_v8 = vadd.f32 %v2124_v25, %v4757_v38  ;;  %v2126_v37 = vpop.f32.mrb[59].mxu0  ;;  %v4870_v30 = vadd.f32 %v4770_v1, %v2479_v59 }
 0x219   : > { %2599 = vst [vmem:[%s4848_s9 + $0x58] sm:$0xff] %v4866_v58 }
 0x21a   : > { %2598 = vst [vmem:[%s4848_s9 + $0x50] sm:$0xff] %v4870_v30  ;;  %v2931_v2 = vpop.f32.mrb[124].mxu1  ;;  %v4877_v45 = vadd.f32 %v3265_v8, %v4802_v54 }
 0x21b   : > { %v2129_v17 = vpop.f32.mrb[60].mxu0  ;;  %v4880_v5 = vadd.f32 %v4779_v52, %v2931_v2  ;;  %v2489_v23 = vpop.f32.mrb[125].mxu1 }
 0x21c   : > { %v3267_v38 = vadd.f32 %v2129_v17, %v4759_v11  ;;  %v2131_v32 = vpop.f32.mrb[61].mxu0  ;;  %v4884_v1 = vadd.f32 %v4776_v43, %v2489_v23 }
 0x21d   : > { %2601 = vst [vmem:[%s4848_s9 + $0x68] sm:$0xff] %v4880_v5 }
 0x21e   : > { %2600 = vst [vmem:[%s4848_s9 + $0x60] sm:$0xff] %v4884_v1  ;;  %v2934_v14 = vpop.f32.mrb[126].mxu1  ;;  %v4891_v54 = vadd.f32 %v3267_v38, %v4805_v24 }
 0x21f   : > { %v2134_v57 = vpop.f32.mrb[62].mxu0  ;;  %v4894_v52 = vadd.f32 %v4785_v19, %v2934_v14  ;;  %v2499_v12 = vpop.f32.mrb[127].mxu1 }
 0x220   : > { %v3269_v11 = vadd.f32 %v2134_v57, %v4761_v62  ;;  %v2136_v20 = vpop.f32.mrb[63].mxu0  ;;  %v4898_v43 = vadd.f32 %v4782_v34, %v2499_v12 }
 0x221   : > { %2603 = vst [vmem:[%s4848_s9 + $0x78] sm:$0xff] %v4894_v52 }
 0x222   : > { %2602 = vst [vmem:[%s4848_s9 + $0x70] sm:$0xff] %v4898_v43  ;;  %v2937_v24 = vpop.f32.mrb[128].mxu1  ;;  %v4905_v6 = vadd.f32 %v3269_v11, %v4810_v15 }
 0x223   : > { %v2204_v33 = vpop.f32.mrb[0].mxu0  ;;  %v4908_v19 = vadd.f32 %v4791_v4, %v2937_v24  ;;  %v2509_v13 = vpop.f32.mrb[129].mxu1 }
 0x224   : > { %v3215_v62 = vadd.f32 %v2204_v33, %v4664_v53  ;;  %v2206_v34 = vpop.f32.mrb[1].mxu0  ;;  %v4912_v39 = vadd.f32 %v4788_v42, %v2509_v13 }
 0x225   : > { %2605 = vst [vmem:[%s4848_s9 + $0x88] sm:$0xff] %v4908_v19 }
 0x226   : > { %v2430_v31 = vadd.f32 %v3215_v62, %v4819_v10  ;;  %2604 = vst [vmem:[%s4848_s9 + $0x80] sm:$0xff] %v4912_v39  ;;  %v2940_v15 = vpop.f32.mrb[130].mxu1 }
 0x227   : > { %v2209_v60 = vpop.f32.mrb[2].mxu0  ;;  %v4920_v4 = vadd.f32 %v4797_v0, %v2940_v15  ;;  %v2519_v25 = vpop.f32.mrb[131].mxu1 }
 0x228   : > { %2588 = vst [vmem:[%s4848_s9] sm:$0xff] %v2430_v31  ;;  %v3216_v53 = vadd.f32 %v2209_v60, %v4668_v51  ;;  %v2211_v59 = vpop.f32.mrb[3].mxu0  ;;  %v4925_v42 = vadd.f32 %v4794_v29, %v2519_v25  ;;  %v2657_v37 = vmul.f32 %v2430_v31, %v2430_v31 }
 0x229   : > { %2607 = vst [vmem:[%s4848_s9 + $0x98] sm:$0xff] %v4920_v4 }
 0x22a   : > { %v2435_v10 = vadd.f32 %v3216_v53, %v4815_v21  ;;  %2606 = vst [vmem:[%s4848_s9 + $0x90] sm:$0xff] %v4925_v42  ;;  %v2943_v8 = vpop.f32.mrb[132].mxu1 }
 0x22b   : > { %v2214_v0 = vpop.f32.mrb[4].mxu0  ;;  %v4933_v2 = vadd.f32 %v4807_v56, %v2943_v8  ;;  %v2529_v51 = vpop.f32.mrb[133].mxu1 }
 0x22c   : > { %2589 = vst [vmem:[%s4848_s9 + $0x8] sm:$0xff] %v2435_v10  ;;  %v2620_v17 = vadd.f32 %v2435_v10, %v2430_v31  ;;  %v2658_v23 = vmul.f32 %v2435_v10, %v2435_v10  ;;  %v3217_v29 = vadd.f32 %v2214_v0, %v4671_v44  ;;  %v2216_v38 = vpop.f32.mrb[5].mxu0  ;;  %v4938_v21 = vadd.f32 %v4800_v55, %v2529_v51 }
 0x22d   : > { %2609 = vst [vmem:[%s4848_s9 + $0xa8] sm:$0xff] %v4933_v2 }
 0x22e   : > { %v2689_v32 = vadd.f32 %v2658_v23, %v2657_v37  ;;  %v2440_v14 = vadd.f32 %v3217_v29, %v4826_v28  ;;  %2608 = vst [vmem:[%s4848_s9 + $0xa0] sm:$0xff] %v4938_v21  ;;  %v2946_v56 = vpop.f32.mrb[134].mxu1 }
 0x22f   : > { %v2219_v57 = vpop.f32.mrb[6].mxu0  ;;  %v4946_v12 = vadd.f32 %v4817_v40, %v2946_v56  ;;  %v2539_v44 = vpop.f32.mrb[135].mxu1 }
 0x230   : > { %2590 = vst [vmem:[%s4848_s9 + $0x10] sm:$0xff] %v2440_v14  ;;  %v2621_v11 = vadd.f32 %v2620_v17, %v2440_v14  ;;  %v2659_v20 = vmul.f32 %v2440_v14, %v2440_v14  ;;  %v3218_v55 = vadd.f32 %v2219_v57, %v4675_v16  ;;  %v2221_v24 = vpop.f32.mrb[7].mxu0  ;;  %v4951_v33 = vadd.f32 %v4812_v46, %v2539_v44 }
 0x231   : > { %2611 = vst [vmem:[%s4848_s9 + $0xb8] sm:$0xff] %v4946_v12 }
 0x232   : > { %v2690_v28 = vadd.f32 %v2689_v32, %v2659_v20  ;;  %v2445_v13 = vadd.f32 %v3218_v55, %v4822_v22  ;;  %2610 = vst [vmem:[%s4848_s9 + $0xb0] sm:$0xff] %v4951_v33  ;;  %v2949_v40 = vpop.f32.mrb[136].mxu1 }
 0x233   : > { %v2224_v62 = vpop.f32.mrb[8].mxu0  ;;  %v4959_v34 = vadd.f32 %v4831_v49, %v2949_v40  ;;  %v2549_v16 = vpop.f32.mrb[137].mxu1 }
 0x234   : > { %2591 = vst [vmem:[%s4848_s9 + $0x18] sm:$0xff] %v2445_v13  ;;  %v2622_v31 = vadd.f32 %v2621_v11, %v2445_v13  ;;  %v2660_v15 = vmul.f32 %v2445_v13, %v2445_v13  ;;  %v3219_v46 = vadd.f32 %v2224_v62, %v4679_v63  ;;  %v2226_v60 = vpop.f32.mrb[9].mxu0  ;;  %v4964_v25 = vadd.f32 %v4824_v3, %v2549_v16 }
 0x235   : > { %2613 = vst [vmem:[%s4848_s9 + $0xc8] sm:$0xff] %v4959_v34  ;;  %v2665_v62 = vmul.f32 %v4857_v36, %v4857_v36 }
 0x236   : > { %v2691_v22 = vadd.f32 %v2690_v28, %v2660_v15  ;;  %v2450_v53 = vadd.f32 %v3219_v46, %v4833_v18  ;;  %2612 = vst [vmem:[%s4848_s9 + $0xc0] sm:$0xff] %v4964_v25  ;;  %v2952_v49 = vpop.f32.mrb[138].mxu1 }
 0x237   : > { %v2229_v59 = vpop.f32.mrb[10].mxu0  ;;  %v4972_v10 = vadd.f32 %v4850_v9, %v2952_v49  ;;  %v2559_v63 = vpop.f32.mrb[139].mxu1 }
 0x238   : > { %2592 = vst [vmem:[%s4848_s9 + $0x20] sm:$0xff] %v2450_v53  ;;  %v2623_v8 = vadd.f32 %v2622_v31, %v2450_v53  ;;  %v2661_v37 = vmul.f32 %v2450_v53, %v2450_v53  ;;  %v3220_v3 = vadd.f32 %v2229_v59, %v4682_v7  ;;  %v2231_v0 = vpop.f32.mrb[11].mxu0  ;;  %v4977_v51 = vadd.f32 %v4838_v47, %v2559_v63 }
 0x239   : > { %2615 = vst [vmem:[%s4848_s9 + $0xd8] sm:$0xff] %v4972_v10 }
 0x23a   : > { %v2692_v18 = vadd.f32 %v2691_v22, %v2661_v37  ;;  %v2455_v17 = vadd.f32 %v3220_v3, %v4829_v35  ;;  %2614 = vst [vmem:[%s4848_s9 + $0xd0] sm:$0xff] %v4977_v51  ;;  %v2955_v9 = vpop.f32.mrb[140].mxu1  ;;  %v2668_v22 = vmul.f32 %v4866_v58, %v4866_v58 }
 0x23b   : > { %v2234_v23 = vpop.f32.mrb[12].mxu0  ;;  %v4985_v29 = vadd.f32 %v4877_v45, %v2955_v9  ;;  %v2569_v7 = vpop.f32.mrb[141].mxu1 }
 0x23c   : > { %2593 = vst [vmem:[%s4848_s9 + $0x28] sm:$0xff] %v2455_v17  ;;  %v2624_v38 = vadd.f32 %v2623_v8, %v2455_v17  ;;  %v2662_v32 = vmul.f32 %v2455_v17, %v2455_v17  ;;  %v3221_v47 = vadd.f32 %v2234_v23, %v4685_v61  ;;  %v2236_v14 = vpop.f32.mrb[13].mxu0  ;;  %v4990_v56 = vadd.f32 %v4863_v41, %v2569_v7 }
 0x23d   : > { %2617 = vst [vmem:[%s4848_s9 + $0xe8] sm:$0xff] %v4985_v29 }
 0x23e   : > { %v2693_v35 = vadd.f32 %v2692_v18, %v2662_v32  ;;  %v2460_v57 = vadd.f32 %v3221_v47, %v4840_v48  ;;  %2616 = vst [vmem:[%s4848_s9 + $0xe0] sm:$0xff] %v4990_v56  ;;  %v2958_v45 = vpop.f32.mrb[142].mxu1 }
 0x23f   : > { %v2239_v44 = vpop.f32.mrb[14].mxu0  ;;  %v4998_v11 = vadd.f32 %v4905_v6, %v2958_v45  ;;  %v2579_v61 = vpop.f32.mrb[143].mxu1 }
 0x240   : > { %2594 = vst [vmem:[%s4848_s9 + $0x30] sm:$0xff] %v2460_v57  ;;  %v2625_v20 = vadd.f32 %v2624_v38, %v2460_v57  ;;  %v2663_v55 = vmul.f32 %v2460_v57, %v2460_v57  ;;  %v3222_v41 = vadd.f32 %v2239_v44, %v4688_v27  ;;  %v2241_v24 = vpop.f32.mrb[15].mxu0  ;;  %v5003_v28 = vadd.f32 %v4891_v54, %v2579_v61 }
 0x241   : > { %2619 = vst [vmem:[%s4848_s9 + $0xf8] sm:$0xff] %v4998_v11  ;;  %v2666_v54 = vmul.f32 %v4853_v26, %v4853_v26 }
 0x242   : > { %v2694_v48 = vadd.f32 %v2693_v35, %v2663_v55  ;;  %v2465_v13 = vadd.f32 %v3222_v41, %v4836_v50  ;;  %2618 = vst [vmem:[%s4848_s9 + $0xf0] sm:$0xff] %v5003_v28  ;;  %v2667_v50 = vmul.f32 %v4870_v30, %v4870_v30 }
 0x244   : > { %2595 = vst [vmem:[%s4848_s9 + $0x38] sm:$0xff] %v2465_v13  ;;  %v2626_v6 = vadd.f32 %v2625_v20, %v2465_v13  ;;  %v2664_v40 = vmul.f32 %v2465_v13, %v2465_v13 }
 0x246   : > { %v2627_v16 = vadd.f32 %v2626_v6, %v4857_v36  ;;  %v2695_v27 = vadd.f32 %v2694_v48, %v2664_v40  ;;  %v2669_v36 = vmul.f32 %v4884_v1, %v4884_v1 }
 0x248   : > { %v2628_v31 = vadd.f32 %v2627_v16, %v4853_v26  ;;  %v2696_v15 = vadd.f32 %v2695_v27, %v2665_v62  ;;  %v2670_v26 = vmul.f32 %v4880_v5, %v4880_v5 }
 0x24a   : > { %v2629_v46 = vadd.f32 %v2628_v31, %v4870_v30  ;;  %v2697_v60 = vadd.f32 %v2696_v15, %v2666_v54  ;;  %v2671_v30 = vmul.f32 %v4898_v43, %v4898_v43 }
 0x24c   : > { %v2630_v53 = vadd.f32 %v2629_v46, %v4866_v58  ;;  %v2698_v49 = vadd.f32 %v2697_v60, %v2667_v50  ;;  %v2672_v58 = vmul.f32 %v4894_v52, %v4894_v52  ;;  %v2687_v60 = vmul.f32 %v5003_v28, %v5003_v28 }
 0x24e   : > { %v2631_v59 = vadd.f32 %v2630_v53, %v4884_v1  ;;  %v2699_v63 = vadd.f32 %v2698_v49, %v2668_v22  ;;  %v2673_v1 = vmul.f32 %v4912_v39, %v4912_v39  ;;  %v2688_v22 = vmul.f32 %v4998_v11, %v4998_v11 }
 0x250   : > { %v2632_v8 = vadd.f32 %v2631_v59, %v4880_v5  ;;  %v2700_v37 = vadd.f32 %v2699_v63, %v2669_v36  ;;  %v2674_v5 = vmul.f32 %v4908_v19, %v4908_v19 }
 0x252   : > { %v2633_v3 = vadd.f32 %v2632_v8, %v4898_v43  ;;  %v2701_v0 = vadd.f32 %v2700_v37, %v2670_v26  ;;  %v2675_v43 = vmul.f32 %v4925_v42, %v4925_v42 }
 0x254   : > { %v2634_v18 = vadd.f32 %v2633_v3, %v4894_v52  ;;  %v2702_v17 = vadd.f32 %v2701_v0, %v2671_v30  ;;  %v2676_v52 = vmul.f32 %v4920_v4, %v4920_v4 }
 0x256   : > { %v2635_v9 = vadd.f32 %v2634_v18, %v4912_v39  ;;  %v2703_v23 = vadd.f32 %v2702_v17, %v2672_v58  ;;  %v2677_v39 = vmul.f32 %v4938_v21, %v4938_v21 }
 0x258   : > { %v2636_v7 = vadd.f32 %v2635_v9, %v4908_v19  ;;  %v2704_v38 = vadd.f32 %v2703_v23, %v2673_v1  ;;  %v2678_v19 = vmul.f32 %v4933_v2, %v4933_v2 }
 0x25a   : > { %v2705_v32 = vadd.f32 %v2704_v38, %v2674_v5  ;;  %v2637_v47 = vadd.f32 %v2636_v7, %v4925_v42  ;;  %v2679_v42 = vmul.f32 %v4951_v33, %v4951_v33 }
 0x25c   : > { %v2638_v14 = vadd.f32 %v2637_v47, %v4920_v4  ;;  %v2706_v35 = vadd.f32 %v2705_v32, %v2675_v43  ;;  %v2680_v4 = vmul.f32 %v4946_v12, %v4946_v12 }
 0x25e   : > { %v2639_v57 = vadd.f32 %v2638_v14, %v4938_v21  ;;  %v2707_v45 = vadd.f32 %v2706_v35, %v2676_v52  ;;  %v2681_v21 = vmul.f32 %v4964_v25, %v4964_v25 }
 0x260   : > { %v2640_v44 = vadd.f32 %v2639_v57, %v4933_v2  ;;  %v2708_v61 = vadd.f32 %v2707_v45, %v2677_v39  ;;  %v2682_v2 = vmul.f32 %v4959_v34, %v4959_v34 }
 0x262   : > { %v2641_v20 = vadd.f32 %v2640_v44, %v4951_v33  ;;  %v2709_v55 = vadd.f32 %v2708_v61, %v2678_v19  ;;  %v2683_v33 = vmul.f32 %v4977_v51, %v4977_v51 }
 0x264   : > { %v2642_v41 = vadd.f32 %v2641_v20, %v4946_v12  ;;  %v2710_v24 = vadd.f32 %v2709_v55, %v2679_v42  ;;  %v2684_v12 = vmul.f32 %v4972_v10, %v4972_v10 }
 0x266   : > { %v2643_v48 = vadd.f32 %v2642_v41, %v4964_v25  ;;  %v2711_v13 = vadd.f32 %v2710_v24, %v2680_v4  ;;  %v2685_v25 = vmul.f32 %v4990_v56, %v4990_v56 }
 0x268   : > { %v2644_v6 = vadd.f32 %v2643_v48, %v4959_v34  ;;  %v2712_v40 = vadd.f32 %v2711_v13, %v2681_v21  ;;  %v2686_v34 = vmul.f32 %v4985_v29, %v4985_v29 }
 0x26a   : > { %v2645_v62 = vadd.f32 %v2644_v6, %v4977_v51  ;;  %v2713_v16 = vadd.f32 %v2712_v40, %v2682_v2 }
 0x26c   : > { %v2646_v27 = vadd.f32 %v2645_v62, %v4972_v10  ;;  %v2714_v54 = vadd.f32 %v2713_v16, %v2683_v33 }
 0x26e   : > { %v2647_v31 = vadd.f32 %v2646_v27, %v4990_v56  ;;  %v2715_v15 = vadd.f32 %v2714_v54, %v2684_v12 }
 0x270   : > { %v2648_v50 = vadd.f32 %v2647_v31, %v4985_v29  ;;  %v2716_v46 = vadd.f32 %v2715_v15, %v2685_v25 }
 0x272   : > { %v2649_v51 = vadd.f32 %v2648_v50, %v5003_v28  ;;  %v2717_v10 = vadd.f32 %v2716_v46, %v2686_v34 }
 0x274   : > { %v2650_v53 = vadd.f32 %v2649_v51, %v4998_v11  ;;  %v2718_v56 = vadd.f32 %v2717_v10, %v2687_v60 }
 0x276   : > { %v2651_v49 = vrot.slane %v2650_v53, 4  ;;  %v2719_v36 = vadd.f32 %v2718_v56, %v2688_v22 }
 0x278   : > { %v2652_v59 = vadd.f32 %v2651_v49, %v2650_v53  ;;  %v2720_v63 = vrot.slane %v2719_v36, 4 }
 0x27a   : > { %v2653_v26 = vrot.slane %v2652_v59, 2  ;;  %v2721_v29 = vadd.f32 %v2720_v63, %v2719_v36 }
 0x27c   : > { %v2654_v8 = vadd.f32 %v2653_v26, %v2652_v59  ;;  %v2722_v37 = vrot.slane %v2721_v29, 2 }
 0x27e   : > { %v2655_v30 = vrot.slane %v2654_v8, 1  ;;  %v2723_v3 = vadd.f32 %v2722_v37, %v2721_v29 }
 0x280   : > { %v2724_v0 = vrot.slane %v2723_v3, 1  ;;  %v2656_v28 = vadd.f32 %v2655_v30, %v2654_v8 }
 0x282   : > { %v2725_v11 = vadd.f32 %v2724_v0, %v2723_v3 }
 0x284   : > { %v2727_v58 = vsel %vm2726_vm0, %v2656_v28, %v2725_v11 }
 0x285   : > { %2728 = vst [vmem:[%s235_s13] sm:$0x3] %v2727_v58 }
 0x286 PF: > { %s16_s18 = sadd.s32 1, %s3390_s18  }
 0x287   : > { %p13_p4 = scmp.ge.s32.totalorder %s16_s18, 4  }
 0x289   :  { %15 = sbr.rel (!%p13_p4) target bundleno = 1 (0x1), region = 81 }

</bundles_post_ra>
